<compile_context>
chip_gen: v6e
topology: v6e:2x2x1
jax: 0.10.0
libtpu: 0.0.40
codegen_flags: <defaults>
</compile_context>

<pallas_src>
import functools
import math

import jax
import jax.numpy as jnp
from jax.experimental import pallas as pl
from jax.experimental.pallas import tpu as pltpu

_H1, _H2 = 6, 2  # LargeFeatureExtractor hidden widths: data_dim -> 6 -> 2 -> 1

_VMEM = pl.BlockSpec(memory_space=pltpu.MemorySpace.VMEM)
_SMEM = pl.BlockSpec(memory_space=pltpu.MemorySpace.SMEM)


def _round_up(x, k):
    return ((x + k - 1) // k) * k


def _mlp_param_size(d_dim):
    # w1[d,6] + b1[6] + w2[6,2] + b2[2] + w3[2] + b3[1]
    return d_dim * _H1 + _H1 + _H1 * _H2 + _H2 + _H2 + 1


def _mlp_eval(xs, p_ref, d_dim):
    """Linear->Tanh->Linear->Tanh->Linear->Sigmoid on the VPU/EUP.

    xs:    list of d_dim same-shaped arrays (lane-dense [1, L] rows here).
    p_ref: flat SMEM parameter ref (see _mlp_param_size layout).
    """
    o = 0
    w1 = [[p_ref[o + dd * _H1 + k] for k in range(_H1)] for dd in range(d_dim)]
    o += d_dim * _H1
    b1 = [p_ref[o + k] for k in range(_H1)]
    o += _H1
    w2 = [[p_ref[o + k * _H2 + j] for j in range(_H2)] for k in range(_H1)]
    o += _H1 * _H2
    b2 = [p_ref[o + j] for j in range(_H2)]
    o += _H2
    w3 = [p_ref[o + k] for k in range(_H2)]
    o += _H2
    b3 = p_ref[o]

    h1 = []
    for k in range(_H1):
        a = b1[k]
        for dd in range(d_dim):
            a = a + xs[dd] * w1[dd][k]
        h1.append(jnp.tanh(a))
    h2 = []
    for j in range(_H2):
        a = b2[j]
        for k in range(_H1):
            a = a + h1[k] * w2[k][j]
        h2.append(jnp.tanh(a))
    z = b3
    for j in range(_H2):
        z = z + h2[j] * w3[j]
    # Exact sigmoid: one lane-dense vreg, so the extra cost over the approx
    # reciprocal is negligible and it matches the PyTorch sigmoid numerically.
    return 1.0 / (1.0 + jnp.exp(-z))


# ----------------------------------------------------------------------------
# Fused kernel: one lane-dense MLP pass + regional SE covariance blocks
# ----------------------------------------------------------------------------
def _deepgp_kernel(p_ref, x_all_ref, xt_all_ref, ky_ref, kst_ref, kdiag_ref,
                   *, n, m, n_pad8):
    # p_ref      : SMEM [P]          flat MLP params + 1/lengthscale^2 + sf^2 + sn^2
    # x_all_ref  : VMEM [t_pad8, D]  rows 0..n-1 = train, rows n_pad8..n_pad8+m-1 = test
    # xt_all_ref : VMEM [D, t_lane]  same points transposed, lane-dense (128-padded)
    # ky_ref     : VMEM [n, n]       K(train, train) + sn2 * I
    # kst_ref    : VMEM [m, n]       K(test, train)
    # kdiag_ref  : VMEM [m, 1]       diag K(test, test) = sf^2 * h(x_test)^2
    d_dim = x_all_ref.shape[1]
    t_pad8 = x_all_ref.shape[0]
    t_lane = xt_all_ref.shape[1]

    base = _mlp_param_size(d_dim)
    inv_l2 = [p_ref[base + dd] for dd in range(d_dim)]   # 1 / lengthscale_d^2
    sf2 = p_ref[base + d_dim]                            # sigma_f^2
    sn2 = p_ref[base + d_dim + 1]                        # sigma_n^2

    # ---- one lane-dense MLP pass over all (train + test) points -------------
    xs_lane = [xt_all_ref[dd:dd + 1, :] for dd in range(d_dim)]   # each [1, t_lane]
    h_lane = _mlp_eval(xs_lane, p_ref, d_dim)                     # [1, t_lane]

    # Column form of h (lane j -> sublane j) via masked lane-reduce "transpose"
    # (iota equality + XLU lane sum): guaranteed lowering for any small shape.
    rr = jax.lax.broadcasted_iota(jnp.int32, (t_pad8, t_lane), 0)
    cc = jax.lax.broadcasted_iota(jnp.int32, (t_pad8, t_lane), 1)
    h_col = jnp.sum(jnp.where(rr == cc, h_lane, 0.0), axis=1, keepdims=True)  # [t_pad8, 1]

    h_row_tr = h_lane[:, :n]                       # [1, n]  h(x_train), lane axis
    h_col_tr = h_col[:n, :]                        # [n, 1]  h(x_train), sublane axis
    h_col_te = h_col[n_pad8:n_pad8 + m, :]         # [m, 1]  h(x_test)

    xs_row_tr = [xt_all_ref[dd:dd + 1, :n] for dd in range(d_dim)]               # [1, n]
    xs_col_tr = [x_all_ref[:n, dd:dd + 1] for dd in range(d_dim)]                # [n, 1]
    xs_col_te = [x_all_ref[n_pad8:n_pad8 + m, dd:dd + 1] for dd in range(d_dim)]  # [m, 1]

    def se_block(xs_col, h_c):
        # Pairwise scaled squared distances on the VPU broadcast path.
        # (Do NOT move to the MXU for small D — see module docstring.)
        acc = None
        for dd in range(d_dim):
            diff = xs_col[dd] - xs_row_tr[dd]
            term = (diff * diff) * inv_l2[dd]
            acc = term if acc is None else acc + term
        return (h_c * h_row_tr) * (sf2 * jnp.exp(-0.5 * acc))

    # K(train, train) + sn2 * I  -- exact [n, n], diagonal added in-kernel.
    k_tt = se_block(xs_col_tr, h_col_tr)
    ri = jax.lax.broadcasted_iota(jnp.int32, (n, n), 0)
    ci = jax.lax.broadcasted_iota(jnp.int32, (n, n), 1)
    ky_ref[...] = k_tt + jnp.where(ri == ci, sn2, 0.0)

    # K(test, train) -- exact [m, n].
    kst_ref[...] = se_block(xs_col_te, h_col_te)

    # diag K(test, test) for the test rows only.
    kdiag_ref[...] = sf2 * (h_col_te * h_col_te)


# ----------------------------------------------------------------------------
# Parameters (matches PyTorch Linear init distribution; GP_SE_R defaults)
# ----------------------------------------------------------------------------
def _linear_params(key, fan_in, fan_out):
    kw, kb = jax.random.split(key)
    bound = 1.0 / math.sqrt(fan_in)
    w = jax.random.uniform(kw, (fan_in, fan_out), jnp.float32, -bound, bound)
    b = jax.random.uniform(kb, (fan_out,), jnp.float32, -bound, bound)
    return w, b


def init_params(key, data_dim):
    k1, k2, k3 = jax.random.split(key, 3)
    w1, b1 = _linear_params(k1, data_dim, _H1)   # linear1: data_dim -> 6
    w2, b2 = _linear_params(k2, _H1, _H2)        # linear2: 6 -> 2
    w3, b3 = _linear_params(k3, _H2, 1)          # linear3: 2 -> 1

    # GP_SE_R defaults: sigma_f = 1, lengthscale = ones(data_dim), sigma_n = 1
    sigma_f = jnp.ones((1,), jnp.float32)
    lengthscale = jnp.ones((data_dim,), jnp.float32)
    sigma_n = jnp.ones((1,), jnp.float32)

    flat = jnp.concatenate([
        w1.reshape(-1), b1,
        w2.reshape(-1), b2,
        w3.reshape(-1), b3,
        1.0 / (lengthscale ** 2),    # inv_l2 [data_dim]
        sigma_f ** 2,                # sf2 [1]
        sigma_n ** 2,                # sn2 [1]
    ]).astype(jnp.float32)
    return {"flat": flat}


# ----------------------------------------------------------------------------
# DeepGP.forward (x_test given, classify=False)
# ----------------------------------------------------------------------------
def deep_gp_forward(params, x_train, y_train, x_test):
    n, d = x_train.shape
    m = x_test.shape[0]
    n_pad8 = _round_up(n, 8)          # test block starts here (sublane aligned)
    m_pad8 = _round_up(m, 8)
    t_pad8 = n_pad8 + m_pad8          # total rows, 8-aligned
    t_lane = _round_up(t_pad8, 128)   # lane-dense width for the MLP pass

    xtr = x_train.astype(jnp.float32)
    xte = x_test.astype(jnp.float32)

    x_all = (jnp.zeros((t_pad8, d), jnp.float32)
             .at[:n].set(xtr)
             .at[n_pad8:n_pad8 + m].set(xte))
    xt_all = (jnp.zeros((d, t_lane), jnp.float32)
              .at[:, :n].set(xtr.T)
              .at[:, n_pad8:n_pad8 + m].set(xte.T))

    kernel = functools.partial(_deepgp_kernel, n=n, m=m, n_pad8=n_pad8)
    ky, k_st, kdiag = pl.pallas_call(
        kernel,
        out_shape=(jax.ShapeDtypeStruct((n, n), jnp.float32),
                   jax.ShapeDtypeStruct((m, n), jnp.float32),
                   jax.ShapeDtypeStruct((m, 1), jnp.float32)),
        in_specs=[_SMEM, _VMEM, _VMEM],
        out_specs=(_VMEM, _VMEM, _VMEM),
    )(params["flat"], x_all, xt_all)

    # GP posterior (Cholesky solves stay in plain JAX — no clean Pallas equivalent)
    chol = jnp.linalg.cholesky(ky)
    alpha = jax.scipy.linalg.cho_solve(
        (chol, True), y_train.astype(jnp.float32)[:, None])              # [N, 1]
    mean = k_st @ alpha                                                  # [M, 1]
    v = jax.scipy.linalg.solve_triangular(chol, k_st.T, lower=True)      # [N, M]
    var = jnp.maximum(kdiag[:, 0] - jnp.sum(v * v, axis=0), 0.0)         # [M]
    return mean[:, 0], var


# ----------------------------------------------------------------------------
if __name__ == "__main__":
    n_train, n_test, data_dim = 40, 8, 1   # n = 40, train_x = Tensor(n, 1) in the module

    key = jax.random.PRNGKey(0)
    k_x, k_y, k_t, k_p = jax.random.split(key, 4)
    x_train = jax.random.normal(k_x, (n_train, data_dim), jnp.float32)
    y_train = jnp.sin(3.0 * x_train[:, 0]) + 0.1 * jax.random.normal(
        k_y, (n_train,), jnp.float32
    )
    x_test = jax.random.normal(k_t, (n_test, data_dim), jnp.float32)

    params = init_params(k_p, data_dim)

    fwd = jax.jit(lambda a, b, c: deep_gp_forward(params, a, b, c))
    mean, var = fwd(x_train, y_train, x_test)
    jax.block_until_ready((mean, var))

    assert mean.shape == (n_test,) and var.shape == (n_test,)
    assert bool(jnp.all(jnp.isfinite(mean))) and bool(jnp.all(jnp.isfinite(var)))
    assert bool(jnp.all(var >= 0.0))
    print("KERNEL_OK")
</pallas_src>

<mosaic_0001>
module attributes {stable_mosaic.version = 11 : i64} {
  func.func @_deepgp_kernel(%arg0: memref<32xf32, #tpu.memory_space<smem>>, %arg1: memref<48x1xf32, #tpu.memory_space<vmem>>, %arg2: memref<1x128xf32, #tpu.memory_space<vmem>>, %arg3: memref<40x40xf32, #tpu.memory_space<vmem>>, %arg4: memref<8x40xf32, #tpu.memory_space<vmem>>, %arg5: memref<8x1xf32, #tpu.memory_space<vmem>>) attributes {dimension_semantics = [], scalar_prefetch = 0 : i64, scratch_operands = 0 : i64, tpu.core_type = #tpu.core_type<tc>} {
    %c29 = arith.constant 29 : index
    %0 = memref.load %arg0[%c29] : memref<32xf32, #tpu.memory_space<smem>>
    %c30 = arith.constant 30 : index
    %1 = memref.load %arg0[%c30] : memref<32xf32, #tpu.memory_space<smem>>
    %c31 = arith.constant 31 : index
    %2 = memref.load %arg0[%c31] : memref<32xf32, #tpu.memory_space<smem>>
    %c0 = arith.constant 0 : index
    %c0_0 = arith.constant 0 : index
    %3 = vector.load %arg2[%c0, %c0_0] : memref<1x128xf32, #tpu.memory_space<vmem>>, vector<1x128xf32>
    %c0_1 = arith.constant 0 : index
    %4 = memref.load %arg0[%c0_1] : memref<32xf32, #tpu.memory_space<smem>>
    %c1 = arith.constant 1 : index
    %5 = memref.load %arg0[%c1] : memref<32xf32, #tpu.memory_space<smem>>
    %c2 = arith.constant 2 : index
    %6 = memref.load %arg0[%c2] : memref<32xf32, #tpu.memory_space<smem>>
    %c3 = arith.constant 3 : index
    %7 = memref.load %arg0[%c3] : memref<32xf32, #tpu.memory_space<smem>>
    %c4 = arith.constant 4 : index
    %8 = memref.load %arg0[%c4] : memref<32xf32, #tpu.memory_space<smem>>
    %c5 = arith.constant 5 : index
    %9 = memref.load %arg0[%c5] : memref<32xf32, #tpu.memory_space<smem>>
    %c6 = arith.constant 6 : index
    %10 = memref.load %arg0[%c6] : memref<32xf32, #tpu.memory_space<smem>>
    %c7 = arith.constant 7 : index
    %11 = memref.load %arg0[%c7] : memref<32xf32, #tpu.memory_space<smem>>
    %c8 = arith.constant 8 : index
    %12 = memref.load %arg0[%c8] : memref<32xf32, #tpu.memory_space<smem>>
    %c9 = arith.constant 9 : index
    %13 = memref.load %arg0[%c9] : memref<32xf32, #tpu.memory_space<smem>>
    %c10 = arith.constant 10 : index
    %14 = memref.load %arg0[%c10] : memref<32xf32, #tpu.memory_space<smem>>
    %c11 = arith.constant 11 : index
    %15 = memref.load %arg0[%c11] : memref<32xf32, #tpu.memory_space<smem>>
    %c12 = arith.constant 12 : index
    %16 = memref.load %arg0[%c12] : memref<32xf32, #tpu.memory_space<smem>>
    %c13 = arith.constant 13 : index
    %17 = memref.load %arg0[%c13] : memref<32xf32, #tpu.memory_space<smem>>
    %c14 = arith.constant 14 : index
    %18 = memref.load %arg0[%c14] : memref<32xf32, #tpu.memory_space<smem>>
    %c15 = arith.constant 15 : index
    %19 = memref.load %arg0[%c15] : memref<32xf32, #tpu.memory_space<smem>>
    %c16 = arith.constant 16 : index
    %20 = memref.load %arg0[%c16] : memref<32xf32, #tpu.memory_space<smem>>
    %c17 = arith.constant 17 : index
    %21 = memref.load %arg0[%c17] : memref<32xf32, #tpu.memory_space<smem>>
    %c18 = arith.constant 18 : index
    %22 = memref.load %arg0[%c18] : memref<32xf32, #tpu.memory_space<smem>>
    %c19 = arith.constant 19 : index
    %23 = memref.load %arg0[%c19] : memref<32xf32, #tpu.memory_space<smem>>
    %c20 = arith.constant 20 : index
    %24 = memref.load %arg0[%c20] : memref<32xf32, #tpu.memory_space<smem>>
    %c21 = arith.constant 21 : index
    %25 = memref.load %arg0[%c21] : memref<32xf32, #tpu.memory_space<smem>>
    %c22 = arith.constant 22 : index
    %26 = memref.load %arg0[%c22] : memref<32xf32, #tpu.memory_space<smem>>
    %c23 = arith.constant 23 : index
    %27 = memref.load %arg0[%c23] : memref<32xf32, #tpu.memory_space<smem>>
    %c24 = arith.constant 24 : index
    %28 = memref.load %arg0[%c24] : memref<32xf32, #tpu.memory_space<smem>>
    %c25 = arith.constant 25 : index
    %29 = memref.load %arg0[%c25] : memref<32xf32, #tpu.memory_space<smem>>
    %c26 = arith.constant 26 : index
    %30 = memref.load %arg0[%c26] : memref<32xf32, #tpu.memory_space<smem>>
    %c27 = arith.constant 27 : index
    %31 = memref.load %arg0[%c27] : memref<32xf32, #tpu.memory_space<smem>>
    %c28 = arith.constant 28 : index
    %32 = memref.load %arg0[%c28] : memref<32xf32, #tpu.memory_space<smem>>
    %33 = vector.broadcast %4 : f32 to vector<1x128xf32>
    %34 = arith.mulf %3, %33 : vector<1x128xf32>
    %35 = vector.broadcast %10 : f32 to vector<1x128xf32>
    %36 = arith.addf %35, %34 : vector<1x128xf32>
    %37 = math.tanh %36 : vector<1x128xf32>
    %38 = vector.broadcast %5 : f32 to vector<1x128xf32>
    %39 = arith.mulf %3, %38 : vector<1x128xf32>
    %40 = vector.broadcast %11 : f32 to vector<1x128xf32>
    %41 = arith.addf %40, %39 : vector<1x128xf32>
    %42 = math.tanh %41 : vector<1x128xf32>
    %43 = vector.broadcast %6 : f32 to vector<1x128xf32>
    %44 = arith.mulf %3, %43 : vector<1x128xf32>
    %45 = vector.broadcast %12 : f32 to vector<1x128xf32>
    %46 = arith.addf %45, %44 : vector<1x128xf32>
    %47 = math.tanh %46 : vector<1x128xf32>
    %48 = vector.broadcast %7 : f32 to vector<1x128xf32>
    %49 = arith.mulf %3, %48 : vector<1x128xf32>
    %50 = vector.broadcast %13 : f32 to vector<1x128xf32>
    %51 = arith.addf %50, %49 : vector<1x128xf32>
    %52 = math.tanh %51 : vector<1x128xf32>
    %53 = vector.broadcast %8 : f32 to vector<1x128xf32>
    %54 = arith.mulf %3, %53 : vector<1x128xf32>
    %55 = vector.broadcast %14 : f32 to vector<1x128xf32>
    %56 = arith.addf %55, %54 : vector<1x128xf32>
    %57 = math.tanh %56 : vector<1x128xf32>
    %58 = vector.broadcast %9 : f32 to vector<1x128xf32>
    %59 = arith.mulf %3, %58 : vector<1x128xf32>
    %60 = vector.broadcast %15 : f32 to vector<1x128xf32>
    %61 = arith.addf %60, %59 : vector<1x128xf32>
    %62 = math.tanh %61 : vector<1x128xf32>
    %63 = vector.broadcast %16 : f32 to vector<1x128xf32>
    %64 = arith.mulf %37, %63 : vector<1x128xf32>
    %65 = vector.broadcast %28 : f32 to vector<1x128xf32>
    %66 = arith.addf %65, %64 : vector<1x128xf32>
    %67 = vector.broadcast %18 : f32 to vector<1x128xf32>
    %68 = arith.mulf %42, %67 : vector<1x128xf32>
    %69 = arith.addf %66, %68 : vector<1x128xf32>
    %70 = vector.broadcast %20 : f32 to vector<1x128xf32>
    %71 = arith.mulf %47, %70 : vector<1x128xf32>
    %72 = arith.addf %69, %71 : vector<1x128xf32>
    %73 = vector.broadcast %22 : f32 to vector<1x128xf32>
    %74 = arith.mulf %52, %73 : vector<1x128xf32>
    %75 = arith.addf %72, %74 : vector<1x128xf32>
    %76 = vector.broadcast %24 : f32 to vector<1x128xf32>
    %77 = arith.mulf %57, %76 : vector<1x128xf32>
    %78 = arith.addf %75, %77 : vector<1x128xf32>
    %79 = vector.broadcast %26 : f32 to vector<1x128xf32>
    %80 = arith.mulf %62, %79 : vector<1x128xf32>
    %81 = arith.addf %78, %80 : vector<1x128xf32>
    %82 = math.tanh %81 : vector<1x128xf32>
    %83 = vector.broadcast %17 : f32 to vector<1x128xf32>
    %84 = arith.mulf %37, %83 : vector<1x128xf32>
    %85 = vector.broadcast %29 : f32 to vector<1x128xf32>
    %86 = arith.addf %85, %84 : vector<1x128xf32>
    %87 = vector.broadcast %19 : f32 to vector<1x128xf32>
    %88 = arith.mulf %42, %87 : vector<1x128xf32>
    %89 = arith.addf %86, %88 : vector<1x128xf32>
    %90 = vector.broadcast %21 : f32 to vector<1x128xf32>
    %91 = arith.mulf %47, %90 : vector<1x128xf32>
    %92 = arith.addf %89, %91 : vector<1x128xf32>
    %93 = vector.broadcast %23 : f32 to vector<1x128xf32>
    %94 = arith.mulf %52, %93 : vector<1x128xf32>
    %95 = arith.addf %92, %94 : vector<1x128xf32>
    %96 = vector.broadcast %25 : f32 to vector<1x128xf32>
    %97 = arith.mulf %57, %96 : vector<1x128xf32>
    %98 = arith.addf %95, %97 : vector<1x128xf32>
    %99 = vector.broadcast %27 : f32 to vector<1x128xf32>
    %100 = arith.mulf %62, %99 : vector<1x128xf32>
    %101 = arith.addf %98, %100 : vector<1x128xf32>
    %102 = math.tanh %101 : vector<1x128xf32>
    %103 = vector.broadcast %30 : f32 to vector<1x128xf32>
    %104 = arith.mulf %82, %103 : vector<1x128xf32>
    %105 = vector.broadcast %32 : f32 to vector<1x128xf32>
    %106 = arith.addf %105, %104 : vector<1x128xf32>
    %107 = vector.broadcast %31 : f32 to vector<1x128xf32>
    %108 = arith.mulf %102, %107 : vector<1x128xf32>
    %109 = arith.addf %106, %108 : vector<1x128xf32>
    %cst = arith.constant 0.000000e+00 : f32
    %110 = vector.broadcast %cst : f32 to vector<1x128xf32>
    %111 = arith.subf %110, %109 : vector<1x128xf32>
    %112 = math.exp %111 : vector<1x128xf32>
    %cst_2 = arith.constant 1.000000e+00 : f32
    %113 = vector.broadcast %cst_2 : f32 to vector<1x128xf32>
    %114 = arith.addf %113, %112 : vector<1x128xf32>
    %cst_3 = arith.constant 1.000000e+00 : f32
    %115 = vector.broadcast %cst_3 : f32 to vector<1x128xf32>
    %116 = arith.divf %115, %114 : vector<1x128xf32>
    %117 = tpu.iota {dimensions = array<i32: 0>} : vector<48x128xi32>
    %118 = tpu.iota {dimensions = array<i32: 1>} : vector<48x128xi32>
    %119 = arith.cmpi eq, %117, %118 : vector<48x128xi32>
    %cst_4 = arith.constant 0.000000e+00 : f32
    %120 = vector.shape_cast %116 : vector<1x128xf32> to vector<1x128xf32>
    %121 = vector.broadcast %120 : vector<1x128xf32> to vector<48x128xf32>
    %122 = vector.broadcast %cst_4 : f32 to vector<48x128xf32>
    %123 = arith.select %119, %121, %122 : vector<48x128xi1>, vector<48x128xf32>
    %cst_5 = arith.constant dense<0.000000e+00> : vector<48xf32>
    %124 = vector.multi_reduction <add>, %123, %cst_5 [1] : vector<48x128xf32> to vector<48xf32>
    %125 = vector.shape_cast %124 : vector<48xf32> to vector<48x1xf32>
    %126 = vector.extract_strided_slice %116 {offsets = [0, 0], sizes = [1, 40], strides = [1, 1]} : vector<1x128xf32> to vector<1x40xf32>
    %127 = vector.extract_strided_slice %125 {offsets = [0, 0], sizes = [40, 1], strides = [1, 1]} : vector<48x1xf32> to vector<40x1xf32>
    %128 = vector.extract_strided_slice %125 {offsets = [40, 0], sizes = [8, 1], strides = [1, 1]} : vector<48x1xf32> to vector<8x1xf32>
    %c0_6 = arith.constant 0 : index
    %c0_7 = arith.constant 0 : index
    %129 = vector.load %arg2[%c0_6, %c0_7] : memref<1x128xf32, #tpu.memory_space<vmem>>, vector<1x40xf32>
    %c0_8 = arith.constant 0 : index
    %c0_9 = arith.constant 0 : index
    %130 = vector.load %arg1[%c0_8, %c0_9] : memref<48x1xf32, #tpu.memory_space<vmem>>, vector<40x1xf32>
    %c40 = arith.constant 40 : index
    %c0_10 = arith.constant 0 : index
    %131 = vector.load %arg1[%c40, %c0_10] : memref<48x1xf32, #tpu.memory_space<vmem>>, vector<8x1xf32>
    %132 = vector.broadcast %130 : vector<40x1xf32> to vector<40x40xf32>
    %133 = vector.broadcast %129 : vector<1x40xf32> to vector<40x40xf32>
    %134 = arith.subf %132, %133 : vector<40x40xf32>
    %135 = arith.mulf %134, %134 : vector<40x40xf32>
    %136 = vector.broadcast %0 : f32 to vector<40x40xf32>
    %137 = arith.mulf %135, %136 : vector<40x40xf32>
    %138 = vector.broadcast %127 : vector<40x1xf32> to vector<40x40xf32>
    %139 = vector.broadcast %126 : vector<1x40xf32> to vector<40x40xf32>
    %140 = arith.mulf %138, %139 : vector<40x40xf32>
    %cst_11 = arith.constant -5.000000e-01 : f32
    %141 = vector.broadcast %cst_11 : f32 to vector<40x40xf32>
    %142 = arith.mulf %141, %137 : vector<40x40xf32>
    %143 = math.exp %142 : vector<40x40xf32>
    %144 = vector.broadcast %1 : f32 to vector<40x40xf32>
    %145 = arith.mulf %144, %143 : vector<40x40xf32>
    %146 = arith.mulf %140, %145 : vector<40x40xf32>
    %147 = tpu.iota {dimensions = array<i32: 0>} : vector<40x40xi32>
    %148 = tpu.iota {dimensions = array<i32: 1>} : vector<40x40xi32>
    %149 = arith.cmpi eq, %147, %148 : vector<40x40xi32>
    %cst_12 = arith.constant 0.000000e+00 : f32
    %150 = vector.broadcast %2 : f32 to vector<40x40xf32>
    %151 = vector.broadcast %cst_12 : f32 to vector<40x40xf32>
    %152 = arith.select %149, %150, %151 : vector<40x40xi1>, vector<40x40xf32>
    %153 = arith.addf %146, %152 : vector<40x40xf32>
    %c0_13 = arith.constant 0 : index
    %c0_14 = arith.constant 0 : index
    %154 = vector.load %arg3[%c0_13, %c0_14] : memref<40x40xf32, #tpu.memory_space<vmem>>, vector<40x40xf32>
    tpu.vector_store %arg3[%c0_13, %c0_14], %153 {strides = array<i32>} : memref<40x40xf32, #tpu.memory_space<vmem>>, vector<40x40xf32>,
    %155 = vector.broadcast %131 : vector<8x1xf32> to vector<8x40xf32>
    %156 = vector.broadcast %129 : vector<1x40xf32> to vector<8x40xf32>
    %157 = arith.subf %155, %156 : vector<8x40xf32>
    %158 = arith.mulf %157, %157 : vector<8x40xf32>
    %159 = vector.broadcast %0 : f32 to vector<8x40xf32>
    %160 = arith.mulf %158, %159 : vector<8x40xf32>
    %161 = vector.broadcast %128 : vector<8x1xf32> to vector<8x40xf32>
    %162 = vector.broadcast %126 : vector<1x40xf32> to vector<8x40xf32>
    %163 = arith.mulf %161, %162 : vector<8x40xf32>
    %cst_15 = arith.constant -5.000000e-01 : f32
    %164 = vector.broadcast %cst_15 : f32 to vector<8x40xf32>
    %165 = arith.mulf %164, %160 : vector<8x40xf32>
    %166 = math.exp %165 : vector<8x40xf32>
    %167 = vector.broadcast %1 : f32 to vector<8x40xf32>
    %168 = arith.mulf %167, %166 : vector<8x40xf32>
    %169 = arith.mulf %163, %168 : vector<8x40xf32>
    %c0_16 = arith.constant 0 : index
    %c0_17 = arith.constant 0 : index
    %170 = vector.load %arg4[%c0_16, %c0_17] : memref<8x40xf32, #tpu.memory_space<vmem>>, vector<8x40xf32>
    tpu.vector_store %arg4[%c0_16, %c0_17], %169 {strides = array<i32>} : memref<8x40xf32, #tpu.memory_space<vmem>>, vector<8x40xf32>,
    %171 = arith.mulf %128, %128 : vector<8x1xf32>
    %172 = vector.broadcast %1 : f32 to vector<8x1xf32>
    %173 = arith.mulf %172, %171 : vector<8x1xf32>
    %c0_18 = arith.constant 0 : index
    %c0_19 = arith.constant 0 : index
    %174 = vector.load %arg5[%c0_18, %c0_19] : memref<8x1xf32, #tpu.memory_space<vmem>>, vector<8x1xf32>
    tpu.vector_store %arg5[%c0_18, %c0_19], %173 {strides = array<i32>} : memref<8x1xf32, #tpu.memory_space<vmem>>, vector<8x1xf32>,
    return
  }
}

</mosaic_0001>

<bundles_post_ra>
// kernel: custom-call.8
= control target key start
LH: loop header
LB: loop body
LE: loop exit
PB: predicated region body
PF: predicated region fallthrough
CT: control target
= control target key end

     0   :  { %v2204_v0 = vmov 0.0   ;;  %vm60_vm0 = vcmask 7168   ;;  %vm130_vm1 = vcmask 15368   ;;  %vm147_vm2 = vcmask 1047553   ;;  %s2833_s0 = inlined_call_operand.vmem [shape: f32[40,40], index: 0, kind: input, shape index: {}]   ;;  %s2834_s1 = inlined_call_operand.vmem [shape: f32[40,40], index: 1, kind: output, shape index: {}]  }
   0x1   :  { %51 = vst [vmem:[#allocation1] sm:$0xff] %v2204_v0  ;;  %v2220_v4 = vld [vmem:[%s2833_s0] sm:$0xff]  ;;  %v2238_v16 = vld [vmem:[%s2833_s0 + $0x8] sm:$0xff]  ;;  %vm148_vm3 = vmand %vm130_vm1, %vm147_vm2  ;;  %vm204_vm4 = vcmask 23568   ;;  %vm221_vm5 = vcmask 1047554   ;;  %vm278_vm7 = vcmask 31768  }
   0x2   :  { %39 = vst [vmem:[#allocation0] sm:$0xff] %v2220_v4  ;;  %41 = vst [vmem:[#allocation0 + $0x8] sm:$0xff] %v2238_v16  ;;  %v2260_v34 = vld [vmem:[%s2833_s0 + $0x10] sm:$0xff]  ;;  %v2281_v55 = vld [vmem:[%s2833_s0 + $0x18] sm:$0xff]  ;;  %vm295_vm8 = vcmask 1047555   ;;  %vm352_vm10 = vcmask 39968  }
   0x3   :  { %43 = vst [vmem:[#allocation0 + $0x10] sm:$0xff] %v2260_v34  ;;  %vm222_vm6 = vmand %vm204_vm4, %vm221_vm5  ;;  %vm369_vm11 = vcmask 1047556   ;;  %vm426_vm13 = vcmask 48168   ;;  %vm443_vm14 = vcmask 1047557  }
   0x4   :  { %45 = vst [vmem:[#allocation0 + $0x18] sm:$0xff] %v2281_v55  ;;  %vm296_vm9 = vmand %vm278_vm7, %vm295_vm8 }
   0x5   :  { %vm370_vm12 = vmand %vm352_vm10, %vm369_vm11 }
   0x6   :  { %vm444_vm15 = vmand %vm426_vm13, %vm443_vm14 }
   0x8   :  { %v61_v1 = vld [vmem:[#allocation1] ss:$0 sm:$0xff] }
   0x9   :  { %v63_v2 = vmul.f32 %v61_v1, %v61_v1  ;;  %v2215_v3 = vmul.f32 0.0, %v61_v1  ;;  %v62_v5 = vld [vmem:[#allocation0] ss:$0 sm:$0xff]  ;;  %v134_v17 = vld [vmem:[#allocation0 + $0x1] ss:$0 sm:$0xff] }
   0xa   :  { %v208_v41 = vld [vmem:[#allocation0 + $0x2] ss:$0 sm:$0xff] }
   0xb   :  { %64 = vadd.xlane.f32.xlu0 %v63_v2 }
   0xf   :  { %71 = vadd.xlane.f32.xlu0 %v2215_v3 }
  0x94   :  { %v65_v6 = vpop.xlane.xlu0 %64 }
  0x95   :  { %v66_v7 = vsub.f32 %v62_v5, %v65_v6 }
  0x97   :  { %2122 = vrsqrt.f32 %v66_v7 }
  0x98   :  { %v72_v8 = vpop.xlane.xlu0 %71 }
  0x99   :  { %v73_v9 = vsub.f32 %v2220_v4, %v72_v8 }
  0xa4   :  { %v2225_v10 = vpop.eup %2122 }
  0xa5   :  { %v74_v11 = vmul.f32 %v2225_v10, %v73_v9  ;;  %v282_v9 = vld [vmem:[#allocation0 + $0x3] ss:$0 sm:$0xff] }
  0xa7   :  { %v75_v12 = vsel %vm60_vm0, %v74_v11, 0.0 }
  0xa8   :  { %77 = vst [vmem:[#allocation1] sm:$0xff] %v75_v12 }
  0xaf   :  { %v2229_v13 = vld [vmem:[#allocation1 + $0x1] ss:$0 sm:$0xff] }
  0xb0   :  { %v142_v14 = vmul.f32 %v2229_v13, %v75_v12  ;;  %v135_v15 = vmul.f32 %v2229_v13, %v2229_v13 }
  0xb2   :  { %143 = vadd.xlane.f32.xlu0 %v142_v14  ;;  %136 = vadd.xlane.f32.xlu1 %v135_v15 }
  0xb6   :  { %83 = vadd.xlane.f32.xlu1 %v2215_v3 }
 0x13b   :  { %v137_v18 = vpop.xlane.xlu1 %136  ;;  %v144_v24 = vpop.xlane.xlu0 %143 }
 0x13c   :  { %v138_v19 = vsub.f32 %v134_v17, %v137_v18  ;;  %v145_v26 = vsub.f32 %v2220_v4, %v144_v24 }
 0x13e   :  { %2124 = vrsqrt.f32 %v138_v19 }
 0x13f   :  { %v84_v20 = vpop.xlane.xlu1 %83 }
 0x140   :  { %v85_v21 = vsub.f32 %v2238_v16, %v84_v20 }
 0x142   :  { %v86_v22 = vmul.f32 %v2225_v10, %v85_v21 }
 0x144   :  { %v87_v23 = vsel %vm60_vm0, %v86_v22, 0.0 }
 0x145   :  { %v156_v25 = vmul.f32 %v2229_v13, %v87_v23 }
 0x147   :  { %157 = vadd.xlane.f32.xlu1 %v156_v25 }
 0x14b   :  { %v2246_v27 = vpop.eup %2124 }
 0x14c   :  { %v146_v28 = vmul.f32 %v2246_v27, %v145_v26 }
 0x14e   :  { %v149_v29 = vsel %vm148_vm3, %v146_v28, 0.0 }
 0x14f   :  { %v150_v30 = vadd.f32 %v149_v29, %v75_v12 }
 0x151   :  { %151 = vst [vmem:[#allocation1] sm:$0xff] %v150_v30 }
 0x158   :  { %v2251_v31 = vld [vmem:[#allocation1 + $0x2] ss:$0 sm:$0xff] }
 0x159   :  { %v209_v32 = vmul.f32 %v2251_v31, %v2251_v31  ;;  %v216_v33 = vmul.f32 %v2251_v31, %v150_v30 }
 0x15b   :  { %210 = vadd.xlane.f32.xlu0 %v209_v32  ;;  %217 = vadd.xlane.f32.xlu1 %v216_v33 }
 0x15f   :  { %96 = vadd.xlane.f32.xlu0 %v2215_v3 }
 0x1d0   :  { %v158_v35 = vpop.xlane.xlu1 %157 }
 0x1d1   :  { %v159_v36 = vsub.f32 %v2238_v16, %v158_v35 }
 0x1d3   :  { %v160_v37 = vmul.f32 %v2246_v27, %v159_v36 }
 0x1d5   :  { %v161_v38 = vsel %vm130_vm1, %v160_v37, 0.0 }
 0x1d6   :  { %v162_v39 = vadd.f32 %v161_v38, %v87_v23 }
 0x1d8   :  { %v230_v40 = vmul.f32 %v2251_v31, %v162_v39 }
 0x1da   :  { %231 = vadd.xlane.f32.xlu1 %v230_v40 }
 0x1e4   :  { %v211_v42 = vpop.xlane.xlu0 %210  ;;  %v218_v48 = vpop.xlane.xlu1 %217 }
 0x1e5   :  { %v212_v43 = vsub.f32 %v208_v41, %v211_v42  ;;  %v219_v50 = vsub.f32 %v2220_v4, %v218_v48 }
 0x1e7   :  { %2126 = vrsqrt.f32 %v212_v43 }
 0x1e8   :  { %v97_v44 = vpop.xlane.xlu0 %96 }
 0x1e9   :  { %v98_v45 = vsub.f32 %v2260_v34, %v97_v44  ;;  %v356_v44 = vld [vmem:[#allocation0 + $0x4] ss:$0 sm:$0xff] }
 0x1eb   :  { %v99_v46 = vmul.f32 %v2225_v10, %v98_v45 }
 0x1ed   :  { %v100_v47 = vsel %vm60_vm0, %v99_v46, 0.0 }
 0x1ee   :  { %v169_v49 = vmul.f32 %v2229_v13, %v100_v47 }
 0x1f0   :  { %170 = vadd.xlane.f32.xlu1 %v169_v49 }
 0x1f4   :  { %v2272_v51 = vpop.eup %2126  ;;  %109 = vadd.xlane.f32.xlu1 %v2215_v3 }
 0x1f5   :  { %v220_v52 = vmul.f32 %v2272_v51, %v219_v50 }
 0x1f7   :  { %v223_v53 = vsel %vm222_vm6, %v220_v52, 0.0  ;;  %vm648_vm6 = vcmask 72768  }
 0x1f8   :  { %v224_v54 = vadd.f32 %v223_v53, %v150_v30  ;;  %v2316_v30 = vld [vmem:[%s2833_s0 + $0x20] sm:$0xff] }
 0x1f9   :  { %47 = vst [vmem:[#allocation0 + $0x20] sm:$0xff] %v2316_v30 }
 0x1fa   :  { %225 = vst [vmem:[#allocation1] sm:$0xff] %v224_v54 }
 0x201   :  { %v2284_v56 = vld [vmem:[#allocation1 + $0x3] ss:$0 sm:$0xff] }
 0x202   :  { %v283_v57 = vmul.f32 %v2284_v56, %v2284_v56  ;;  %v290_v58 = vmul.f32 %v2284_v56, %v224_v54 }
 0x204   :  { %284 = vadd.xlane.f32.xlu0 %v283_v57 }
 0x208   :  { %291 = vadd.xlane.f32.xlu0 %v290_v58 }
 0x263   :  { %v232_v59 = vpop.xlane.xlu1 %231 }
 0x264   :  { %v233_v60 = vsub.f32 %v2238_v16, %v232_v59 }
 0x266   :  { %v234_v61 = vmul.f32 %v2272_v51, %v233_v60 }
 0x268   :  { %v235_v62 = vsel %vm204_vm4, %v234_v61, 0.0 }
 0x269   :  { %v236_v63 = vadd.f32 %v235_v62, %v162_v39 }
 0x26b   :  { %v304_v0 = vmul.f32 %v2284_v56, %v236_v63 }
 0x26d   :  { %305 = vadd.xlane.f32.xlu0 %v304_v0 }
 0x279   :  { %v171_v1 = vpop.xlane.xlu1 %170 }
 0x27a   :  { %v172_v2 = vsub.f32 %v2260_v34, %v171_v1 }
 0x27c   :  { %v173_v5 = vmul.f32 %v2246_v27, %v172_v2 }
 0x27d   :  { %v110_v18 = vpop.xlane.xlu1 %109 }
 0x27e   :  { %v174_v6 = vsel %vm130_vm1, %v173_v5, 0.0  ;;  %v111_v20 = vsub.f32 %v2281_v55, %v110_v18 }
 0x27f   :  { %v175_v7 = vadd.f32 %v174_v6, %v100_v47 }
 0x280   :  { %v112_v23 = vmul.f32 %v2225_v10, %v111_v20 }
 0x281   :  { %v243_v8 = vmul.f32 %v2251_v31, %v175_v7 }
 0x282   :  { %v113_v24 = vsel %vm60_vm0, %v112_v23, 0.0 }
 0x283   :  { %244 = vadd.xlane.f32.xlu1 %v243_v8  ;;  %v182_v29 = vmul.f32 %v2229_v13, %v113_v24 }
 0x28d   :  { %v285_v11 = vpop.xlane.xlu0 %284 }
 0x28e   :  { %v286_v12 = vsub.f32 %v282_v9, %v285_v11 }
 0x290   :  { %2128 = vrsqrt.f32 %v286_v12 }
 0x291   :  { %v292_v14 = vpop.xlane.xlu0 %291 }
 0x292   :  { %v293_v15 = vsub.f32 %v2220_v4, %v292_v14 }
 0x29d   :  { %v2298_v17 = vpop.eup %2128 }
 0x29e   :  { %v294_v19 = vmul.f32 %v2298_v17, %v293_v15 }
 0x2a0   :  { %v297_v21 = vsel %vm296_vm9, %v294_v19, 0.0 }
 0x2a1   :  { %v298_v22 = vadd.f32 %v297_v21, %v224_v54 }
 0x2a3   :  { %299 = vst [vmem:[#allocation1] sm:$0xff] %v298_v22 }
 0x2aa   :  { %v2306_v25 = vld [vmem:[#allocation1 + $0x4] ss:$0 sm:$0xff] }
 0x2ab   :  { %v357_v26 = vmul.f32 %v2306_v25, %v2306_v25  ;;  %v364_v28 = vmul.f32 %v2306_v25, %v298_v22 }
 0x2ad   :  { %358 = vadd.xlane.f32.xlu0 %v357_v26  ;;  %365 = vadd.xlane.f32.xlu1 %v364_v28 }
 0x2b1   :  { %122 = vadd.xlane.f32.xlu1 %v2215_v3  ;;  %183 = vadd.xlane.f32.xlu0 %v182_v29 }
 0x2f6   :  { %v306_v32 = vpop.xlane.xlu0 %305 }
 0x2f7   :  { %v307_v33 = vsub.f32 %v2238_v16, %v306_v32  ;;  %v430_v32 = vld [vmem:[#allocation0 + $0x5] ss:$0 sm:$0xff] }
 0x2f9   :  { %v308_v35 = vmul.f32 %v2298_v17, %v307_v33 }
 0x2fb   :  { %v309_v36 = vsel %vm278_vm7, %v308_v35, 0.0 }
 0x2fc   :  { %v310_v37 = vadd.f32 %v309_v36, %v236_v63 }
 0x2fe   :  { %v378_v38 = vmul.f32 %v2306_v25, %v310_v37 }
 0x300   :  { %379 = vadd.xlane.f32.xlu0 %v378_v38 }
 0x30c   :  { %v245_v3 = vpop.xlane.xlu1 %244 }
 0x30d   :  { %v246_v39 = vsub.f32 %v2260_v34, %v245_v3 }
 0x30f   :  { %v247_v40 = vmul.f32 %v2272_v51, %v246_v39 }
 0x311   :  { %v248_v41 = vsel %vm204_vm4, %v247_v40, 0.0 }
 0x312   :  { %v249_v42 = vadd.f32 %v248_v41, %v175_v7 }
 0x314   :  { %v317_v43 = vmul.f32 %v2284_v56, %v249_v42 }
 0x316   :  { %318 = vadd.xlane.f32.xlu1 %v317_v43 }
 0x336   :  { %v359_v45 = vpop.xlane.xlu0 %358  ;;  %v366_v46 = vpop.xlane.xlu1 %365 }
 0x337   :  { %v360_v47 = vsub.f32 %v356_v44, %v359_v45  ;;  %v367_v61 = vsub.f32 %v2220_v4, %v366_v46 }
 0x339   :  { %2130 = vrsqrt.f32 %v360_v47 }
 0x33a   :  { %v184_v48 = vpop.xlane.xlu0 %183  ;;  %v123_v49 = vpop.xlane.xlu1 %122 }
 0x33b   :  { %v185_v50 = vsub.f32 %v2281_v55, %v184_v48  ;;  %v124_v52 = vsub.f32 %v2316_v30, %v123_v49 }
 0x33d   :  { %v186_v53 = vmul.f32 %v2246_v27, %v185_v50  ;;  %v125_v54 = vmul.f32 %v2225_v10, %v124_v52 }
 0x33f   :  { %v187_v57 = vsel %vm130_vm1, %v186_v53, 0.0  ;;  %v126_v58 = vsel %vm60_vm0, %v125_v54, 0.0  ;;  %vm500_vm0 = vcmask 56368  }
 0x340   :  { %v188_v59 = vadd.f32 %v187_v57, %v113_v24  ;;  %v195_v63 = vmul.f32 %v2229_v13, %v126_v58 }
 0x342   :  { %v256_v60 = vmul.f32 %v2251_v31, %v188_v59 }
 0x344   :  { %257 = vadd.xlane.f32.xlu1 %v256_v60 }
 0x346   :  { %v2335_v62 = vpop.eup %2130 }
 0x347   :  { %v368_v10 = vmul.f32 %v2335_v62, %v367_v61 }
 0x348   :  { %196 = vadd.xlane.f32.xlu1 %v195_v63 }
 0x349   :  { %v371_v0 = vsel %vm370_vm12, %v368_v10, 0.0 }
 0x34a   :  { %v372_v1 = vadd.f32 %v371_v0, %v298_v22 }
 0x34c   :  { %373 = vst [vmem:[#allocation1] sm:$0xff] %v372_v1 }
 0x353   :  { %v2341_v2 = vld [vmem:[#allocation1 + $0x5] ss:$0 sm:$0xff] }
 0x354   :  { %v431_v5 = vmul.f32 %v2341_v2, %v2341_v2  ;;  %v438_v6 = vmul.f32 %v2341_v2, %v372_v1 }
 0x356   :  { %432 = vadd.xlane.f32.xlu0 %v431_v5 }
 0x35a   :  { %439 = vadd.xlane.f32.xlu0 %v438_v6 }
 0x389   :  { %v380_v7 = vpop.xlane.xlu0 %379 }
 0x38a   :  { %v381_v8 = vsub.f32 %v2238_v16, %v380_v7 }
 0x38c   :  { %v382_v13 = vmul.f32 %v2335_v62, %v381_v8  ;;  %v504_v8 = vld [vmem:[#allocation0 + $0x6] ss:$0 sm:$0xff] }
 0x38e   :  { %v383_v9 = vsel %vm352_vm10, %v382_v13, 0.0 }
 0x38f   :  { %v384_v11 = vadd.f32 %v383_v9, %v310_v37 }
 0x391   :  { %v452_v12 = vmul.f32 %v2341_v2, %v384_v11 }
 0x393   :  { %453 = vadd.xlane.f32.xlu0 %v452_v12 }
 0x39f   :  { %v319_v14 = vpop.xlane.xlu1 %318 }
 0x3a0   :  { %v320_v15 = vsub.f32 %v2260_v34, %v319_v14 }
 0x3a2   :  { %v321_v18 = vmul.f32 %v2298_v17, %v320_v15 }
 0x3a4   :  { %v322_v19 = vsel %vm278_vm7, %v321_v18, 0.0 }
 0x3a5   :  { %v323_v20 = vadd.f32 %v322_v19, %v249_v42 }
 0x3a7   :  { %v391_v21 = vmul.f32 %v2306_v25, %v323_v20 }
 0x3a9   :  { %392 = vadd.xlane.f32.xlu1 %v391_v21 }
 0x3cd   :  { %v258_v22 = vpop.xlane.xlu1 %257 }
 0x3ce   :  { %v259_v23 = vsub.f32 %v2281_v55, %v258_v22 }
 0x3d0   :  { %v260_v24 = vmul.f32 %v2272_v51, %v259_v23 }
 0x3d1   :  { %v197_v3 = vpop.xlane.xlu1 %196 }
 0x3d2   :  { %v261_v26 = vsel %vm204_vm4, %v260_v24, 0.0  ;;  %v198_v40 = vsub.f32 %v2316_v30, %v197_v3 }
 0x3d3   :  { %v262_v28 = vadd.f32 %v261_v26, %v188_v59 }
 0x3d4   :  { %v199_v43 = vmul.f32 %v2246_v27, %v198_v40 }
 0x3d5   :  { %v330_v29 = vmul.f32 %v2284_v56, %v262_v28 }
 0x3d6   :  { %v200_v44 = vsel %vm130_vm1, %v199_v43, 0.0  ;;  %vm517_vm1 = vcmask 1047558  }
 0x3d7   :  { %331 = vadd.xlane.f32.xlu0 %v330_v29  ;;  %v201_v46 = vadd.f32 %v200_v44, %v126_v58  ;;  %vm518_vm3 = vmand %vm500_vm0, %vm517_vm1 }
 0x3d9   :  { %v269_v49 = vmul.f32 %v2251_v31, %v201_v46 }
 0x3df   :  { %v433_v33 = vpop.xlane.xlu0 %432 }
 0x3e0   :  { %v434_v35 = vsub.f32 %v430_v32, %v433_v33 }
 0x3e2   :  { %2132 = vrsqrt.f32 %v434_v35 }
 0x3e3   :  { %v440_v36 = vpop.xlane.xlu0 %439 }
 0x3e4   :  { %v441_v37 = vsub.f32 %v2220_v4, %v440_v36 }
 0x3ef   :  { %v2359_v38 = vpop.eup %2132 }
 0x3f0   :  { %v442_v39 = vmul.f32 %v2359_v38, %v441_v37 }
 0x3f2   :  { %v445_v41 = vsel %vm444_vm15, %v442_v39, 0.0 }
 0x3f3   :  { %v446_v42 = vadd.f32 %v445_v41, %v372_v1 }
 0x3f5   :  { %447 = vst [vmem:[#allocation1] sm:$0xff] %v446_v42 }
 0x3fc   :  { %v2367_v45 = vld [vmem:[#allocation1 + $0x6] ss:$0 sm:$0xff] }
 0x3fd   :  { %v505_v47 = vmul.f32 %v2367_v45, %v2367_v45  ;;  %v512_v48 = vmul.f32 %v2367_v45, %v446_v42 }
 0x3ff   :  { %506 = vadd.xlane.f32.xlu1 %v505_v47  ;;  %513 = vadd.xlane.f32.xlu0 %v512_v48 }
 0x403   :  { %270 = vadd.xlane.f32.xlu1 %v269_v49 }
 0x41c   :  { %v454_v50 = vpop.xlane.xlu0 %453 }
 0x41d   :  { %v455_v52 = vsub.f32 %v2238_v16, %v454_v50 }
 0x41f   :  { %v456_v27 = vmul.f32 %v2359_v38, %v455_v52 }
 0x421   :  { %v457_v53 = vsel %vm426_vm13, %v456_v27, 0.0 }
 0x422   :  { %v458_v54 = vadd.f32 %v457_v53, %v384_v11 }
 0x424   :  { %v526_v57 = vmul.f32 %v2367_v45, %v458_v54 }
 0x426   :  { %527 = vadd.xlane.f32.xlu0 %v526_v57  ;;  %v578_v57 = vld [vmem:[#allocation0 + $0x7] ss:$0 sm:$0xff] }
 0x432   :  { %v393_v58 = vpop.xlane.xlu1 %392 }
 0x433   :  { %v394_v59 = vsub.f32 %v2260_v34, %v393_v58 }
 0x435   :  { %v395_v60 = vmul.f32 %v2335_v62, %v394_v59 }
 0x437   :  { %v396_v61 = vsel %vm352_vm10, %v395_v60, 0.0 }
 0x438   :  { %v397_v31 = vadd.f32 %v396_v61, %v323_v20 }
 0x43a   :  { %v465_v63 = vmul.f32 %v2341_v2, %v397_v31 }
 0x43c   :  { %466 = vadd.xlane.f32.xlu1 %v465_v63 }
 0x460   :  { %v332_v10 = vpop.xlane.xlu0 %331 }
 0x461   :  { %v333_v0 = vsub.f32 %v2281_v55, %v332_v10 }
 0x463   :  { %v334_v1 = vmul.f32 %v2298_v17, %v333_v0 }
 0x465   :  { %v335_v5 = vsel %vm278_vm7, %v334_v1, 0.0 }
 0x466   :  { %v336_v6 = vadd.f32 %v335_v5, %v262_v28 }
 0x468   :  { %v404_v7 = vmul.f32 %v2306_v25, %v336_v6 }
 0x46a   :  { %405 = vadd.xlane.f32.xlu0 %v404_v7 }
 0x488   :  { %v507_v13 = vpop.xlane.xlu1 %506  ;;  %v514_v19 = vpop.xlane.xlu0 %513 }
 0x489   :  { %v508_v9 = vsub.f32 %v504_v8, %v507_v13  ;;  %v515_v21 = vsub.f32 %v2220_v4, %v514_v19 }
 0x48b   :  { %2134 = vrsqrt.f32 %v508_v9 }
 0x48c   :  { %v271_v11 = vpop.xlane.xlu1 %270 }
 0x48d   :  { %v272_v12 = vsub.f32 %v2316_v30, %v271_v11 }
 0x48f   :  { %v273_v14 = vmul.f32 %v2272_v51, %v272_v12 }
 0x491   :  { %v274_v15 = vsel %vm204_vm4, %v273_v14, 0.0  ;;  %vm574_vm4 = vcmask 64568  }
 0x492   :  { %v275_v18 = vadd.f32 %v274_v15, %v201_v46 }
 0x494   :  { %v343_v20 = vmul.f32 %v2284_v56, %v275_v18 }
 0x496   :  { %344 = vadd.xlane.f32.xlu0 %v343_v20 }
 0x498   :  { %v2390_v22 = vpop.eup %2134 }
 0x499   :  { %v516_v23 = vmul.f32 %v2390_v22, %v515_v21 }
 0x49b   :  { %v519_v24 = vsel %vm518_vm3, %v516_v23, 0.0 }
 0x49c   :  { %v520_v51 = vadd.f32 %v519_v24, %v446_v42 }
 0x49e   :  { %521 = vst [vmem:[#allocation1] sm:$0xff] %v520_v51 }
 0x4a5   :  { %v2395_v26 = vld [vmem:[#allocation1 + $0x7] ss:$0 sm:$0xff] }
 0x4a6   :  { %v579_v56 = vmul.f32 %v2395_v26, %v2395_v26 }
 0x4a8   :  { %580 = vadd.xlane.f32.xlu1 %v579_v56 }
 0x4af   :  { %v528_v28 = vpop.xlane.xlu0 %527 }
 0x4b0   :  { %v529_v29 = vsub.f32 %v2238_v16, %v528_v28  ;;  %v652_v28 = vld [vmem:[#allocation0 + $0x8] ss:$0 sm:$0xff] }
 0x4b2   :  { %v530_v4 = vmul.f32 %v2390_v22, %v529_v29 }
 0x4b4   :  { %v531_v32 = vsel %vm500_vm0, %v530_v4, 0.0 }
 0x4b5   :  { %v532_v33 = vadd.f32 %v531_v32, %v458_v54 }
 0x4b7   :  { %v600_v35 = vmul.f32 %v2395_v26, %v532_v33 }
 0x4b9   :  { %601 = vadd.xlane.f32.xlu1 %v600_v35 }
 0x4c5   :  { %v467_v36 = vpop.xlane.xlu1 %466 }
 0x4c6   :  { %v468_v37 = vsub.f32 %v2260_v34, %v467_v36 }
 0x4c8   :  { %v469_v3 = vmul.f32 %v2359_v38, %v468_v37 }
 0x4ca   :  { %v470_v39 = vsel %vm426_vm13, %v469_v3, 0.0 }
 0x4cb   :  { %v471_v40 = vadd.f32 %v470_v39, %v397_v31 }
 0x4cd   :  { %v539_v41 = vmul.f32 %v2367_v45, %v471_v40 }
 0x4cf   :  { %540 = vadd.xlane.f32.xlu0 %v539_v41 }
 0x4f3   :  { %v406_v42 = vpop.xlane.xlu0 %405 }
 0x4f4   :  { %v407_v43 = vsub.f32 %v2281_v55, %v406_v42 }
 0x4f6   :  { %v408_v44 = vmul.f32 %v2335_v62, %v407_v43 }
 0x4f8   :  { %v409_v46 = vsel %vm352_vm10, %v408_v44, 0.0 }
 0x4f9   :  { %v410_v47 = vadd.f32 %v409_v46, %v336_v6 }
 0x4fb   :  { %v478_v48 = vmul.f32 %v2341_v2, %v410_v47 }
 0x4fd   :  { %479 = vadd.xlane.f32.xlu1 %v478_v48 }
 0x51f   :  { %v345_v49 = vpop.xlane.xlu0 %344 }
 0x520   :  { %v346_v50 = vsub.f32 %v2316_v30, %v345_v49 }
 0x522   :  { %v347_v52 = vmul.f32 %v2298_v17, %v346_v50 }
 0x524   :  { %v348_v27 = vsel %vm278_vm7, %v347_v52, 0.0  ;;  %vm710_vm7 = vcmask 80968  }
 0x525   :  { %v349_v53 = vadd.f32 %v348_v27, %v275_v18  ;;  %vm730_vm9 = vmand %vm710_vm7, %vm147_vm2 }
 0x527   :  { %v417_v54 = vmul.f32 %v2306_v25, %v349_v53 }
 0x529   :  { %418 = vadd.xlane.f32.xlu0 %v417_v54 }
 0x531   :  { %v581_v58 = vpop.xlane.xlu1 %580 }
 0x532   :  { %v582_v59 = vsub.f32 %v578_v57, %v581_v58 }
 0x534   :  { %2136 = vrsqrt.f32 %v582_v59 }
 0x541   :  { %v2416_v31 = vpop.eup %2136 }
 0x542   :  { %v602_v60 = vpop.xlane.xlu1 %601 }
 0x543   :  { %v603_v61 = vsub.f32 %v2238_v16, %v602_v60 }
 0x545   :  { %v604_v63 = vmul.f32 %v2416_v31, %v603_v61 }
 0x547   :  { %v605_v17 = vsel %vm574_vm4, %v604_v63, 0.0 }
 0x548   :  { %v606_v10 = vadd.f32 %v605_v17, %v532_v33 }
 0x54a   :  { %608 = vst [vmem:[#allocation1 + $0x8] sm:$0xff] %v606_v10 }
 0x551   :  { %v2420_v0 = vld [vmem:[#allocation1 + $0x8] ss:$0 sm:$0xff] }
 0x552   :  { %v662_v25 = vmul.f32 %v2420_v0, %v606_v10  ;;  %v653_v1 = vmul.f32 %v2420_v0, %v2420_v0 }
 0x554   :  { %663 = vadd.xlane.f32.xlu0 %v662_v25  ;;  %654 = vadd.xlane.f32.xlu1 %v653_v1  ;;  %v714_v25 = vld [vmem:[#allocation0 + $0x9] ss:$0 sm:$0xff] }
 0x558   :  { %v541_v5 = vpop.xlane.xlu0 %540 }
 0x559   :  { %v542_v6 = vsub.f32 %v2260_v34, %v541_v5 }
 0x55b   :  { %v543_v7 = vmul.f32 %v2390_v22, %v542_v6 }
 0x55d   :  { %v544_v8 = vsel %vm500_vm0, %v543_v7, 0.0 }
 0x55e   :  { %v545_v13 = vadd.f32 %v544_v8, %v471_v40 }
 0x560   :  { %v613_v9 = vmul.f32 %v2395_v26, %v545_v13 }
 0x562   :  { %614 = vadd.xlane.f32.xlu1 %v613_v9 }
 0x586   :  { %v480_v11 = vpop.xlane.xlu1 %479 }
 0x587   :  { %v481_v12 = vsub.f32 %v2281_v55, %v480_v11 }
 0x589   :  { %v482_v14 = vmul.f32 %v2359_v38, %v481_v12 }
 0x58b   :  { %v483_v15 = vsel %vm426_vm13, %v482_v14, 0.0 }
 0x58c   :  { %v484_v18 = vadd.f32 %v483_v15, %v410_v47 }
 0x58e   :  { %v552_v19 = vmul.f32 %v2367_v45, %v484_v18 }
 0x590   :  { %553 = vadd.xlane.f32.xlu0 %v552_v19 }
 0x5b2   :  { %v419_v20 = vpop.xlane.xlu0 %418 }
 0x5b3   :  { %v420_v21 = vsub.f32 %v2316_v30, %v419_v20 }
 0x5b5   :  { %v421_v23 = vmul.f32 %v2335_v62, %v420_v21 }
 0x5b7   :  { %v422_v24 = vsel %vm352_vm10, %v421_v23, 0.0  ;;  %vm774_vm10 = vcmask 89168  }
 0x5b8   :  { %v423_v51 = vadd.f32 %v422_v24, %v349_v53  ;;  %vm794_vm12 = vmand %vm774_vm10, %vm221_vm5 }
 0x5ba   :  { %v491_v56 = vmul.f32 %v2341_v2, %v423_v51 }
 0x5bc   :  { %492 = vadd.xlane.f32.xlu1 %v491_v56 }
 0x5dd   :  { %v655_v29 = vpop.xlane.xlu1 %654  ;;  %v664_v32 = vpop.xlane.xlu0 %663 }
 0x5de   :  { %v656_v4 = vsub.f32 %v652_v28, %v655_v29  ;;  %v665_v35 = vsub.f32 %v2238_v16, %v664_v32 }
 0x5e0   :  { %2138 = vrsqrt.f32 %v656_v4 }
 0x5eb   :  { %v615_v33 = vpop.xlane.xlu1 %614 }
 0x5ec   :  { %v616_v36 = vsub.f32 %v2260_v34, %v615_v33 }
 0x5ed   :  { %v2439_v37 = vpop.eup %2138 }
 0x5ee   :  { %v666_v62 = vmul.f32 %v2439_v37, %v665_v35  ;;  %v617_v3 = vmul.f32 %v2416_v31, %v616_v36 }
 0x5f0   :  { %v667_v2 = vsel %vm648_vm6, %v666_v62, 0.0  ;;  %v618_v39 = vsel %vm574_vm4, %v617_v3, 0.0 }
 0x5f1   :  { %v668_v40 = vadd.f32 %v667_v2, %v606_v10  ;;  %v619_v41 = vadd.f32 %v618_v39, %v545_v13  ;;  %v778_v39 = vld [vmem:[#allocation0 + $0xa] ss:$0 sm:$0xff] }
 0x5f3   :  { %670 = vst [vmem:[#allocation1 + $0x8] sm:$0xff] %v668_v40  ;;  %v675_v42 = vmul.f32 %v2420_v0, %v619_v41 }
 0x5f5   :  { %676 = vadd.xlane.f32.xlu1 %v675_v42 }
 0x5fa   :  { %v2446_v43 = vld [vmem:[#allocation1 + $0x9] ss:$0 sm:$0xff] }
 0x5fb   :  { %v715_v44 = vmul.f32 %v2446_v43, %v2446_v43  ;;  %v724_v46 = vmul.f32 %v2446_v43, %v668_v40 }
 0x5fd   :  { %716 = vadd.xlane.f32.xlu0 %v715_v44 }
 0x601   :  { %725 = vadd.xlane.f32.xlu0 %v724_v46 }
 0x619   :  { %v554_v47 = vpop.xlane.xlu0 %553 }
 0x61a   :  { %v555_v48 = vsub.f32 %v2281_v55, %v554_v47 }
 0x61c   :  { %v556_v49 = vmul.f32 %v2390_v22, %v555_v48 }
 0x61e   :  { %v557_v50 = vsel %vm500_vm0, %v556_v49, 0.0 }
 0x61f   :  { %v558_v52 = vadd.f32 %v557_v50, %v484_v18 }
 0x621   :  { %v626_v27 = vmul.f32 %v2395_v26, %v558_v52 }
 0x623   :  { %627 = vadd.xlane.f32.xlu1 %v626_v27 }
 0x645   :  { %v493_v53 = vpop.xlane.xlu1 %492 }
 0x646   :  { %v494_v54 = vsub.f32 %v2316_v30, %v493_v53 }
 0x648   :  { %v495_v57 = vmul.f32 %v2359_v38, %v494_v54 }
 0x64a   :  { %v496_v58 = vsel %vm426_vm13, %v495_v57, 0.0  ;;  %vm838_vm13 = vcmask 97368  }
 0x64b   :  { %v497_v59 = vadd.f32 %v496_v58, %v423_v51  ;;  %vm858_vm15 = vmand %vm838_vm13, %vm295_vm8 }
 0x64d   :  { %v565_v60 = vmul.f32 %v2367_v45, %v497_v59 }
 0x64f   :  { %566 = vadd.xlane.f32.xlu0 %v565_v60 }
 0x67e   :  { %v677_v61 = vpop.xlane.xlu1 %676 }
 0x67f   :  { %v678_v63 = vsub.f32 %v2260_v34, %v677_v61 }
 0x681   :  { %v679_v17 = vmul.f32 %v2439_v37, %v678_v63 }
 0x683   :  { %v680_v10 = vsel %vm648_vm6, %v679_v17, 0.0 }
 0x684   :  { %v681_v1 = vadd.f32 %v680_v10, %v619_v41 }
 0x686   :  { %v717_v5 = vpop.xlane.xlu0 %716  ;;  %v739_v6 = vmul.f32 %v2446_v43, %v681_v1 }
 0x687   :  { %v718_v7 = vsub.f32 %v714_v25, %v717_v5 }
 0x688   :  { %740 = vadd.xlane.f32.xlu1 %v739_v6 }
 0x689   :  { %2140 = vrsqrt.f32 %v718_v7 }
 0x68a   :  { %v726_v38 = vpop.xlane.xlu0 %725 }
 0x68b   :  { %v727_v45 = vsub.f32 %v2238_v16, %v726_v38 }
 0x696   :  { %v2464_v8 = vpop.eup %2140 }
 0x697   :  { %v728_v13 = vmul.f32 %v2464_v8, %v727_v45 }
 0x699   :  { %v731_v9 = vsel %vm730_vm9, %v728_v13, 0.0  ;;  %vm1030_vm9 = vcmask 121968  }
 0x69a   :  { %v732_v11 = vadd.f32 %v731_v9, %v668_v40 }
 0x69c   :  { %734 = vst [vmem:[#allocation1 + $0x8] sm:$0xff] %v732_v11 }
 0x6a3   :  { %v2469_v12 = vld [vmem:[#allocation1 + $0xa] ss:$0 sm:$0xff] }
 0x6a4   :  { %v779_v14 = vmul.f32 %v2469_v12, %v2469_v12  ;;  %v788_v15 = vmul.f32 %v2469_v12, %v732_v11 }
 0x6a6   :  { %780 = vadd.xlane.f32.xlu0 %v779_v14  ;;  %789 = vadd.xlane.f32.xlu1 %v788_v15 }
 0x6ac   :  { %v628_v18 = vpop.xlane.xlu1 %627 }
 0x6ad   :  { %v629_v19 = vsub.f32 %v2281_v55, %v628_v18  ;;  %v2513_v18 = vld [vmem:[#allocation0 + $0x8] sm:$0xff] }
 0x6af   :  { %v630_v20 = vmul.f32 %v2416_v31, %v629_v19 }
 0x6b1   :  { %v631_v21 = vsel %vm574_vm4, %v630_v20, 0.0 }
 0x6b2   :  { %v632_v23 = vadd.f32 %v631_v21, %v558_v52 }
 0x6b4   :  { %v688_v24 = vmul.f32 %v2420_v0, %v632_v23 }
 0x6b6   :  { %689 = vadd.xlane.f32.xlu0 %v688_v24 }
 0x6d8   :  { %v567_v51 = vpop.xlane.xlu0 %566 }
 0x6d9   :  { %v568_v56 = vsub.f32 %v2316_v30, %v567_v51 }
 0x6db   :  { %v569_v28 = vmul.f32 %v2390_v22, %v568_v56 }
 0x6dd   :  { %v570_v29 = vsel %vm500_vm0, %v569_v28, 0.0  ;;  %vm902_vm0 = vcmask 105568  }
 0x6de   :  { %v571_v4 = vadd.f32 %v570_v29, %v497_v59  ;;  %vm922_vm3 = vmand %vm902_vm0, %vm369_vm11 }
 0x6e0   :  { %v639_v32 = vmul.f32 %v2395_v26, %v571_v4 }
 0x6e2   :  { %640 = vadd.xlane.f32.xlu1 %v639_v32 }
 0x711   :  { %v741_v33 = vpop.xlane.xlu1 %740 }
 0x712   :  { %v742_v35 = vsub.f32 %v2260_v34, %v741_v33 }
 0x714   :  { %v743_v36 = vmul.f32 %v2464_v8, %v742_v35 }
 0x716   :  { %v744_v62 = vsel %vm710_vm7, %v743_v36, 0.0 }
 0x717   :  { %v745_v3 = vadd.f32 %v744_v62, %v681_v1  ;;  %v2530_v62 = vld [vmem:[#allocation0 + $0x10] sm:$0xff] }
 0x719   :  { %v803_v2 = vmul.f32 %v2469_v12, %v745_v3 }
 0x71b   :  { %804 = vadd.xlane.f32.xlu0 %v803_v2 }
 0x72f   :  { %v781_v40 = vpop.xlane.xlu0 %780  ;;  %v790_v41 = vpop.xlane.xlu1 %789 }
 0x730   :  { %v782_v22 = vsub.f32 %v778_v39, %v781_v40  ;;  %v791_v26 = vsub.f32 %v2238_v16, %v790_v41 }
 0x732   :  { %2142 = vrsqrt.f32 %v782_v22 }
 0x73f   :  { %v690_v42 = vpop.xlane.xlu0 %689  ;;  %v2488_v46 = vpop.eup %2142 }
 0x740   :  { %v691_v44 = vsub.f32 %v2281_v55, %v690_v42  ;;  %v792_v47 = vmul.f32 %v2488_v46, %v791_v26 }
 0x742   :  { %v692_v48 = vmul.f32 %v2439_v37, %v691_v44  ;;  %v795_v49 = vsel %vm794_vm12, %v792_v47, 0.0  ;;  %vm1094_vm12 = vcmask 130168  }
 0x743   :  { %v796_v52 = vadd.f32 %v795_v49, %v732_v11  ;;  %v842_v11 = vld [vmem:[#allocation0 + $0xb] ss:$0 sm:$0xff]  ;;  %v906_v49 = vld [vmem:[#allocation0 + $0xc] ss:$0 sm:$0xff] }
 0x744   :  { %v693_v50 = vsel %vm648_vm6, %v692_v48, 0.0 }
 0x745   :  { %v694_v27 = vadd.f32 %v693_v50, %v632_v23  ;;  %798 = vst [vmem:[#allocation1 + $0x8] sm:$0xff] %v796_v52 }
 0x747   :  { %v752_v53 = vmul.f32 %v2446_v43, %v694_v27 }
 0x749   :  { %753 = vadd.xlane.f32.xlu0 %v752_v53 }
 0x74c   :  { %v2496_v16 = vld [vmem:[#allocation1 + $0xb] ss:$0 sm:$0xff] }
 0x74d   :  { %v843_v54 = vmul.f32 %v2496_v16, %v2496_v16  ;;  %v852_v57 = vmul.f32 %v2496_v16, %v796_v52 }
 0x74f   :  { %844 = vadd.xlane.f32.xlu1 %v843_v54 }
 0x753   :  { %853 = vadd.xlane.f32.xlu1 %v852_v57 }
 0x76b   :  { %v641_v58 = vpop.xlane.xlu1 %640 }
 0x76c   :  { %v642_v59 = vsub.f32 %v2316_v30, %v641_v58 }
 0x76e   :  { %v643_v60 = vmul.f32 %v2416_v31, %v642_v59 }
 0x770   :  { %v644_v61 = vsel %vm574_vm4, %v643_v60, 0.0 }
 0x771   :  { %v645_v63 = vadd.f32 %v644_v61, %v571_v4 }
 0x773   :  { %v701_v17 = vmul.f32 %v2420_v0, %v645_v63 }
 0x775   :  { %702 = vadd.xlane.f32.xlu0 %v701_v17 }
 0x7a4   :  { %v805_v10 = vpop.xlane.xlu0 %804 }
 0x7a5   :  { %v806_v25 = vsub.f32 %v2260_v34, %v805_v10 }
 0x7a7   :  { %v807_v1 = vmul.f32 %v2488_v46, %v806_v25 }
 0x7a9   :  { %v808_v5 = vsel %vm774_vm10, %v807_v1, 0.0 }
 0x7aa   :  { %v809_v6 = vadd.f32 %v808_v5, %v745_v3 }
 0x7ac   :  { %v867_v7 = vmul.f32 %v2496_v16, %v809_v6 }
 0x7ae   :  { %868 = vadd.xlane.f32.xlu1 %v867_v7 }
 0x7d2   :  { %v754_v38 = vpop.xlane.xlu0 %753 }
 0x7d3   :  { %v755_v45 = vsub.f32 %v2281_v55, %v754_v38 }
 0x7d5   :  { %v756_v13 = vmul.f32 %v2464_v8, %v755_v45 }
 0x7d7   :  { %v757_v9 = vsel %vm710_vm7, %v756_v13, 0.0 }
 0x7d8   :  { %v758_v0 = vadd.f32 %v757_v9, %v694_v27  ;;  %v845_v14 = vpop.xlane.xlu1 %844 }
 0x7d9   :  { %v846_v15 = vsub.f32 %v842_v11, %v845_v14 }
 0x7da   :  { %v816_v34 = vmul.f32 %v2469_v12, %v758_v0 }
 0x7db   :  { %2144 = vrsqrt.f32 %v846_v15 }
 0x7dc   :  { %817 = vadd.xlane.f32.xlu0 %v816_v34  ;;  %v854_v19 = vpop.xlane.xlu1 %853 }
 0x7dd   :  { %v855_v20 = vsub.f32 %v2513_v18, %v854_v19 }
 0x7e8   :  { %v2516_v21 = vpop.eup %2144 }
 0x7e9   :  { %v856_v55 = vmul.f32 %v2516_v21, %v855_v20 }
 0x7eb   :  { %v859_v23 = vsel %vm858_vm15, %v856_v55, 0.0  ;;  %vm1207_vm15 = vcmask 146568  }
 0x7ec   :  { %v860_v24 = vadd.f32 %v859_v23, %v796_v52 }
 0x7ee   :  { %862 = vst [vmem:[#allocation1 + $0x8] sm:$0xff] %v860_v24 }
 0x7f5   :  { %v2521_v51 = vld [vmem:[#allocation1 + $0xc] ss:$0 sm:$0xff] }
 0x7f6   :  { %v916_v56 = vmul.f32 %v2521_v51, %v860_v24  ;;  %v907_v28 = vmul.f32 %v2521_v51, %v2521_v51 }
 0x7f8   :  { %917 = vadd.xlane.f32.xlu0 %v916_v56  ;;  %908 = vadd.xlane.f32.xlu1 %v907_v28 }
 0x7fe   :  { %v703_v29 = vpop.xlane.xlu0 %702 }
 0x7ff   :  { %v704_v4 = vsub.f32 %v2316_v30, %v703_v29 }
 0x801   :  { %v705_v32 = vmul.f32 %v2439_v37, %v704_v4  ;;  %v2536_v37 = vld [vmem:[#allocation0 + $0x18] sm:$0xff] }
 0x803   :  { %v706_v33 = vsel %vm648_vm6, %v705_v32, 0.0  ;;  %vm966_vm6 = vcmask 113768  }
 0x804   :  { %v707_v35 = vadd.f32 %v706_v33, %v645_v63 }
 0x806   :  { %v765_v36 = vmul.f32 %v2446_v43, %v707_v35 }
 0x808   :  { %766 = vadd.xlane.f32.xlu1 %v765_v36 }
 0x837   :  { %v869_v3 = vpop.xlane.xlu1 %868 }
 0x838   :  { %v870_v2 = vsub.f32 %v2530_v62, %v869_v3 }
 0x83a   :  { %v871_v39 = vmul.f32 %v2516_v21, %v870_v2 }
 0x83c   :  { %v872_v40 = vsel %vm838_vm13, %v871_v39, 0.0 }
 0x83d   :  { %v873_v22 = vadd.f32 %v872_v40, %v809_v6 }
 0x83f   :  { %v931_v41 = vmul.f32 %v2521_v51, %v873_v22 }
 0x841   :  { %932 = vadd.xlane.f32.xlu0 %v931_v41 }
 0x865   :  { %v818_v42 = vpop.xlane.xlu0 %817 }
 0x866   :  { %v819_v26 = vsub.f32 %v2536_v37, %v818_v42 }
 0x868   :  { %v820_v43 = vmul.f32 %v2488_v46, %v819_v26 }
 0x86a   :  { %v821_v44 = vsel %vm774_vm10, %v820_v43, 0.0 }
 0x86b   :  { %v822_v47 = vadd.f32 %v821_v44, %v758_v0 }
 0x86d   :  { %v880_v48 = vmul.f32 %v2496_v16, %v822_v47 }
 0x86f   :  { %881 = vadd.xlane.f32.xlu1 %v880_v48 }
 0x881   :  { %v909_v50 = vpop.xlane.xlu1 %908  ;;  %v918_v27 = vpop.xlane.xlu0 %917 }
 0x882   :  { %v910_v52 = vsub.f32 %v906_v49, %v909_v50  ;;  %v919_v54 = vsub.f32 %v2513_v18, %v918_v27 }
 0x884   :  { %2146 = vrsqrt.f32 %v910_v52  ;;  %v2588_v52 = vld [vmem:[#allocation0 + $0x20] sm:$0xff] }
 0x891   :  { %v767_v53 = vpop.xlane.xlu1 %766  ;;  %v2544_v58 = vpop.eup %2146 }
 0x892   :  { %v768_v57 = vsub.f32 %v2316_v30, %v767_v53  ;;  %v920_v59 = vmul.f32 %v2544_v58, %v919_v54 }
 0x894   :  { %v769_v60 = vmul.f32 %v2464_v8, %v768_v57  ;;  %v923_v61 = vsel %vm922_vm3, %v920_v59, 0.0  ;;  %vm1258_vm3 = vcmask 154768  }
 0x895   :  { %v924_v17 = vadd.f32 %v923_v61, %v860_v24  ;;  %v970_v24 = vld [vmem:[#allocation0 + $0xd] ss:$0 sm:$0xff]  ;;  %v1034_v61 = vld [vmem:[#allocation0 + $0xe] ss:$0 sm:$0xff] }
 0x896   :  { %v770_v63 = vsel %vm710_vm7, %v769_v60, 0.0  ;;  %vm986_vm7 = vmand %vm966_vm6, %vm443_vm14 }
 0x897   :  { %v771_v10 = vadd.f32 %v770_v63, %v707_v35  ;;  %926 = vst [vmem:[#allocation1 + $0x8] sm:$0xff] %v924_v17 }
 0x899   :  { %v829_v25 = vmul.f32 %v2469_v12, %v771_v10 }
 0x89b   :  { %830 = vadd.xlane.f32.xlu1 %v829_v25 }
 0x89e   :  { %v2552_v1 = vld [vmem:[#allocation1 + $0xd] ss:$0 sm:$0xff] }
 0x89f   :  { %v971_v5 = vmul.f32 %v2552_v1, %v2552_v1  ;;  %v980_v6 = vmul.f32 %v2552_v1, %v924_v17 }
 0x8a1   :  { %972 = vadd.xlane.f32.xlu0 %v971_v5 }
 0x8a5   :  { %981 = vadd.xlane.f32.xlu0 %v980_v6 }
 0x8ca   :  { %v933_v7 = vpop.xlane.xlu0 %932 }
 0x8cb   :  { %v934_v8 = vsub.f32 %v2530_v62, %v933_v7 }
 0x8cd   :  { %v935_v38 = vmul.f32 %v2544_v58, %v934_v8 }
 0x8cf   :  { %v936_v45 = vsel %vm902_vm0, %v935_v38, 0.0 }
 0x8d0   :  { %v937_v13 = vadd.f32 %v936_v45, %v873_v22 }
 0x8d2   :  { %v995_v12 = vmul.f32 %v2552_v1, %v937_v13 }
 0x8d4   :  { %996 = vadd.xlane.f32.xlu1 %v995_v12 }
 0x8f8   :  { %v882_v9 = vpop.xlane.xlu1 %881 }
 0x8f9   :  { %v883_v0 = vsub.f32 %v2536_v37, %v882_v9 }
 0x8fb   :  { %v884_v11 = vmul.f32 %v2516_v21, %v883_v0 }
 0x8fd   :  { %v885_v14 = vsel %vm838_vm13, %v884_v11, 0.0 }
 0x8fe   :  { %v886_v34 = vadd.f32 %v885_v14, %v822_v47 }
 0x900   :  { %v944_v15 = vmul.f32 %v2521_v51, %v886_v34 }
 0x902   :  { %945 = vadd.xlane.f32.xlu0 %v944_v15 }
 0x924   :  { %v831_v19 = vpop.xlane.xlu1 %830 }
 0x925   :  { %v832_v20 = vsub.f32 %v2316_v30, %v831_v19 }
 0x927   :  { %v833_v55 = vmul.f32 %v2488_v46, %v832_v20 }
 0x929   :  { %v834_v23 = vsel %vm774_vm10, %v833_v55, 0.0  ;;  %vm1050_vm10 = vmand %vm1030_vm9, %vm517_vm1 }
 0x92a   :  { %v835_v56 = vadd.f32 %v834_v23, %v771_v10  ;;  %v973_v28 = vpop.xlane.xlu0 %972 }
 0x92b   :  { %v974_v4 = vsub.f32 %v970_v24, %v973_v28 }
 0x92c   :  { %v893_v29 = vmul.f32 %v2496_v16, %v835_v56 }
 0x92d   :  { %2148 = vrsqrt.f32 %v974_v4 }
 0x92e   :  { %894 = vadd.xlane.f32.xlu1 %v893_v29  ;;  %v982_v32 = vpop.xlane.xlu0 %981  ;;  %v1098_v29 = vld [vmem:[#allocation0 + $0xf] ss:$0 sm:$0xff] }
 0x92f   :  { %v983_v33 = vsub.f32 %v2513_v18, %v982_v32 }
 0x93a   :  { %v2570_v35 = vpop.eup %2148 }
 0x93b   :  { %v984_v30 = vmul.f32 %v2570_v35, %v983_v33 }
 0x93d   :  { %v987_v46 = vsel %vm986_vm7, %v984_v30, 0.0  ;;  %vm1309_vm7 = vcmask 162968  }
 0x93e   :  { %v988_v36 = vadd.f32 %v987_v46, %v924_v17 }
 0x940   :  { %990 = vst [vmem:[#allocation1 + $0x8] sm:$0xff] %v988_v36 }
 0x947   :  { %v2575_v3 = vld [vmem:[#allocation1 + $0xe] ss:$0 sm:$0xff] }
 0x948   :  { %v1035_v16 = vmul.f32 %v2575_v3, %v2575_v3  ;;  %v1044_v2 = vmul.f32 %v2575_v3, %v988_v36 }
 0x94a   :  { %1036 = vadd.xlane.f32.xlu0 %v1035_v16  ;;  %1045 = vadd.xlane.f32.xlu1 %v1044_v2 }
 0x95d   :  { %v997_v39 = vpop.xlane.xlu1 %996 }
 0x95e   :  { %v998_v40 = vsub.f32 %v2530_v62, %v997_v39 }
 0x960   :  { %v999_v22 = vmul.f32 %v2570_v35, %v998_v40 }
 0x962   :  { %v1000_v41 = vsel %vm966_vm6, %v999_v22, 0.0 }
 0x963   :  { %v1001_v42 = vadd.f32 %v1000_v41, %v937_v13 }
 0x965   :  { %v1059_v26 = vmul.f32 %v2575_v3, %v1001_v42 }
 0x967   :  { %1060 = vadd.xlane.f32.xlu0 %v1059_v26 }
 0x98b   :  { %v946_v43 = vpop.xlane.xlu0 %945 }
 0x98c   :  { %v947_v44 = vsub.f32 %v2536_v37, %v946_v43 }
 0x98e   :  { %v948_v47 = vmul.f32 %v2544_v58, %v947_v44 }
 0x990   :  { %v949_v48 = vsel %vm902_vm0, %v948_v47, 0.0 }
 0x991   :  { %v950_v49 = vadd.f32 %v949_v48, %v886_v34 }
 0x993   :  { %v1008_v50 = vmul.f32 %v2552_v1, %v950_v49 }
 0x995   :  { %1009 = vadd.xlane.f32.xlu1 %v1008_v50 }
 0x9b7   :  { %v895_v27 = vpop.xlane.xlu1 %894 }
 0x9b8   :  { %v896_v53 = vsub.f32 %v2588_v52, %v895_v27 }
 0x9ba   :  { %v897_v54 = vmul.f32 %v2516_v21, %v896_v53  ;;  %v1162_v53 = vld [vmem:[#allocation0 + $0x10] ss:$0 sm:$0xff] }
 0x9bc   :  { %v898_v57 = vsel %vm838_vm13, %v897_v54, 0.0  ;;  %vm1158_vm13 = vcmask 138368  }
 0x9bd   :  { %v899_v59 = vadd.f32 %v898_v57, %v835_v56 }
 0x9bf   :  { %v957_v60 = vmul.f32 %v2521_v51, %v899_v59 }
 0x9c1   :  { %958 = vadd.xlane.f32.xlu0 %v957_v60 }
 0x9d3   :  { %v1037_v63 = vpop.xlane.xlu0 %1036  ;;  %v1046_v10 = vpop.xlane.xlu1 %1045 }
 0x9d4   :  { %v1038_v17 = vsub.f32 %v1034_v61, %v1037_v63  ;;  %v1047_v25 = vsub.f32 %v2513_v18, %v1046_v10 }
 0x9d6   :  { %2150 = vrsqrt.f32 %v1038_v17 }
 0x9e3   :  { %v2595_v5 = vpop.eup %2150 }
 0x9e4   :  { %v1048_v21 = vmul.f32 %v2595_v5, %v1047_v25 }
 0x9e6   :  { %v1051_v6 = vsel %vm1050_vm10, %v1048_v21, 0.0  ;;  %vm1360_vm10 = vcmask 171168  }
 0x9e7   :  { %v1052_v7 = vadd.f32 %v1051_v6, %v988_v36 }
 0x9e9   :  { %1054 = vst [vmem:[#allocation1 + $0x8] sm:$0xff] %v1052_v7 }
 0x9f0   :  { %v2600_v51 = vld [vmem:[#allocation1 + $0xf] ss:$0 sm:$0xff]  ;;  %v1061_v8 = vpop.xlane.xlu0 %1060 }
 0x9f1   :  { %v1099_v38 = vmul.f32 %v2600_v51, %v2600_v51  ;;  %v1062_v45 = vsub.f32 %v2530_v62, %v1061_v8 }
 0x9f3   :  { %1100 = vadd.xlane.f32.xlu1 %v1099_v38  ;;  %v1063_v18 = vmul.f32 %v2595_v5, %v1062_v45 }
 0x9f5   :  { %v1064_v13 = vsel %vm1030_vm9, %v1063_v18, 0.0 }
 0x9f6   :  { %v1065_v12 = vadd.f32 %v1064_v13, %v1001_v42 }
 0x9f8   :  { %v1123_v9 = vmul.f32 %v2600_v51, %v1065_v12 }
 0x9fa   :  { %1124 = vadd.xlane.f32.xlu0 %v1123_v9 }
 0xa1e   :  { %v1010_v0 = vpop.xlane.xlu1 %1009 }
 0xa1f   :  { %v1011_v11 = vsub.f32 %v2536_v37, %v1010_v0 }
 0xa21   :  { %v1012_v14 = vmul.f32 %v2570_v35, %v1011_v11 }
 0xa23   :  { %v1013_v34 = vsel %vm966_vm6, %v1012_v14, 0.0  ;;  %v1211_v14 = vld [vmem:[#allocation0 + $0x11] ss:$0 sm:$0xff] }
 0xa24   :  { %v1014_v15 = vadd.f32 %v1013_v34, %v950_v49 }
 0xa26   :  { %v1072_v19 = vmul.f32 %v2575_v3, %v1014_v15 }
 0xa28   :  { %1073 = vadd.xlane.f32.xlu1 %v1072_v19 }
 0xa4a   :  { %v959_v20 = vpop.xlane.xlu0 %958 }
 0xa4b   :  { %v960_v55 = vsub.f32 %v2588_v52, %v959_v20 }
 0xa4d   :  { %v961_v23 = vmul.f32 %v2544_v58, %v960_v55 }
 0xa4f   :  { %v962_v24 = vsel %vm902_vm0, %v961_v23, 0.0  ;;  %vm1227_vm0 = vmand %vm1207_vm15, %vm147_vm2 }
 0xa50   :  { %v963_v56 = vadd.f32 %v962_v24, %v899_v59 }
 0xa52   :  { %v1021_v28 = vmul.f32 %v2552_v1, %v963_v56 }
 0xa54   :  { %1022 = vadd.xlane.f32.xlu0 %v1021_v28 }
 0xa7c   :  { %v1101_v4 = vpop.xlane.xlu1 %1100 }
 0xa7d   :  { %v1102_v32 = vsub.f32 %v1098_v29, %v1101_v4 }
 0xa7f   :  { %2152 = vrsqrt.f32 %v1102_v32 }
 0xa83   :  { %v1125_v33 = vpop.xlane.xlu0 %1124 }
 0xa84   :  { %v1126_v30 = vsub.f32 %v2530_v62, %v1125_v33 }
 0xa8c   :  { %v2617_v46 = vpop.eup %2152 }
 0xa8d   :  { %v1127_v36 = vmul.f32 %v2617_v46, %v1126_v30 }
 0xa8f   :  { %v1128_v58 = vsel %vm1094_vm12, %v1127_v36, 0.0 }
 0xa90   :  { %v1129_v16 = vadd.f32 %v1128_v58, %v1065_v12 }
 0xa92   :  { %1131 = vst [vmem:[#allocation1 + $0x10] sm:$0xff] %v1129_v16 }
 0xa99   :  { %v2621_v2 = vld [vmem:[#allocation1 + $0x10] ss:$0 sm:$0xff] }
 0xa9a   :  { %v1172_v1 = vmul.f32 %v2621_v2, %v1129_v16  ;;  %v1163_v39 = vmul.f32 %v2621_v2, %v2621_v2 }
 0xa9c   :  { %1173 = vadd.xlane.f32.xlu0 %v1172_v1  ;;  %1164 = vadd.xlane.f32.xlu1 %v1163_v39 }
 0xab1   :  { %v1074_v40 = vpop.xlane.xlu1 %1073 }
 0xab2   :  { %v1075_v22 = vsub.f32 %v2536_v37, %v1074_v40 }
 0xab4   :  { %v1076_v41 = vmul.f32 %v2595_v5, %v1075_v22 }
 0xab6   :  { %v1077_v42 = vsel %vm1030_vm9, %v1076_v41, 0.0 }
 0xab7   :  { %v1078_v26 = vadd.f32 %v1077_v42, %v1014_v15 }
 0xab9   :  { %v1136_v43 = vmul.f32 %v2600_v51, %v1078_v26 }
 0xabb   :  { %1137 = vadd.xlane.f32.xlu1 %v1136_v43 }
 0xadd   :  { %v1023_v44 = vpop.xlane.xlu0 %1022 }
 0xade   :  { %v1024_v47 = vsub.f32 %v2588_v52, %v1023_v44 }
 0xae0   :  { %v1025_v48 = vmul.f32 %v2570_v35, %v1024_v47 }
 0xae2   :  { %v1026_v49 = vsel %vm966_vm6, %v1025_v48, 0.0  ;;  %v1262_v48 = vld [vmem:[#allocation0 + $0x12] ss:$0 sm:$0xff]  ;;  %vm1278_vm6 = vmand %vm1258_vm3, %vm221_vm5 }
 0xae3   :  { %v1027_v50 = vadd.f32 %v1026_v49, %v963_v56 }
 0xae5   :  { %v1085_v27 = vmul.f32 %v2575_v3, %v1027_v50 }
 0xae7   :  { %1086 = vadd.xlane.f32.xlu0 %v1085_v27 }
 0xb25   :  { %v1165_v54 = vpop.xlane.xlu1 %1164  ;;  %v1174_v59 = vpop.xlane.xlu0 %1173 }
 0xb26   :  { %v1166_v57 = vsub.f32 %v1162_v53, %v1165_v54  ;;  %v1175_v60 = vsub.f32 %v2530_v62, %v1174_v59 }
 0xb28   :  { %2154 = vrsqrt.f32 %v1166_v57 }
 0xb35   :  { %v2635_v61 = vpop.eup %2154 }
 0xb36   :  { %v1176_v63 = vmul.f32 %v2635_v61, %v1175_v60 }
 0xb38   :  { %v1177_v35 = vsel %vm1158_vm13, %v1176_v63, 0.0 }
 0xb39   :  { %v1178_v17 = vadd.f32 %v1177_v35, %v1129_v16 }
 0xb3b   :  { %1180 = vst [vmem:[#allocation1 + $0x10] sm:$0xff] %v1178_v17 }
 0xb42   :  { %v2639_v25 = vld [vmem:[#allocation1 + $0x11] ss:$0 sm:$0xff] }
 0xb43   :  { %v1212_v21 = vmul.f32 %v2639_v25, %v2639_v25  ;;  %v1221_v8 = vmul.f32 %v2639_v25, %v1178_v17 }
 0xb44   :  { %v1138_v10 = vpop.xlane.xlu1 %1137 }
 0xb45   :  { %v1139_v3 = vsub.f32 %v2536_v37, %v1138_v10  ;;  %1213 = vadd.xlane.f32.xlu1 %v1212_v21 }
 0xb47   :  { %v1140_v6 = vmul.f32 %v2617_v46, %v1139_v3 }
 0xb49   :  { %v1141_v7 = vsel %vm1094_vm12, %v1140_v6, 0.0  ;;  %1222 = vadd.xlane.f32.xlu1 %v1221_v8 }
 0xb4a   :  { %v1142_v38 = vadd.f32 %v1141_v7, %v1078_v26 }
 0xb4c   :  { %v1185_v45 = vmul.f32 %v2621_v2, %v1142_v38 }
 0xb4e   :  { %1186 = vadd.xlane.f32.xlu0 %v1185_v45 }
 0xb70   :  { %v1087_v18 = vpop.xlane.xlu0 %1086 }
 0xb71   :  { %v1088_v13 = vsub.f32 %v2588_v52, %v1087_v18 }
 0xb73   :  { %v1089_v12 = vmul.f32 %v2595_v5, %v1088_v13 }
 0xb75   :  { %v1090_v9 = vsel %vm1030_vm9, %v1089_v12, 0.0  ;;  %vm1329_vm9 = vmand %vm1309_vm7, %vm295_vm8 }
 0xb76   :  { %v1091_v0 = vadd.f32 %v1090_v9, %v1027_v50  ;;  %v1313_v9 = vld [vmem:[#allocation0 + $0x13] ss:$0 sm:$0xff] }
 0xb78   :  { %v1149_v11 = vmul.f32 %v2600_v51, %v1091_v0 }
 0xb7a   :  { %1150 = vadd.xlane.f32.xlu0 %v1149_v11 }
 0xbce   :  { %v1214_v34 = vpop.xlane.xlu1 %1213 }
 0xbcf   :  { %v1215_v15 = vsub.f32 %v1211_v14, %v1214_v34 }
 0xbd1   :  { %2156 = vrsqrt.f32 %v1215_v15 }
 0xbd2   :  { %v1223_v23 = vpop.xlane.xlu1 %1222 }
 0xbd3   :  { %v1224_v56 = vsub.f32 %v2530_v62, %v1223_v23 }
 0xbd7   :  { %v1187_v19 = vpop.xlane.xlu0 %1186 }
 0xbd8   :  { %v1188_v20 = vsub.f32 %v2536_v37, %v1187_v19 }
 0xbda   :  { %v1189_v55 = vmul.f32 %v2635_v61, %v1188_v20 }
 0xbdc   :  { %v1190_v24 = vsel %vm1158_vm13, %v1189_v55, 0.0 }
 0xbdd   :  { %v1191_v5 = vadd.f32 %v1190_v24, %v1142_v38 }
 0xbde   :  { %v2657_v51 = vpop.eup %2156 }
 0xbdf   :  { %v1236_v28 = vmul.f32 %v2639_v25, %v1191_v5  ;;  %v1225_v29 = vmul.f32 %v2657_v51, %v1224_v56 }
 0xbe1   :  { %1237 = vadd.xlane.f32.xlu1 %v1236_v28  ;;  %v1228_v4 = vsel %vm1227_vm0, %v1225_v29, 0.0 }
 0xbe2   :  { %v1229_v32 = vadd.f32 %v1228_v4, %v1178_v17 }
 0xbe4   :  { %1231 = vst [vmem:[#allocation1 + $0x10] sm:$0xff] %v1229_v32 }
 0xbeb   :  { %v2662_v33 = vld [vmem:[#allocation1 + $0x12] ss:$0 sm:$0xff] }
 0xbec   :  { %v1263_v30 = vmul.f32 %v2662_v33, %v2662_v33  ;;  %v1272_v36 = vmul.f32 %v2662_v33, %v1229_v32 }
 0xbee   :  { %1264 = vadd.xlane.f32.xlu0 %v1263_v30  ;;  %1273 = vadd.xlane.f32.xlu1 %v1272_v36 }
 0xc03   :  { %v1151_v58 = vpop.xlane.xlu0 %1150 }
 0xc04   :  { %v1152_v16 = vsub.f32 %v2588_v52, %v1151_v58 }
 0xc06   :  { %v1153_v1 = vmul.f32 %v2617_v46, %v1152_v16 }
 0xc08   :  { %v1154_v39 = vsel %vm1094_vm12, %v1153_v1, 0.0 }
 0xc09   :  { %v1155_v40 = vadd.f32 %v1154_v39, %v1091_v0 }
 0xc0b   :  { %v1198_v22 = vmul.f32 %v2621_v2, %v1155_v40 }
 0xc0d   :  { %1199 = vadd.xlane.f32.xlu0 %v1198_v22 }
 0xc6a   :  { %v1238_v41 = vpop.xlane.xlu1 %1237 }
 0xc6b   :  { %v1239_v42 = vsub.f32 %v2536_v37, %v1238_v41 }
 0xc6d   :  { %v1240_v26 = vmul.f32 %v2657_v51, %v1239_v42  ;;  %v1364_v42 = vld [vmem:[#allocation0 + $0x14] ss:$0 sm:$0xff] }
 0xc6f   :  { %v1241_v43 = vsel %vm1207_vm15, %v1240_v26, 0.0 }
 0xc70   :  { %v1242_v44 = vadd.f32 %v1241_v43, %v1191_v5 }
 0xc72   :  { %v1287_v47 = vmul.f32 %v2662_v33, %v1242_v44 }
 0xc74   :  { %1288 = vadd.xlane.f32.xlu1 %v1287_v47 }
 0xc77   :  { %v1265_v49 = vpop.xlane.xlu0 %1264  ;;  %v1274_v27 = vpop.xlane.xlu1 %1273 }
 0xc78   :  { %v1266_v50 = vsub.f32 %v1262_v48, %v1265_v49  ;;  %v1275_v2 = vsub.f32 %v2530_v62, %v1274_v27 }
 0xc7a   :  { %2158 = vrsqrt.f32 %v1266_v50 }
 0xc87   :  { %v2159_v53 = vpop.eup %2158 }
 0xc88   :  { %v1276_v54 = vmul.f32 %v2159_v53, %v1275_v2 }
 0xc8a   :  { %v1279_v57 = vsel %vm1278_vm6, %v1276_v54, 0.0 }
 0xc8b   :  { %v1280_v59 = vadd.f32 %v1279_v57, %v1229_v32 }
 0xc8d   :  { %1282 = vst [vmem:[#allocation1 + $0x10] sm:$0xff] %v1280_v59 }
 0xc94   :  { %v1311_v63 = vld [vmem:[#allocation1 + $0x13] ss:$0 sm:$0xff] }
 0xc95   :  { %v1314_v17 = vmul.f32 %v1311_v63, %v1311_v63  ;;  %v1323_v21 = vmul.f32 %v1311_v63, %v1280_v59 }
 0xc96   :  { %v1200_v60 = vpop.xlane.xlu0 %1199 }
 0xc97   :  { %v1201_v35 = vsub.f32 %v2588_v52, %v1200_v60  ;;  %1315 = vadd.xlane.f32.xlu0 %v1314_v17 }
 0xc99   :  { %v1202_v10 = vmul.f32 %v2635_v61, %v1201_v35 }
 0xc9b   :  { %v1203_v3 = vsel %vm1158_vm13, %v1202_v10, 0.0  ;;  %1324 = vadd.xlane.f32.xlu0 %v1323_v21  ;;  %vm1380_vm13 = vmand %vm1360_vm10, %vm369_vm11 }
 0xc9c   :  { %v1204_v6 = vadd.f32 %v1203_v3, %v1155_v40 }
 0xc9e   :  { %v1249_v7 = vmul.f32 %v2639_v25, %v1204_v6 }
 0xca0   :  { %1250 = vadd.xlane.f32.xlu1 %v1249_v7 }
 0xcfd   :  { %v1289_v8 = vpop.xlane.xlu1 %1288 }
 0xcfe   :  { %v1290_v38 = vsub.f32 %v2536_v37, %v1289_v8 }
 0xd00   :  { %v1291_v45 = vmul.f32 %v2159_v53, %v1290_v38  ;;  %v1415_v38 = vld [vmem:[#allocation0 + $0x15] ss:$0 sm:$0xff] }
 0xd02   :  { %v1292_v18 = vsel %vm1258_vm3, %v1291_v45, 0.0 }
 0xd03   :  { %v1293_v13 = vadd.f32 %v1292_v18, %v1242_v44 }
 0xd05   :  { %v1338_v12 = vmul.f32 %v1311_v63, %v1293_v13 }
 0xd07   :  { %1339 = vadd.xlane.f32.xlu1 %v1338_v12 }
 0xd20   :  { %v1316_v61 = vpop.xlane.xlu0 %1315 }
 0xd21   :  { %v1317_v0 = vsub.f32 %v1313_v9, %v1316_v61 }
 0xd23   :  { %2160 = vrsqrt.f32 %v1317_v0 }
 0xd24   :  { %v1325_v25 = vpop.xlane.xlu0 %1324 }
 0xd25   :  { %v1326_v20 = vsub.f32 %v2530_v62, %v1325_v25 }
 0xd29   :  { %v1251_v11 = vpop.xlane.xlu1 %1250 }
 0xd2a   :  { %v1252_v14 = vsub.f32 %v2588_v52, %v1251_v11 }
 0xd2c   :  { %v1253_v34 = vmul.f32 %v2657_v51, %v1252_v14 }
 0xd2e   :  { %v1254_v15 = vsel %vm1207_vm15, %v1253_v34, 0.0  ;;  %vm1411_vm15 = vcmask 179368  }
 0xd2f   :  { %v1255_v19 = vadd.f32 %v1254_v15, %v1204_v6  ;;  %vm1431_vm0 = vmand %vm1411_vm15, %vm443_vm14 }
 0xd30   :  { %v2161_v23 = vpop.eup %2160 }
 0xd31   :  { %v1300_v55 = vmul.f32 %v2662_v33, %v1255_v19  ;;  %v1327_v24 = vmul.f32 %v2161_v23, %v1326_v20 }
 0xd33   :  { %1301 = vadd.xlane.f32.xlu0 %v1300_v55  ;;  %v1330_v5 = vsel %vm1329_vm9, %v1327_v24, 0.0  ;;  %vm1564_vm9 = vcmask 203968  }
 0xd34   :  { %v1331_v56 = vadd.f32 %v1330_v5, %v1280_v59 }
 0xd36   :  { %1333 = vst [vmem:[#allocation1 + $0x10] sm:$0xff] %v1331_v56 }
 0xd3d   :  { %v1362_v28 = vld [vmem:[#allocation1 + $0x14] ss:$0 sm:$0xff] }
 0xd3e   :  { %v1365_v51 = vmul.f32 %v1362_v28, %v1362_v28  ;;  %v1374_v29 = vmul.f32 %v1362_v28, %v1331_v56 }
 0xd40   :  { %1366 = vadd.xlane.f32.xlu1 %v1365_v51  ;;  %1375 = vadd.xlane.f32.xlu0 %v1374_v29 }
 0xd90   :  { %v1340_v4 = vpop.xlane.xlu1 %1339 }
 0xd91   :  { %v1341_v32 = vsub.f32 %v2536_v37, %v1340_v4 }
 0xd93   :  { %v1342_v30 = vmul.f32 %v2161_v23, %v1341_v32  ;;  %v1466_v32 = vld [vmem:[#allocation0 + $0x16] ss:$0 sm:$0xff] }
 0xd95   :  { %v1343_v33 = vsel %vm1309_vm7, %v1342_v30, 0.0 }
 0xd96   :  { %v1344_v36 = vadd.f32 %v1343_v33, %v1293_v13 }
 0xd98   :  { %v1389_v58 = vmul.f32 %v1362_v28, %v1344_v36 }
 0xd9a   :  { %1390 = vadd.xlane.f32.xlu1 %v1389_v58 }
 0xdbc   :  { %v1302_v16 = vpop.xlane.xlu0 %1301 }
 0xdbd   :  { %v1303_v1 = vsub.f32 %v2588_v52, %v1302_v16 }
 0xdbf   :  { %v1304_v39 = vmul.f32 %v2159_v53, %v1303_v1 }
 0xdc1   :  { %v1305_v40 = vsel %vm1258_vm3, %v1304_v39, 0.0  ;;  %vm1462_vm3 = vcmask 187568  }
 0xdc2   :  { %v1306_v22 = vadd.f32 %v1305_v40, %v1255_v19  ;;  %vm1482_vm6 = vmand %vm1462_vm3, %vm517_vm1 }
 0xdc4   :  { %v1351_v41 = vmul.f32 %v1311_v63, %v1306_v22 }
 0xdc6   :  { %1352 = vadd.xlane.f32.xlu0 %v1351_v41 }
 0xdc9   :  { %v1367_v26 = vpop.xlane.xlu1 %1366  ;;  %v1376_v44 = vpop.xlane.xlu0 %1375 }
 0xdca   :  { %v1368_v43 = vsub.f32 %v1364_v42, %v1367_v26  ;;  %v1377_v47 = vsub.f32 %v2530_v62, %v1376_v44 }
 0xdcc   :  { %2162 = vrsqrt.f32 %v1368_v43 }
 0xdd9   :  { %v2163_v48 = vpop.eup %2162 }
 0xdda   :  { %v1378_v49 = vmul.f32 %v2163_v48, %v1377_v47 }
 0xddc   :  { %v1381_v50 = vsel %vm1380_vm13, %v1378_v49, 0.0 }
 0xddd   :  { %v1382_v27 = vadd.f32 %v1381_v50, %v1331_v56 }
 0xddf   :  { %1384 = vst [vmem:[#allocation1 + $0x10] sm:$0xff] %v1382_v27 }
 0xde6   :  { %v1413_v2 = vld [vmem:[#allocation1 + $0x15] ss:$0 sm:$0xff] }
 0xde7   :  { %v1425_v53 = vmul.f32 %v1413_v2, %v1382_v27  ;;  %v1416_v54 = vmul.f32 %v1413_v2, %v1413_v2 }
 0xde9   :  { %1426 = vadd.xlane.f32.xlu0 %v1425_v53  ;;  %1417 = vadd.xlane.f32.xlu1 %v1416_v54  ;;  %v1517_v54 = vld [vmem:[#allocation0 + $0x17] ss:$0 sm:$0xff] }
 0xe23   :  { %v1391_v57 = vpop.xlane.xlu1 %1390 }
 0xe24   :  { %v1392_v59 = vsub.f32 %v2536_v37, %v1391_v57 }
 0xe26   :  { %v1393_v60 = vmul.f32 %v2163_v48, %v1392_v59 }
 0xe28   :  { %v1394_v63 = vsel %vm1360_vm10, %v1393_v60, 0.0 }
 0xe29   :  { %v1395_v35 = vadd.f32 %v1394_v63, %v1344_v36 }
 0xe2b   :  { %v1440_v17 = vmul.f32 %v1413_v2, %v1395_v35 }
 0xe2d   :  { %1441 = vadd.xlane.f32.xlu1 %v1440_v17 }
 0xe4f   :  { %v1353_v10 = vpop.xlane.xlu0 %1352 }
 0xe50   :  { %v1354_v3 = vsub.f32 %v2588_v52, %v1353_v10 }
 0xe52   :  { %v1355_v21 = vmul.f32 %v2161_v23, %v1354_v3 }
 0xe54   :  { %v1356_v6 = vsel %vm1309_vm7, %v1355_v21, 0.0  ;;  %vm1513_vm7 = vcmask 195768  }
 0xe55   :  { %v1357_v7 = vadd.f32 %v1356_v6, %v1306_v22 }
 0xe57   :  { %v1402_v8 = vmul.f32 %v1362_v28, %v1357_v7 }
 0xe59   :  { %1403 = vadd.xlane.f32.xlu0 %v1402_v8 }
 0xe72   :  { %v1418_v45 = vpop.xlane.xlu1 %1417  ;;  %v1427_v13 = vpop.xlane.xlu0 %1426 }
 0xe73   :  { %v1419_v18 = vsub.f32 %v1415_v38, %v1418_v45  ;;  %v1428_v12 = vsub.f32 %v2530_v62, %v1427_v13 }
 0xe75   :  { %2164 = vrsqrt.f32 %v1419_v18 }
 0xe82   :  { %v2165_v9 = vpop.eup %2164 }
 0xe83   :  { %v1429_v61 = vmul.f32 %v2165_v9, %v1428_v12  ;;  %v1568_v12 = vld [vmem:[#allocation0 + $0x18] ss:$0 sm:$0xff] }
 0xe85   :  { %v1432_v0 = vsel %vm1431_vm0, %v1429_v61, 0.0 }
 0xe86   :  { %v1433_v11 = vadd.f32 %v1432_v0, %v1382_v27  ;;  %v2732_v0 = vld [vmem:[#allocation0 + $0x18] sm:$0xff] }
 0xe88   :  { %1435 = vst [vmem:[#allocation1 + $0x10] sm:$0xff] %v1433_v11 }
 0xe8f   :  { %v1464_v14 = vld [vmem:[#allocation1 + $0x16] ss:$0 sm:$0xff] }
 0xe90   :  { %v1476_v34 = vmul.f32 %v1464_v14, %v1433_v11  ;;  %v1467_v25 = vmul.f32 %v1464_v14, %v1464_v14 }
 0xe92   :  { %1477 = vadd.xlane.f32.xlu0 %v1476_v34  ;;  %1468 = vadd.xlane.f32.xlu1 %v1467_v25 }
 0xeb6   :  { %v1442_v15 = vpop.xlane.xlu1 %1441 }
 0xeb7   :  { %v1443_v19 = vsub.f32 %v2536_v37, %v1442_v15 }
 0xeb9   :  { %v1444_v20 = vmul.f32 %v2165_v9, %v1443_v19 }
 0xebb   :  { %v1445_v55 = vsel %vm1411_vm15, %v1444_v20, 0.0 }
 0xebc   :  { %v1446_v23 = vadd.f32 %v1445_v55, %v1395_v35 }
 0xebe   :  { %v1491_v24 = vmul.f32 %v1464_v14, %v1446_v23 }
 0xec0   :  { %1492 = vadd.xlane.f32.xlu1 %v1491_v24 }
 0xee2   :  { %v1404_v5 = vpop.xlane.xlu0 %1403 }
 0xee3   :  { %v1405_v56 = vsub.f32 %v2588_v52, %v1404_v5 }
 0xee5   :  { %v1406_v28 = vmul.f32 %v2163_v48, %v1405_v56 }
 0xee7   :  { %v1407_v51 = vsel %vm1360_vm10, %v1406_v28, 0.0  ;;  %vm1600_vm10 = vcmask 212168  }
 0xee8   :  { %v1408_v29 = vadd.f32 %v1407_v51, %v1357_v7  ;;  %vm1620_vm13 = vmand %vm1600_vm10, %vm147_vm2 }
 0xeea   :  { %v1453_v4 = vmul.f32 %v1413_v2, %v1408_v29 }
 0xeec   :  { %1454 = vadd.xlane.f32.xlu0 %v1453_v4  ;;  %v1604_v4 = vld [vmem:[#allocation0 + $0x19] ss:$0 sm:$0xff] }
 0xf1b   :  { %v1469_v30 = vpop.xlane.xlu1 %1468  ;;  %v1478_v36 = vpop.xlane.xlu0 %1477 }
 0xf1c   :  { %v1470_v33 = vsub.f32 %v1466_v32, %v1469_v30  ;;  %v1479_v58 = vsub.f32 %v2530_v62, %v1478_v36 }
 0xf1e   :  { %2166 = vrsqrt.f32 %v1470_v33 }
 0xf2b   :  { %v2167_v16 = vpop.eup %2166 }
 0xf2c   :  { %v1480_v1 = vmul.f32 %v2167_v16, %v1479_v58 }
 0xf2e   :  { %v1483_v39 = vsel %vm1482_vm6, %v1480_v1, 0.0 }
 0xf2f   :  { %v2712_v40 = vadd.f32 %v1483_v39, %v1433_v11 }
 0xf31   :  { %1486 = vst [vmem:[#allocation1 + $0x10] sm:$0xff] %v2712_v40 }
 0xf38   :  { %v2715_v22 = vld [vmem:[#allocation1 + $0x17] ss:$0 sm:$0xff] }
 0xf39   :  { %v1518_v41 = vmul.f32 %v2715_v22, %v2715_v22 }
 0xf3b   :  { %1519 = vadd.xlane.f32.xlu1 %v1518_v41 }
 0xf49   :  { %v1493_v42 = vpop.xlane.xlu1 %1492 }
 0xf4a   :  { %v1494_v26 = vsub.f32 %v2536_v37, %v1493_v42 }
 0xf4c   :  { %v1495_v62 = vmul.f32 %v2167_v16, %v1494_v26 }
 0xf4e   :  { %v1496_v43 = vsel %vm1462_vm3, %v1495_v62, 0.0 }
 0xf4f   :  { %v1497_v44 = vadd.f32 %v1496_v43, %v1446_v23 }
 0xf51   :  { %v1542_v47 = vmul.f32 %v2715_v22, %v1497_v44 }
 0xf53   :  { %1543 = vadd.xlane.f32.xlu0 %v1542_v47 }
 0xf75   :  { %v1455_v48 = vpop.xlane.xlu0 %1454 }
 0xf76   :  { %v1456_v49 = vsub.f32 %v2588_v52, %v1455_v48 }
 0xf78   :  { %v1457_v50 = vmul.f32 %v2165_v9, %v1456_v49 }
 0xf7a   :  { %v1458_v27 = vsel %vm1411_vm15, %v1457_v50, 0.0  ;;  %vm1638_vm15 = vcmask 220368  }
 0xf7b   :  { %v1459_v2 = vadd.f32 %v1458_v27, %v1408_v29  ;;  %vm1658_vm0 = vmand %vm1638_vm15, %vm221_vm5 }
 0xf7d   :  { %v1504_v53 = vmul.f32 %v1464_v14, %v1459_v2 }
 0xf7f   :  { %1505 = vadd.xlane.f32.xlu1 %v1504_v53 }
 0xfc4   :  { %v1520_v57 = vpop.xlane.xlu1 %1519 }
 0xfc5   :  { %v1521_v59 = vsub.f32 %v1517_v54, %v1520_v57  ;;  %v1642_v57 = vld [vmem:[#allocation0 + $0x1a] ss:$0 sm:$0xff] }
 0xfc7   :  { %2168 = vrsqrt.f32 %v1521_v59 }
 0xfd4   :  { %v2725_v35 = vpop.eup %2168 }
 0xfdc   :  { %v1544_v60 = vpop.xlane.xlu0 %1543 }
 0xfdd   :  { %v1545_v63 = vsub.f32 %v2536_v37, %v1544_v60 }
 0xfdf   :  { %v1546_v17 = vmul.f32 %v2725_v35, %v1545_v63 }
 0xfe1   :  { %v1547_v10 = vsel %vm1513_vm7, %v1546_v17, 0.0 }
 0xfe2   :  { %v1548_v3 = vadd.f32 %v1547_v10, %v1497_v44 }
 0xfe4   :  { %1550 = vst [vmem:[#allocation1 + $0x18] sm:$0xff] %v1548_v3 }
 0xfeb   :  { %v1566_v21 = vld [vmem:[#allocation1 + $0x18] ss:$0 sm:$0xff] }
 0xfec   :  { %v1578_v6 = vmul.f32 %v1566_v21, %v1548_v3  ;;  %v1569_v7 = vmul.f32 %v1566_v21, %v1566_v21 }
 0xfee   :  { %1579 = vadd.xlane.f32.xlu1 %v1578_v6  ;;  %1570 = vadd.xlane.f32.xlu0 %v1569_v7 }
0x1008   :  { %v1506_v8 = vpop.xlane.xlu1 %1505 }
0x1009   :  { %v1507_v38 = vsub.f32 %v2588_v52, %v1506_v8 }
0x100b   :  { %v1508_v45 = vmul.f32 %v2167_v16, %v1507_v38 }
0x100d   :  { %v1509_v37 = vsel %vm1462_vm3, %v1508_v45, 0.0  ;;  %vm1676_vm3 = vcmask 228568  }
0x100e   :  { %v1510_v18 = vadd.f32 %v1509_v37, %v1459_v2  ;;  %vm1696_vm6 = vmand %vm1676_vm3, %vm295_vm8 }
0x1010   :  { %v1555_v13 = vmul.f32 %v2715_v22, %v1510_v18 }
0x1012   :  { %1556 = vadd.xlane.f32.xlu0 %v1555_v13 }
0x1077   :  { %v1571_v9 = vpop.xlane.xlu0 %1570  ;;  %v1580_v11 = vpop.xlane.xlu1 %1579 }
0x1078   :  { %v1572_v61 = vsub.f32 %v1568_v12, %v1571_v9  ;;  %v1581_v14 = vsub.f32 %v2732_v0, %v1580_v11  ;;  %v1680_v11 = vld [vmem:[#allocation0 + $0x1b] ss:$0 sm:$0xff] }
0x107a   :  { %2170 = vrsqrt.f32 %v1572_v61 }
0x1087   :  { %v2171_v34 = vpop.eup %2170 }
0x1088   :  { %v1582_v25 = vmul.f32 %v2171_v34, %v1581_v14 }
0x108a   :  { %v1583_v15 = vsel %vm1564_vm9, %v1582_v25, 0.0 }
0x108b   :  { %v1584_v19 = vadd.f32 %v1583_v15, %v1548_v3 }
0x108d   :  { %1586 = vst [vmem:[#allocation1 + $0x18] sm:$0xff] %v1584_v19 }
0x1094   :  { %v1602_v20 = vld [vmem:[#allocation1 + $0x19] ss:$0 sm:$0xff] }
0x1095   :  { %v1605_v55 = vmul.f32 %v1602_v20, %v1602_v20  ;;  %v1614_v23 = vmul.f32 %v1602_v20, %v1584_v19 }
0x1097   :  { %1606 = vadd.xlane.f32.xlu1 %v1605_v55 }
0x109b   :  { %v1557_v24 = vpop.xlane.xlu0 %1556  ;;  %1615 = vadd.xlane.f32.xlu1 %v1614_v23 }
0x109c   :  { %v1558_v5 = vsub.f32 %v2588_v52, %v1557_v24 }
0x109e   :  { %v1559_v56 = vmul.f32 %v2725_v35, %v1558_v5 }
0x10a0   :  { %v1560_v28 = vsel %vm1513_vm7, %v1559_v56, 0.0  ;;  %v2754_v56 = vld [vmem:[#allocation0 + $0x20] sm:$0xff] }
0x10a1   :  { %v1561_v51 = vadd.f32 %v1560_v28, %v1510_v18 }
0x10a3   :  { %v1591_v29 = vmul.f32 %v1566_v21, %v1561_v51 }
0x10a5   :  { %1592 = vadd.xlane.f32.xlu0 %v1591_v29 }
0x1120   :  { %v1607_v32 = vpop.xlane.xlu1 %1606 }
0x1121   :  { %v1608_v30 = vsub.f32 %v1604_v4, %v1607_v32 }
0x1123   :  { %2172 = vrsqrt.f32 %v1608_v30 }
0x1124   :  { %v1616_v33 = vpop.xlane.xlu1 %1615 }
0x1125   :  { %v1617_v58 = vsub.f32 %v2732_v0, %v1616_v33  ;;  %v1718_v33 = vld [vmem:[#allocation0 + $0x1c] ss:$0 sm:$0xff] }
0x112e   :  { %v1593_v36 = vpop.xlane.xlu0 %1592 }
0x112f   :  { %v1594_v16 = vsub.f32 %v2588_v52, %v1593_v36 }
0x1130   :  { %v2173_v1 = vpop.eup %2172 }
0x1131   :  { %v1618_v39 = vmul.f32 %v2173_v1, %v1617_v58  ;;  %v1595_v41 = vmul.f32 %v2171_v34, %v1594_v16 }
0x1133   :  { %v1621_v42 = vsel %vm1620_vm13, %v1618_v39, 0.0  ;;  %v1596_v26 = vsel %vm1564_vm9, %v1595_v41, 0.0  ;;  %vm1714_vm9 = vcmask 236768   ;;  %vm1752_vm13 = vcmask 244968  }
0x1134   :  { %v1622_v62 = vadd.f32 %v1621_v42, %v1584_v19  ;;  %v1597_v43 = vadd.f32 %v1596_v26, %v1561_v51 }
0x1136   :  { %1624 = vst [vmem:[#allocation1 + $0x18] sm:$0xff] %v1622_v62  ;;  %v1629_v44 = vmul.f32 %v1602_v20, %v1597_v43 }
0x1138   :  { %1630 = vadd.xlane.f32.xlu0 %v1629_v44 }
0x113d   :  { %v1640_v47 = vld [vmem:[#allocation1 + $0x1a] ss:$0 sm:$0xff] }
0x113e   :  { %v1643_v48 = vmul.f32 %v1640_v47, %v1640_v47  ;;  %v1652_v49 = vmul.f32 %v1640_v47, %v1622_v62 }
0x1140   :  { %1644 = vadd.xlane.f32.xlu1 %v1643_v48  ;;  %1653 = vadd.xlane.f32.xlu0 %v1652_v49 }
0x11c1   :  { %v1631_v50 = vpop.xlane.xlu0 %1630 }
0x11c2   :  { %v1632_v27 = vsub.f32 %v2588_v52, %v1631_v50 }
0x11c4   :  { %v1633_v2 = vmul.f32 %v2173_v1, %v1632_v27 }
0x11c6   :  { %v1634_v53 = vsel %vm1600_vm10, %v1633_v2, 0.0  ;;  %vm1734_vm10 = vmand %vm1714_vm9, %vm369_vm11 }
0x11c7   :  { %v1635_v54 = vadd.f32 %v1634_v53, %v1597_v43  ;;  %v1756_v53 = vld [vmem:[#allocation0 + $0x1d] ss:$0 sm:$0xff] }
0x11c9   :  { %v1645_v59 = vpop.xlane.xlu1 %1644  ;;  %v1667_v60 = vmul.f32 %v1640_v47, %v1635_v54  ;;  %v1654_v17 = vpop.xlane.xlu0 %1653 }
0x11ca   :  { %v1646_v63 = vsub.f32 %v1642_v57, %v1645_v59  ;;  %v1655_v10 = vsub.f32 %v2732_v0, %v1654_v17 }
0x11cb   :  { %1668 = vadd.xlane.f32.xlu1 %v1667_v60 }
0x11cc   :  { %2174 = vrsqrt.f32 %v1646_v63 }
0x11d9   :  { %v2175_v3 = vpop.eup %2174 }
0x11da   :  { %v1656_v21 = vmul.f32 %v2175_v3, %v1655_v10 }
0x11dc   :  { %v1659_v6 = vsel %vm1658_vm0, %v1656_v21, 0.0  ;;  %vm1790_vm0 = vcmask 253168  }
0x11dd   :  { %v1660_v7 = vadd.f32 %v1659_v6, %v1622_v62 }
0x11df   :  { %1662 = vst [vmem:[#allocation1 + $0x18] sm:$0xff] %v1660_v7 }
0x11e6   :  { %v1678_v8 = vld [vmem:[#allocation1 + $0x1b] ss:$0 sm:$0xff] }
0x11e7   :  { %v1690_v38 = vmul.f32 %v1678_v8, %v1660_v7  ;;  %v1681_v45 = vmul.f32 %v1678_v8, %v1678_v8 }
0x11e9   :  { %1691 = vadd.xlane.f32.xlu1 %v1690_v38  ;;  %1682 = vadd.xlane.f32.xlu0 %v1681_v45 }
0x1254   :  { %v1669_v37 = vpop.xlane.xlu1 %1668 }
0x1255   :  { %v1670_v18 = vsub.f32 %v2588_v52, %v1669_v37 }
0x1257   :  { %v1671_v13 = vmul.f32 %v2175_v3, %v1670_v18 }
0x1259   :  { %v1672_v12 = vsel %vm1638_vm15, %v1671_v13, 0.0  ;;  %vm1772_vm15 = vmand %vm1752_vm13, %vm443_vm14 }
0x125a   :  { %v1673_v9 = vadd.f32 %v1672_v12, %v1635_v54  ;;  %v1794_v12 = vld [vmem:[#allocation0 + $0x1e] ss:$0 sm:$0xff] }
0x125c   :  { %v1705_v61 = vmul.f32 %v1678_v8, %v1673_v9 }
0x125e   :  { %1706 = vadd.xlane.f32.xlu0 %v1705_v61 }
0x1272   :  { %v1683_v14 = vpop.xlane.xlu0 %1682  ;;  %v1692_v25 = vpop.xlane.xlu1 %1691 }
0x1273   :  { %v1684_v34 = vsub.f32 %v1680_v11, %v1683_v14  ;;  %v1693_v15 = vsub.f32 %v2732_v0, %v1692_v25 }
0x1275   :  { %2176 = vrsqrt.f32 %v1684_v34 }
0x1282   :  { %v2177_v19 = vpop.eup %2176 }
0x1283   :  { %v1694_v20 = vmul.f32 %v2177_v19, %v1693_v15 }
0x1285   :  { %v1697_v52 = vsel %vm1696_vm6, %v1694_v20, 0.0  ;;  %vm1828_vm6 = vcmask 261368  }
0x1286   :  { %v1698_v55 = vadd.f32 %v1697_v52, %v1660_v7 }
0x1288   :  { %1700 = vst [vmem:[#allocation1 + $0x18] sm:$0xff] %v1698_v55 }
0x128f   :  { %v1716_v23 = vld [vmem:[#allocation1 + $0x1c] ss:$0 sm:$0xff] }
0x1290   :  { %v1728_v24 = vmul.f32 %v1716_v23, %v1698_v55  ;;  %v1719_v5 = vmul.f32 %v1716_v23, %v1716_v23 }
0x1292   :  { %1729 = vadd.xlane.f32.xlu0 %v1728_v24  ;;  %1720 = vadd.xlane.f32.xlu1 %v1719_v5 }
0x12e7   :  { %v1707_v28 = vpop.xlane.xlu0 %1706 }
0x12e8   :  { %v1708_v51 = vsub.f32 %v2754_v56, %v1707_v28 }
0x12ea   :  { %v1709_v29 = vmul.f32 %v2177_v19, %v1708_v51 }
0x12ec   :  { %v1710_v4 = vsel %vm1676_vm3, %v1709_v29, 0.0  ;;  %vm1810_vm3 = vmand %vm1790_vm0, %vm517_vm1  ;;  %v1832_v29 = vld [vmem:[#allocation0 + $0x1f] ss:$0 sm:$0xff] }
0x12ed   :  { %v1711_v32 = vadd.f32 %v1710_v4, %v1673_v9 }
0x12ef   :  { %v1743_v30 = vmul.f32 %v1716_v23, %v1711_v32 }
0x12f1   :  { %1744 = vadd.xlane.f32.xlu1 %v1743_v30 }
0x131b   :  { %v1721_v36 = vpop.xlane.xlu1 %1720  ;;  %v1730_v16 = vpop.xlane.xlu0 %1729 }
0x131c   :  { %v1722_v58 = vsub.f32 %v1718_v33, %v1721_v36  ;;  %v1731_v1 = vsub.f32 %v2732_v0, %v1730_v16 }
0x131e   :  { %2178 = vrsqrt.f32 %v1722_v58 }
0x132b   :  { %v2179_v39 = vpop.eup %2178 }
0x132c   :  { %v1732_v41 = vmul.f32 %v2179_v39, %v1731_v1 }
0x132e   :  { %v1735_v42 = vsel %vm1734_vm10, %v1732_v41, 0.0  ;;  %vm1889_vm10 = vcmask 277768  }
0x132f   :  { %v1736_v26 = vadd.f32 %v1735_v42, %v1698_v55 }
0x1331   :  { %1738 = vst [vmem:[#allocation1 + $0x18] sm:$0xff] %v1736_v26 }
0x1338   :  { %v1754_v62 = vld [vmem:[#allocation1 + $0x1d] ss:$0 sm:$0xff] }
0x1339   :  { %v1766_v43 = vmul.f32 %v1754_v62, %v1736_v26  ;;  %v1757_v44 = vmul.f32 %v1754_v62, %v1754_v62 }
0x133b   :  { %1767 = vadd.xlane.f32.xlu1 %v1766_v43  ;;  %1758 = vadd.xlane.f32.xlu0 %v1757_v44 }
0x137a   :  { %v1745_v47 = vpop.xlane.xlu1 %1744 }
0x137b   :  { %v1746_v48 = vsub.f32 %v2754_v56, %v1745_v47 }
0x137d   :  { %v1747_v49 = vmul.f32 %v2179_v39, %v1746_v48 }
0x137f   :  { %v1748_v50 = vsel %vm1714_vm9, %v1747_v49, 0.0  ;;  %vm1866_vm9 = vcmask 269568  }
0x1380   :  { %v1749_v27 = vadd.f32 %v1748_v50, %v1711_v32 }
0x1382   :  { %v1781_v2 = vmul.f32 %v1754_v62, %v1749_v27 }
0x1384   :  { %1782 = vadd.xlane.f32.xlu0 %v1781_v2 }
0x13c4   :  { %v1759_v54 = vpop.xlane.xlu0 %1758  ;;  %v1768_v59 = vpop.xlane.xlu1 %1767 }
0x13c5   :  { %v1760_v57 = vsub.f32 %v1756_v53, %v1759_v54  ;;  %v1769_v60 = vsub.f32 %v2732_v0, %v1768_v59 }
0x13c7   :  { %2180 = vrsqrt.f32 %v1760_v57  ;;  %v1893_v57 = vld [vmem:[#allocation0 + $0x21] ss:$0 sm:$0xff] }
0x13d4   :  { %v2181_v63 = vpop.eup %2180 }
0x13d5   :  { %v1770_v17 = vmul.f32 %v2181_v63, %v1769_v60 }
0x13d7   :  { %v1773_v10 = vsel %vm1772_vm15, %v1770_v17, 0.0  ;;  %vm1914_vm15 = vcmask 285968  }
0x13d8   :  { %v1774_v3 = vadd.f32 %v1773_v10, %v1736_v26  ;;  %v1870_v26 = vld [vmem:[#allocation0 + $0x20] ss:$0 sm:$0xff] }
0x13da   :  { %1776 = vst [vmem:[#allocation1 + $0x18] sm:$0xff] %v1774_v3 }
0x13e1   :  { %v1792_v21 = vld [vmem:[#allocation1 + $0x1e] ss:$0 sm:$0xff] }
0x13e2   :  { %v1804_v6 = vmul.f32 %v1792_v21, %v1774_v3  ;;  %v1795_v7 = vmul.f32 %v1792_v21, %v1792_v21 }
0x13e4   :  { %1805 = vadd.xlane.f32.xlu0 %v1804_v6  ;;  %1796 = vadd.xlane.f32.xlu1 %v1795_v7 }
0x140d   :  { %v1783_v8 = vpop.xlane.xlu0 %1782 }
0x140e   :  { %v1784_v38 = vsub.f32 %v2754_v56, %v1783_v8 }
0x1410   :  { %v1785_v45 = vmul.f32 %v2181_v63, %v1784_v38 }
0x1412   :  { %v1786_v37 = vsel %vm1752_vm13, %v1785_v45, 0.0  ;;  %vm1909_vm13 = vmand %vm1889_vm10, %vm147_vm2  ;;  %v1918_v45 = vld [vmem:[#allocation0 + $0x22] ss:$0 sm:$0xff] }
0x1413   :  { %v1787_v18 = vadd.f32 %v1786_v37, %v1749_v27  ;;  %vm1934_vm2 = vmand %vm1914_vm15, %vm221_vm5  ;;  %vm2014_vm15 = vcmask 318768  }
0x1415   :  { %v1819_v13 = vmul.f32 %v1792_v21, %v1787_v18 }
0x1417   :  { %1820 = vadd.xlane.f32.xlu1 %v1819_v13 }
0x146d   :  { %v1797_v9 = vpop.xlane.xlu1 %1796  ;;  %v1806_v11 = vpop.xlane.xlu0 %1805 }
0x146e   :  { %v1798_v61 = vsub.f32 %v1794_v12, %v1797_v9  ;;  %v1807_v14 = vsub.f32 %v2732_v0, %v1806_v11 }
0x1470   :  { %2182 = vrsqrt.f32 %v1798_v61 }
0x147d   :  { %v2183_v34 = vpop.eup %2182 }
0x147e   :  { %v1808_v25 = vmul.f32 %v2183_v34, %v1807_v14 }
0x1480   :  { %v1811_v15 = vsel %vm1810_vm3, %v1808_v25, 0.0  ;;  %vm1964_vm3 = vcmask 302368  }
0x1481   :  { %v2770_v19 = vadd.f32 %v1811_v15, %v1774_v3 }
0x1483   :  { %1814 = vst [vmem:[#allocation1 + $0x18] sm:$0xff] %v2770_v19 }
0x148a   :  { %v2773_v20 = vld [vmem:[#allocation1 + $0x1f] ss:$0 sm:$0xff] }
0x148b   :  { %v1833_v52 = vmul.f32 %v2773_v20, %v2773_v20 }
0x148d   :  { %1834 = vadd.xlane.f32.xlu0 %v1833_v52  ;;  %v1943_v52 = vld [vmem:[#allocation0 + $0x23] ss:$0 sm:$0xff] }
0x14a0   :  { %v1821_v55 = vpop.xlane.xlu1 %1820 }
0x14a1   :  { %v1822_v23 = vsub.f32 %v2754_v56, %v1821_v55 }
0x14a3   :  { %v1823_v24 = vmul.f32 %v2183_v34, %v1822_v23 }
0x14a5   :  { %v1824_v5 = vsel %vm1790_vm0, %v1823_v24, 0.0  ;;  %vm1939_vm0 = vcmask 294168  }
0x14a6   :  { %v1825_v28 = vadd.f32 %v1824_v5, %v1787_v18  ;;  %vm1959_vm5 = vmand %vm1939_vm0, %vm295_vm8 }
0x14a7   :  { %vm1984_vm8 = vmand %vm1964_vm3, %vm369_vm11 }
0x14a8   :  { %v1857_v51 = vmul.f32 %v2773_v20, %v1825_v28 }
0x14aa   :  { %1858 = vadd.xlane.f32.xlu1 %v1857_v51 }
0x1516   :  { %v1835_v4 = vpop.xlane.xlu0 %1834 }
0x1517   :  { %v1836_v32 = vsub.f32 %v1832_v29, %v1835_v4 }
0x1519   :  { %2184 = vrsqrt.f32 %v1836_v32 }
0x1526   :  { %v2780_v36 = vpop.eup %2184 }
0x1533   :  { %v1859_v30 = vpop.xlane.xlu1 %1858 }
0x1534   :  { %v1860_v33 = vsub.f32 %v2754_v56, %v1859_v30 }
0x1536   :  { %v1861_v58 = vmul.f32 %v2780_v36, %v1860_v33 }
0x1538   :  { %v1862_v16 = vsel %vm1828_vm6, %v1861_v58, 0.0  ;;  %v1968_v58 = vld [vmem:[#allocation0 + $0x24] ss:$0 sm:$0xff] }
0x1539   :  { %v1863_v1 = vadd.f32 %v1862_v16, %v1825_v28 }
0x153b   :  { %1865 = vst [vmem:[#allocation1 + $0x20] sm:$0xff] %v1863_v1 }
0x1542   :  { %v1868_v39 = vld [vmem:[#allocation1 + $0x20] ss:$0 sm:$0xff] }
0x1543   :  { %v1880_v41 = vmul.f32 %v1868_v39, %v1863_v1  ;;  %v1871_v42 = vmul.f32 %v1868_v39, %v1868_v39 }
0x1545   :  { %1881 = vadd.xlane.f32.xlu1 %v1880_v41  ;;  %1872 = vadd.xlane.f32.xlu0 %v1871_v42 }
0x15ce   :  { %v1873_v62 = vpop.xlane.xlu0 %1872  ;;  %v1882_v44 = vpop.xlane.xlu1 %1881 }
0x15cf   :  { %v1874_v43 = vsub.f32 %v1870_v26, %v1873_v62  ;;  %v1883_v47 = vsub.f32 %v2754_v56, %v1882_v44 }
0x15d1   :  { %2186 = vrsqrt.f32 %v1874_v43 }
0x15de   :  { %v2187_v48 = vpop.eup %2186 }
0x15df   :  { %v1884_v49 = vmul.f32 %v2187_v48, %v1883_v47 }
0x15e1   :  { %v1885_v50 = vsel %vm1866_vm9, %v1884_v49, 0.0  ;;  %v1993_v49 = vld [vmem:[#allocation0 + $0x25] ss:$0 sm:$0xff]  ;;  %vm1989_vm9 = vcmask 310568  }
0x15e2   :  { %v1886_v27 = vadd.f32 %v1885_v50, %v1863_v1  ;;  %vm2009_vm11 = vmand %vm1989_vm9, %vm443_vm14  ;;  %vm591_vm14 = vcmask 1047559  }
0x15e3   :  { %vm592_vm10 = vmand %vm574_vm4, %vm591_vm14 }
0x15e4   :  { %1888 = vst [vmem:[#allocation1 + $0x20] sm:$0xff] %v1886_v27  ;;  %vm2034_vm4 = vmand %vm2014_vm15, %vm517_vm1 }
0x15e5   :  { %vm1114_vm1 = vmand %vm1094_vm12, %vm591_vm14 }
0x15eb   :  { %v1891_v2 = vld [vmem:[#allocation1 + $0x21] ss:$0 sm:$0xff] }
0x15ec   :  { %v1903_v53 = vmul.f32 %v1891_v2, %v1886_v27  ;;  %v1894_v54 = vmul.f32 %v1891_v2, %v1891_v2 }
0x15ee   :  { %1904 = vadd.xlane.f32.xlu1 %v1903_v53  ;;  %1895 = vadd.xlane.f32.xlu0 %v1894_v54 }
0x1677   :  { %v1896_v59 = vpop.xlane.xlu0 %1895  ;;  %v1905_v63 = vpop.xlane.xlu1 %1904 }
0x1678   :  { %v1897_v60 = vsub.f32 %v1893_v57, %v1896_v59  ;;  %v1906_v17 = vsub.f32 %v2754_v56, %v1905_v63 }
0x167a   :  { %2188 = vrsqrt.f32 %v1897_v60 }
0x1687   :  { %v2189_v10 = vpop.eup %2188 }
0x1688   :  { %v1907_v3 = vmul.f32 %v2189_v10, %v1906_v17 }
0x168a   :  { %v1910_v21 = vsel %vm1909_vm13, %v1907_v3, 0.0  ;;  %v585_v3 = vld [vmem:[#allocation1] sm:$0xff]  ;;  %vm1533_vm13 = vmand %vm1513_vm7, %vm591_vm14 }
0x168b   :  { %v1911_v6 = vadd.f32 %v1910_v21, %v1886_v27  ;;  %v2202_v21 = vld [vmem:[#allocation1 + $0x7] ss:$0 sm:$0xff]  ;;  %vm1848_vm7 = vmand %vm1828_vm6, %vm591_vm14 }
0x168d   :  { %1913 = vst [vmem:[#allocation1 + $0x20] sm:$0xff] %v1911_v6 }
0x1694   :  { %v1916_v7 = vld [vmem:[#allocation1 + $0x22] ss:$0 sm:$0xff] }
0x1695   :  { %v1928_v8 = vmul.f32 %v1916_v7, %v1911_v6  ;;  %v1919_v38 = vmul.f32 %v1916_v7, %v1916_v7  ;;  %v1527_v7 = vmul.f32 %v2715_v22, %v2712_v40 }
0x1697   :  { %1929 = vadd.xlane.f32.xlu1 %v1928_v8  ;;  %1920 = vadd.xlane.f32.xlu0 %v1919_v38  ;;  %v2018_v8 = vld [vmem:[#allocation0 + $0x26] ss:$0 sm:$0xff] }
0x1720   :  { %v1921_v37 = vpop.xlane.xlu0 %1920  ;;  %v1930_v13 = vpop.xlane.xlu1 %1929 }
0x1721   :  { %v1922_v18 = vsub.f32 %v1918_v45, %v1921_v37  ;;  %v1931_v12 = vsub.f32 %v2754_v56, %v1930_v13 }
0x1723   :  { %2190 = vrsqrt.f32 %v1922_v18  ;;  %v584_v18 = vld [vmem:[#allocation0] sm:$0xff] }
0x1730   :  { %v2191_v9 = vpop.eup %2190 }
0x1731   :  { %v1932_v61 = vmul.f32 %v2191_v9, %v1931_v12  ;;  %v1524_v9 = vld [vmem:[#allocation0 + $0x10] sm:$0xff] }
0x1733   :  { %v1935_v11 = vsel %vm1934_vm2, %v1932_v61, 0.0  ;;  %vm2039_vm2 = vcmask 326968  }
0x1734   :  { %v1936_v14 = vadd.f32 %v1935_v11, %v1911_v6  ;;  %v586_v6 = vmul.f32 %v2202_v21, %v585_v3  ;;  %vm2059_vm12 = vmand %vm2039_vm2, %vm591_vm14 }
0x1736   :  { %1938 = vst [vmem:[#allocation1 + $0x20] sm:$0xff] %v1936_v14 }
0x173d   :  { %v1941_v34 = vld [vmem:[#allocation1 + $0x23] ss:$0 sm:$0xff] }
0x173e   :  { %v1953_v25 = vmul.f32 %v1941_v34, %v1936_v14  ;;  %v1944_v15 = vmul.f32 %v1941_v34, %v1941_v34 }
0x1740   :  { %1954 = vadd.xlane.f32.xlu1 %v1953_v25  ;;  %1945 = vadd.xlane.f32.xlu0 %v1944_v15 }
0x17c9   :  { %v1946_v55 = vpop.xlane.xlu0 %1945  ;;  %v1955_v24 = vpop.xlane.xlu1 %1954 }
0x17ca   :  { %v1947_v23 = vsub.f32 %v1943_v52, %v1946_v55  ;;  %v1956_v5 = vsub.f32 %v2754_v56, %v1955_v24 }
0x17cc   :  { %2192 = vrsqrt.f32 %v1947_v23 }
0x17d9   :  { %v2193_v28 = vpop.eup %2192 }
0x17da   :  { %v1957_v51 = vmul.f32 %v2193_v28, %v1956_v5 }
0x17dc   :  { %v1960_v29 = vsel %vm1959_vm5, %v1957_v51, 0.0 }
0x17dd   :  { %v1961_v4 = vadd.f32 %v1960_v29, %v1936_v14  ;;  %v1107_v29 = vld [vmem:[#allocation1 + $0x8] sm:$0xff] }
0x17df   :  { %1963 = vst [vmem:[#allocation1 + $0x20] sm:$0xff] %v1961_v4 }
0x17e6   :  { %v1966_v32 = vld [vmem:[#allocation1 + $0x24] ss:$0 sm:$0xff] }
0x17e7   :  { %v1978_v30 = vmul.f32 %v1966_v32, %v1961_v4  ;;  %v1969_v33 = vmul.f32 %v1966_v32, %v1966_v32  ;;  %v1842_v32 = vmul.f32 %v2773_v20, %v2770_v19 }
0x17e9   :  { %1979 = vadd.xlane.f32.xlu1 %v1978_v30  ;;  %1970 = vadd.xlane.f32.xlu0 %v1969_v33  ;;  %v2043_v30 = vld [vmem:[#allocation0 + $0x27] ss:$0 sm:$0xff] }
0x1872   :  { %v1971_v16 = vpop.xlane.xlu0 %1970  ;;  %v1980_v39 = vpop.xlane.xlu1 %1979 }
0x1873   :  { %v1972_v1 = vsub.f32 %v1968_v58, %v1971_v16  ;;  %v1981_v41 = vsub.f32 %v2754_v56, %v1980_v39  ;;  %v1105_v16 = vld [vmem:[#allocation0 + $0x8] sm:$0xff] }
0x1875   :  { %2194 = vrsqrt.f32 %v1972_v1 }
0x1882   :  { %v2195_v42 = vpop.eup %2194 }
0x1883   :  { %v1982_v26 = vmul.f32 %v2195_v42, %v1981_v41 }
0x1885   :  { %v1985_v62 = vsel %vm1984_vm8, %v1982_v26, 0.0 }
0x1886   :  { %v1986_v43 = vadd.f32 %v1985_v62, %v1961_v4 }
0x1888   :  { %1988 = vst [vmem:[#allocation1 + $0x20] sm:$0xff] %v1986_v43 }
0x188f   :  { %v1991_v44 = vld [vmem:[#allocation1 + $0x25] ss:$0 sm:$0xff] }
0x1890   :  { %v2003_v47 = vmul.f32 %v1991_v44, %v1986_v43  ;;  %v1994_v48 = vmul.f32 %v1991_v44, %v1991_v44 }
0x1892   :  { %2004 = vadd.xlane.f32.xlu1 %v2003_v47  ;;  %1995 = vadd.xlane.f32.xlu0 %v1994_v48 }
0x191b   :  { %v1996_v50 = vpop.xlane.xlu0 %1995  ;;  %v2005_v2 = vpop.xlane.xlu1 %2004 }
0x191c   :  { %v1997_v27 = vsub.f32 %v1993_v49, %v1996_v50  ;;  %v2006_v53 = vsub.f32 %v2754_v56, %v2005_v2 }
0x191e   :  { %2196 = vrsqrt.f32 %v1997_v27 }
0x192b   :  { %v2197_v54 = vpop.eup %2196 }
0x192c   :  { %v2007_v57 = vmul.f32 %v2197_v54, %v2006_v53 }
0x192e   :  { %v2010_v59 = vsel %vm2009_vm11, %v2007_v57, 0.0 }
0x192f   :  { %v2011_v60 = vadd.f32 %v2010_v59, %v1986_v43 }
0x1931   :  { %2013 = vst [vmem:[#allocation1 + $0x20] sm:$0xff] %v2011_v60 }
0x1938   :  { %v2016_v63 = vld [vmem:[#allocation1 + $0x26] ss:$0 sm:$0xff] }
0x1939   :  { %v2028_v17 = vmul.f32 %v2016_v63, %v2011_v60  ;;  %v2019_v10 = vmul.f32 %v2016_v63, %v2016_v63 }
0x193b   :  { %2029 = vadd.xlane.f32.xlu1 %v2028_v17  ;;  %2020 = vadd.xlane.f32.xlu0 %v2019_v10 }
0x193f   :  { %587 = vadd.xlane.f32.xlu1 %v586_v6 }
0x1943   :  { %1528 = vadd.xlane.f32.xlu1 %v1527_v7 }
0x19c4   :  { %v2030_v38 = vpop.xlane.xlu1 %2029  ;;  %v2021_v45 = vpop.xlane.xlu0 %2020 }
0x19c5   :  { %v2022_v37 = vsub.f32 %v2018_v8, %v2021_v45 }
0x19c7   :  { %2198 = vrsqrt.f32 %v2022_v37 }
0x19c8   :  { %v588_v13 = vpop.xlane.xlu1 %587 }
0x19c9   :  { %v589_v12 = vsub.f32 %v584_v18, %v588_v13 }
0x19cb   :  { %v590_v61 = vmul.f32 %v2416_v31, %v589_v12  ;;  %v2031_v31 = vsub.f32 %v2754_v56, %v2030_v38 }
0x19cc   :  { %v1529_v11 = vpop.xlane.xlu1 %1528 }
0x19cd   :  { %v593_v14 = vsel %vm592_vm10, %v590_v61, 0.0  ;;  %v1530_v34 = vsub.f32 %v1524_v9, %v1529_v11 }
0x19ce   :  { %v594_v22 = vadd.f32 %v593_v14, %v585_v3 }
0x19cf   :  { %v1531_v25 = vmul.f32 %v2725_v35, %v1530_v34 }
0x19d0   :  { %595 = vst [vmem:[#allocation1] sm:$0xff] %v594_v22  ;;  %2101 = vst [vmem:[%s2834_s1] sm:$0xff] %v594_v22 }
0x19d1   :  { %v1534_v15 = vsel %vm1533_vm13, %v1531_v25, 0.0 }
0x19d2   :  { %v1535_v52 = vadd.f32 %v1534_v15, %v2712_v40  ;;  %v2203_v40 = vld [vmem:[#allocation1 + $0xf] ss:$0 sm:$0xff] }
0x19d3   :  { %v1108_v4 = vmul.f32 %v2203_v40, %v1107_v29 }
0x19d4   :  { %v2199_v55 = vpop.eup %2198  ;;  %1537 = vst [vmem:[#allocation1 + $0x10] sm:$0xff] %v1535_v52  ;;  %2105 = vst [vmem:[%s2834_s1 + $0x10] sm:$0xff] %v1535_v52 }
0x19d5   :  { %v2032_v35 = vmul.f32 %v2199_v55, %v2031_v31 }
0x19d7   :  { %v2035_v23 = vsel %vm2034_vm4, %v2032_v35, 0.0 }
0x19d8   :  { %v2036_v24 = vadd.f32 %v2035_v23, %v2011_v60 }
0x19da   :  { %2038 = vst [vmem:[#allocation1 + $0x20] sm:$0xff] %v2036_v24 }
0x19e1   :  { %v2041_v5 = vld [vmem:[#allocation1 + $0x27] ss:$0 sm:$0xff] }
0x19e2   :  { %v2053_v28 = vmul.f32 %v2041_v5, %v2036_v24  ;;  %v2044_v51 = vmul.f32 %v2041_v5, %v2041_v5 }
0x19e4   :  { %2054 = vadd.xlane.f32.xlu1 %v2053_v28  ;;  %2045 = vadd.xlane.f32.xlu0 %v2044_v51 }
0x19e8   :  { %1109 = vadd.xlane.f32.xlu0 %v1108_v4 }
0x19ec   :  { %1843 = vadd.xlane.f32.xlu0 %v1842_v32 }
0x1a6d   :  { %v2046_v33 = vpop.xlane.xlu0 %2045  ;;  %v2055_v44 = vpop.xlane.xlu1 %2054 }
0x1a6e   :  { %v2047_v58 = vsub.f32 %v2043_v30, %v2046_v33  ;;  %v2056_v48 = vsub.f32 %v2754_v56, %v2055_v44 }
0x1a70   :  { %2200 = vrsqrt.f32 %v2047_v58 }
0x1a71   :  { %v1110_v1 = vpop.xlane.xlu0 %1109 }
0x1a72   :  { %v1111_v39 = vsub.f32 %v1105_v16, %v1110_v1 }
0x1a74   :  { %v1112_v41 = vmul.f32 %v2617_v46, %v1111_v39 }
0x1a75   :  { %v1844_v42 = vpop.xlane.xlu0 %1843 }
0x1a76   :  { %v1115_v26 = vsel %vm1114_vm1, %v1112_v41, 0.0  ;;  %v1845_v62 = vsub.f32 %v2732_v0, %v1844_v42 }
0x1a77   :  { %v1116_v43 = vadd.f32 %v1115_v26, %v1107_v29 }
0x1a78   :  { %v1846_v20 = vmul.f32 %v2780_v36, %v1845_v62 }
0x1a79   :  { %1118 = vst [vmem:[#allocation1 + $0x8] sm:$0xff] %v1116_v43  ;;  %2103 = vst [vmem:[%s2834_s1 + $0x8] sm:$0xff] %v1116_v43 }
0x1a7a   :  { %v1849_v47 = vsel %vm1848_vm7, %v1846_v20, 0.0 }
0x1a7b   :  { %v1850_v46 = vadd.f32 %v1849_v47, %v2770_v19 }
0x1a7d   :  { %v2201_v49 = vpop.eup %2200  ;;  %1852 = vst [vmem:[#allocation1 + $0x18] sm:$0xff] %v1850_v46  ;;  %2107 = vst [vmem:[%s2834_s1 + $0x18] sm:$0xff] %v1850_v46 }
0x1a7e   :  { %v2057_v0 = vmul.f32 %v2201_v49, %v2056_v48 }
0x1a80   :  { %v2060_v36 = vsel %vm2059_vm12, %v2057_v0, 0.0 }
0x1a81   :  { %v2061_v50 = vadd.f32 %v2060_v36, %v2036_v24 }
0x1a83   :  { %2063 = vst [vmem:[#allocation1 + $0x20] sm:$0xff] %v2061_v50  ;;  %2109 = vst [vmem:[%s2834_s1 + $0x20] sm:$0xff] %v2061_v50 }

// kernel: custom-call.9
= control target key start
LH: loop header
LB: loop body
LE: loop exit
PB: predicated region body
PF: predicated region fallthrough
CT: control target
= control target key end

     0   :  { %v51_v0 = vlaneseq  ;;  %v979_v9 = vmov -1.0   ;;  %v980_v53 = vmov 0.0   ;;  %s1242_s0 = inlined_call_operand.vmem [shape: f32[1,40,40], index: 0, kind: input, shape index: {}]   ;;  %s1243_s1 = inlined_call_operand.vmem [shape: f32[1,40,40], index: 1, kind: output, shape index: {}]  }
   0x1   :  { %v38_v1 = vld [vmem:[%s1242_s0] sm:$0xff]  ;;  %v40_v36 = vld [vmem:[%s1242_s0 + $0x8] sm:$0xff] }
   0x2   :  { %v994_v2 = vand.u32 127, %v51_v0  ;;  %v996_v3 = vshrl.u32 %v51_v0, 7 }
   0x4   :  { %vm57_vm0 = vcmp.eq.s32.totalorder %v996_v3, %v994_v2  ;;  %vm53_vm1 = vcmp.lt.s32.totalorder %v994_v2, 40  ;;  %vm62_vm2 = vcmp.ge.s32.totalorder %v996_v3, %v994_v2  ;;  %vm140_vm4 = vcmp.eq.s32.totalorder %v994_v2, 0 }
   0x5   :  { %v59_v4 = vsel %vm57_vm0, %v38_v1, 0.0  ;;  %vm63_vm3 = vmand %vm62_vm2, %vm53_vm1  ;;  %vm137_vm5 = vcmp.eq.s32.totalorder %v994_v2, %v996_v3  ;;  %v141_v10 = vsel %vm140_vm4, 1.0, %v979_v9  ;;  %vm176_vm6 = vcmp.eq.s32.totalorder %v994_v2, 1 }
   0x6   :  { %60 = vadd.xlane.f32.xlu0 %v59_v4  ;;  %v64_v6 = vsel %vm63_vm3, %v38_v1, 0.0  ;;  %v142_v11 = vsel %vm137_vm5, %v141_v10, 0.0  ;;  %vm186_vm7 = vcmp.eq.s32.totalorder %v994_v2, 2  ;;  %vm196_vm8 = vcmp.eq.s32.totalorder %v994_v2, 3 }
   0x7   :  { %vm206_vm9 = vcmp.eq.s32.totalorder %v994_v2, 4  ;;  %v72_v31 = vadd.s32 8, %v996_v3  ;;  %vm216_vm11 = vcmp.eq.s32.totalorder %v994_v2, 5  ;;  %vm226_vm14 = vcmp.eq.s32.totalorder %v994_v2, 6 }
   0x8   :  { %vm236_vm0 = vcmp.eq.s32.totalorder %v994_v2, 7  ;;  %vm246_vm2 = vcmp.eq.s32.totalorder %v994_v2, 8  ;;  %vm260_vm3 = vcmp.eq.s32.totalorder %v994_v2, 9  ;;  %vm274_vm4 = vcmp.eq.s32.totalorder %v994_v2, 10 }
   0x9   :  { %vm73_vm10 = vcmp.eq.s32.totalorder %v72_v31, %v994_v2  ;;  %vm78_vm12 = vcmp.ge.s32.totalorder %v72_v31, %v994_v2  ;;  %vm148_vm15 = vcmp.eq.s32.totalorder %v994_v2, %v72_v31  ;;  %vm288_vm5 = vcmp.eq.s32.totalorder %v994_v2, 11 }
   0xa   :  { %v75_v37 = vsel %vm73_vm10, %v40_v36, 0.0  ;;  %vm79_vm13 = vmand %vm78_vm12, %vm53_vm1  ;;  %v149_v54 = vsel %vm148_vm15, -1.0, %v980_v53  ;;  %vm344_vm12 = vcmp.eq.s32.totalorder %v994_v2, 15  ;;  %vm376_vm15 = vcmp.eq.s32.totalorder %v994_v2, 17 }
   0xb   :  { %v80_v44 = vsel %vm79_vm13, %v40_v36, 0.0 }
  0x8f   :  { %v1000_v5 = vpop.xlane.xlu0 %60 }
  0x90   :  { %969 = vrcp.f32 %v1000_v5 }
  0x9d   :  { %v1008_v7 = vpop.eup %969 }
  0x9e   :  { %v66_v8 = vmul.f32 %v1008_v7, %v64_v6 }
  0xa0   :  { %67 = vst [vmem:[#allocation2] sm:$0xff] %v66_v8 }
  0xa7   :  { %v172_v12 = vld [vmem:[#allocation2 + $0x1] ss:$0 sm:$0xff]  ;;  %v182_v15 = vld [vmem:[#allocation2 + $0x2] ss:$0 sm:$0xff]  ;;  %v192_v20 = vld [vmem:[#allocation2 + $0x3] ss:$0 sm:$0xff] }
  0xa8   :  { %v173_v13 = vxor.u32 2147483648, %v172_v12  ;;  %v183_v17 = vxor.u32 2147483648, %v182_v15  ;;  %v193_v22 = vxor.u32 2147483648, %v192_v20  ;;  %v202_v25 = vld [vmem:[#allocation2 + $0x4] ss:$0 sm:$0xff] }
  0xa9   :  { %v203_v27 = vxor.u32 2147483648, %v202_v25  ;;  %v212_v30 = vld [vmem:[#allocation2 + $0x5] ss:$0 sm:$0xff]  ;;  %v222_v38 = vld [vmem:[#allocation2 + $0x6] ss:$0 sm:$0xff] }
  0xaa   :  { %v177_v14 = vmul.f32 %v173_v13, %v142_v11  ;;  %v213_v33 = vxor.u32 2147483648, %v212_v30  ;;  %v223_v40 = vxor.u32 2147483648, %v222_v38  ;;  %v232_v47 = vld [vmem:[#allocation2 + $0x7] ss:$0 sm:$0xff] }
  0xab   :  { %v233_v50 = vxor.u32 2147483648, %v232_v47  ;;  %v88_v47 = vadd.s32 16, %v996_v3 }
  0xac   :  { %178 = vadd.xlane.f32.xlu0 %v177_v14 }
  0xad   :  { %vm94_vm10 = vcmp.ge.s32.totalorder %v88_v47, %v994_v2  ;;  %vm155_vm13 = vcmp.eq.s32.totalorder %v994_v2, %v88_v47 }
 0x135   :  { %v179_v16 = vpop.xlane.xlu0 %178 }
 0x136   :  { %v180_v18 = vsel %vm176_vm6, %v179_v16, %v142_v11  ;;  %vm302_vm6 = vcmp.eq.s32.totalorder %v994_v2, 12 }
 0x137   :  { %v187_v19 = vmul.f32 %v183_v17, %v180_v18 }
 0x139   :  { %188 = vadd.xlane.f32.xlu1 %v187_v19 }
 0x1c2   :  { %v189_v21 = vpop.xlane.xlu1 %188 }
 0x1c3   :  { %v190_v23 = vsel %vm186_vm7, %v189_v21, %v180_v18  ;;  %vm316_vm7 = vcmp.eq.s32.totalorder %v994_v2, 13 }
 0x1c4   :  { %v197_v24 = vmul.f32 %v193_v22, %v190_v23 }
 0x1c6   :  { %198 = vadd.xlane.f32.xlu1 %v197_v24 }
 0x24f   :  { %v199_v26 = vpop.xlane.xlu1 %198 }
 0x250   :  { %v200_v28 = vsel %vm196_vm8, %v199_v26, %v190_v23  ;;  %vm89_vm8 = vcmp.eq.s32.totalorder %v88_v47, %v994_v2 }
 0x251   :  { %v207_v29 = vmul.f32 %v203_v27, %v200_v28 }
 0x253   :  { %208 = vadd.xlane.f32.xlu0 %v207_v29 }
 0x2dc   :  { %v209_v32 = vpop.xlane.xlu0 %208 }
 0x2dd   :  { %v210_v34 = vsel %vm206_vm9, %v209_v32, %v200_v28  ;;  %vm330_vm9 = vcmp.eq.s32.totalorder %v994_v2, 14 }
 0x2de   :  { %v217_v35 = vmul.f32 %v213_v33, %v210_v34 }
 0x2e0   :  { %218 = vadd.xlane.f32.xlu1 %v217_v35 }
 0x2e4   :  { %76 = vadd.xlane.f32.xlu1 %v75_v37 }
 0x369   :  { %v219_v39 = vpop.xlane.xlu1 %218 }
 0x36a   :  { %v220_v41 = vsel %vm216_vm11, %v219_v39, %v210_v34  ;;  %vm95_vm11 = vmand %vm94_vm10, %vm53_vm1 }
 0x36b   :  { %v227_v42 = vmul.f32 %v223_v40, %v220_v41 }
 0x36d   :  { %228 = vadd.xlane.f32.xlu0 %v227_v42  ;;  %v1024_v43 = vpop.xlane.xlu1 %76 }
 0x36e   :  { %971 = vrcp.f32 %v1024_v43 }
 0x37b   :  { %v1030_v45 = vpop.eup %971 }
 0x37c   :  { %v82_v46 = vmul.f32 %v1030_v45, %v80_v44 }
 0x37e   :  { %83 = vst [vmem:[#allocation2 + $0x8] sm:$0xff] %v82_v46 }
 0x385   :  { %v242_v48 = vld [vmem:[#allocation2 + $0x8] ss:$0 sm:$0xff]  ;;  %v256_v59 = vld [vmem:[#allocation2 + $0x9] ss:$0 sm:$0xff]  ;;  %v270_v6 = vld [vmem:[#allocation2 + $0xa] ss:$0 sm:$0xff] }
 0x386   :  { %v243_v51 = vxor.u32 2147483648, %v242_v48  ;;  %v257_v62 = vxor.u32 2147483648, %v256_v59  ;;  %v271_v10 = vxor.u32 2147483648, %v270_v6  ;;  %v284_v15 = vld [vmem:[#allocation2 + $0xb] ss:$0 sm:$0xff] }
 0x387   :  { %v285_v18 = vxor.u32 2147483648, %v284_v15  ;;  %v298_v23 = vld [vmem:[#allocation2 + $0xc] ss:$0 sm:$0xff]  ;;  %v312_v31 = vld [vmem:[#allocation2 + $0xd] ss:$0 sm:$0xff] }
 0x388   :  { %v251_v56 = vmul.f32 %v243_v51, %v149_v54  ;;  %v299_v26 = vxor.u32 2147483648, %v298_v23  ;;  %v313_v34 = vxor.u32 2147483648, %v312_v31  ;;  %v326_v39 = vld [vmem:[#allocation2 + $0xe] ss:$0 sm:$0xff] }
 0x389   :  { %v327_v42 = vxor.u32 2147483648, %v326_v39 }
 0x3f6   :  { %v229_v49 = vpop.xlane.xlu0 %228 }
 0x3f7   :  { %v230_v52 = vsel %vm226_vm14, %v229_v49, %v220_v41  ;;  %vm358_vm14 = vcmp.eq.s32.totalorder %v994_v2, 16 }
 0x3f8   :  { %v237_v55 = vmul.f32 %v233_v50, %v230_v52 }
 0x3fa   :  { %238 = vadd.xlane.f32.xlu0 %v237_v55  ;;  %v340_v55 = vld [vmem:[#allocation2 + $0xf] ss:$0 sm:$0xff] }
 0x3fe   :  { %252 = vadd.xlane.f32.xlu0 %v251_v56 }
 0x483   :  { %v239_v57 = vpop.xlane.xlu0 %238 }
 0x484   :  { %v240_v58 = vsel %vm236_vm0, %v239_v57, %v230_v52  ;;  %v341_v57 = vxor.u32 2147483648, %v340_v55  ;;  %vm394_vm0 = vcmp.eq.s32.totalorder %v994_v2, 18 }
 0x485   :  { %v247_v60 = vmul.f32 %v243_v51, %v240_v58  ;;  %v42_v51 = vld [vmem:[%s1242_s0 + $0x10] sm:$0xff] }
 0x487   :  { %v253_v61 = vpop.xlane.xlu0 %252  ;;  %248 = vadd.xlane.f32.xlu1 %v247_v60 }
 0x488   :  { %v254_v63 = vsel %vm246_vm2, %v253_v61, %v149_v54  ;;  %v91_v54 = vsel %vm89_vm8, %v42_v51, 0.0 }
 0x489   :  { %v265_v0 = vmul.f32 %v257_v62, %v254_v63 }
 0x48b   :  { %266 = vadd.xlane.f32.xlu0 %v265_v0 }
 0x510   :  { %v249_v1 = vpop.xlane.xlu1 %248 }
 0x511   :  { %v250_v4 = vsel %vm246_vm2, %v249_v1, %v240_v58  ;;  %vm412_vm2 = vcmp.eq.s32.totalorder %v994_v2, 19 }
 0x512   :  { %v261_v8 = vmul.f32 %v257_v62, %v250_v4 }
 0x514   :  { %v267_v9 = vpop.xlane.xlu0 %266  ;;  %262 = vadd.xlane.f32.xlu1 %v261_v8 }
 0x515   :  { %v268_v11 = vsel %vm260_vm3, %v267_v9, %v254_v63  ;;  %v96_v63 = vsel %vm95_vm11, %v42_v51, 0.0  ;;  %vm502_vm11 = vcmp.eq.s32.totalorder %v994_v2, 24 }
 0x516   :  { %v279_v12 = vmul.f32 %v271_v10, %v268_v11 }
 0x518   :  { %280 = vadd.xlane.f32.xlu0 %v279_v12 }
 0x59d   :  { %v263_v13 = vpop.xlane.xlu1 %262 }
 0x59e   :  { %v264_v14 = vsel %vm260_vm3, %v263_v13, %v250_v4  ;;  %vm430_vm3 = vcmp.eq.s32.totalorder %v994_v2, 20 }
 0x59f   :  { %v275_v16 = vmul.f32 %v271_v10, %v264_v14 }
 0x5a1   :  { %v281_v17 = vpop.xlane.xlu0 %280  ;;  %276 = vadd.xlane.f32.xlu1 %v275_v16 }
 0x5a2   :  { %v282_v19 = vsel %vm274_vm4, %v281_v17, %v268_v11 }
 0x5a3   :  { %v293_v20 = vmul.f32 %v285_v18, %v282_v19 }
 0x5a5   :  { %294 = vadd.xlane.f32.xlu0 %v293_v20 }
 0x62a   :  { %v277_v21 = vpop.xlane.xlu1 %276 }
 0x62b   :  { %v278_v22 = vsel %vm274_vm4, %v277_v21, %v264_v14  ;;  %v156_v14 = vsel %vm155_vm13, -1.0, %v980_v53  ;;  %vm448_vm4 = vcmp.eq.s32.totalorder %v994_v2, 21  ;;  %vm546_vm13 = vcmp.eq.s32.totalorder %v994_v2, 26 }
 0x62c   :  { %v289_v24 = vmul.f32 %v285_v18, %v278_v22 }
 0x62e   :  { %v295_v25 = vpop.xlane.xlu0 %294  ;;  %290 = vadd.xlane.f32.xlu1 %v289_v24 }
 0x62f   :  { %v296_v27 = vsel %vm288_vm5, %v295_v25, %v282_v19 }
 0x630   :  { %v307_v28 = vmul.f32 %v299_v26, %v296_v27 }
 0x632   :  { %308 = vadd.xlane.f32.xlu0 %v307_v28 }
 0x6b7   :  { %v291_v29 = vpop.xlane.xlu1 %290 }
 0x6b8   :  { %v292_v30 = vsel %vm288_vm5, %v291_v29, %v278_v22 }
 0x6b9   :  { %v303_v32 = vmul.f32 %v299_v26, %v292_v30 }
 0x6bb   :  { %v309_v33 = vpop.xlane.xlu0 %308  ;;  %304 = vadd.xlane.f32.xlu1 %v303_v32 }
 0x6bc   :  { %v310_v35 = vsel %vm302_vm6, %v309_v33, %v296_v27 }
 0x6bd   :  { %v321_v36 = vmul.f32 %v313_v34, %v310_v35 }
 0x6bf   :  { %322 = vadd.xlane.f32.xlu0 %v321_v36 }
 0x744   :  { %v305_v37 = vpop.xlane.xlu1 %304 }
 0x745   :  { %v306_v38 = vsel %vm302_vm6, %v305_v37, %v292_v30  ;;  %vm466_vm6 = vcmp.eq.s32.totalorder %v994_v2, 22 }
 0x746   :  { %v317_v40 = vmul.f32 %v313_v34, %v306_v38 }
 0x748   :  { %v323_v41 = vpop.xlane.xlu0 %322  ;;  %318 = vadd.xlane.f32.xlu1 %v317_v40 }
 0x749   :  { %v324_v44 = vsel %vm316_vm7, %v323_v41, %v310_v35 }
 0x74a   :  { %v335_v46 = vmul.f32 %v327_v42, %v324_v44 }
 0x74c   :  { %336 = vadd.xlane.f32.xlu0 %v335_v46 }
 0x7d1   :  { %v319_v48 = vpop.xlane.xlu1 %318 }
 0x7d2   :  { %v320_v49 = vsel %vm316_vm7, %v319_v48, %v306_v38 }
 0x7d3   :  { %v331_v50 = vmul.f32 %v327_v42, %v320_v49 }
 0x7d5   :  { %v337_v52 = vpop.xlane.xlu0 %336  ;;  %332 = vadd.xlane.f32.xlu1 %v331_v50 }
 0x7d6   :  { %v338_v56 = vsel %vm330_vm9, %v337_v52, %v324_v44 }
 0x7d7   :  { %v349_v58 = vmul.f32 %v341_v57, %v338_v56 }
 0x7d9   :  { %92 = vadd.xlane.f32.xlu1 %v91_v54 }
 0x7dd   :  { %350 = vadd.xlane.f32.xlu1 %v349_v58 }
 0x85e   :  { %v333_v59 = vpop.xlane.xlu1 %332 }
 0x85f   :  { %v334_v60 = vsel %vm330_vm9, %v333_v59, %v320_v49  ;;  %vm484_vm9 = vcmp.eq.s32.totalorder %v994_v2, 23 }
 0x860   :  { %v345_v61 = vmul.f32 %v341_v57, %v334_v60 }
 0x862   :  { %346 = vadd.xlane.f32.xlu0 %v345_v61  ;;  %v1049_v62 = vpop.xlane.xlu1 %92 }
 0x863   :  { %973 = vrcp.f32 %v1049_v62 }
 0x866   :  { %v351_v4 = vpop.xlane.xlu1 %350 }
 0x867   :  { %v352_v9 = vsel %vm344_vm12, %v351_v4, %v338_v56 }
 0x870   :  { %v1055_v0 = vpop.eup %973 }
 0x871   :  { %v98_v1 = vmul.f32 %v1055_v0, %v96_v63 }
 0x873   :  { %99 = vst [vmem:[#allocation2 + $0x10] sm:$0xff] %v98_v1 }
 0x87a   :  { %v354_v6 = vld [vmem:[#allocation2 + $0x10] ss:$0 sm:$0xff]  ;;  %v372_v16 = vld [vmem:[#allocation2 + $0x11] ss:$0 sm:$0xff]  ;;  %v390_v27 = vld [vmem:[#allocation2 + $0x12] ss:$0 sm:$0xff] }
 0x87b   :  { %v355_v8 = vxor.u32 2147483648, %v354_v6  ;;  %v373_v18 = vxor.u32 2147483648, %v372_v16  ;;  %v391_v29 = vxor.u32 2147483648, %v390_v27  ;;  %v408_v38 = vld [vmem:[#allocation2 + $0x13] ss:$0 sm:$0xff] }
 0x87c   :  { %v409_v40 = vxor.u32 2147483648, %v408_v38  ;;  %v426_v51 = vld [vmem:[#allocation2 + $0x14] ss:$0 sm:$0xff]  ;;  %v444_v1 = vld [vmem:[#allocation2 + $0x15] ss:$0 sm:$0xff] }
 0x87d   :  { %v363_v10 = vmul.f32 %v355_v8, %v352_v9  ;;  %v367_v15 = vmul.f32 %v355_v8, %v156_v14  ;;  %v427_v54 = vxor.u32 2147483648, %v426_v51  ;;  %v445_v6 = vxor.u32 2147483648, %v444_v1  ;;  %v462_v16 = vld [vmem:[#allocation2 + $0x16] ss:$0 sm:$0xff] }
 0x87f   :  { %364 = vadd.xlane.f32.xlu1 %v363_v10 }
 0x8eb   :  { %v347_v11 = vpop.xlane.xlu0 %346 }
 0x8ec   :  { %v348_v12 = vsel %vm344_vm12, %v347_v11, %v334_v60  ;;  %vm524_vm12 = vcmp.eq.s32.totalorder %v994_v2, 25 }
 0x8ed   :  { %v359_v13 = vmul.f32 %v355_v8, %v348_v12 }
 0x8ef   :  { %360 = vadd.xlane.f32.xlu0 %v359_v13 }
 0x8f3   :  { %368 = vadd.xlane.f32.xlu0 %v367_v15 }
 0x908   :  { %v365_v17 = vpop.xlane.xlu1 %364 }
 0x909   :  { %v366_v19 = vsel %vm358_vm14, %v365_v17, %v352_v9  ;;  %v104_v17 = vadd.s32 24, %v996_v3 }
 0x90a   :  { %v381_v20 = vmul.f32 %v373_v18, %v366_v19 }
 0x90b   :  { %vm105_vm5 = vcmp.eq.s32.totalorder %v104_v17, %v994_v2  ;;  %vm110_vm7 = vcmp.ge.s32.totalorder %v104_v17, %v994_v2  ;;  %vm162_vm10 = vcmp.eq.s32.totalorder %v994_v2, %v104_v17 }
 0x90c   :  { %382 = vadd.xlane.f32.xlu0 %v381_v20  ;;  %vm111_vm8 = vmand %vm110_vm7, %vm53_vm1  ;;  %v163_v51 = vsel %vm162_vm10, -1.0, %v980_v53  ;;  %vm678_vm7 = vcmp.eq.s32.totalorder %v994_v2, 32  ;;  %vm756_vm10 = vcmp.eq.s32.totalorder %v994_v2, 35 }
 0x978   :  { %v361_v21 = vpop.xlane.xlu0 %360 }
 0x979   :  { %v362_v22 = vsel %vm358_vm14, %v361_v21, %v348_v12 }
 0x97a   :  { %v377_v23 = vmul.f32 %v373_v18, %v362_v22 }
 0x97c   :  { %v369_v24 = vpop.xlane.xlu0 %368  ;;  %378 = vadd.xlane.f32.xlu1 %v377_v23 }
 0x97d   :  { %v370_v25 = vsel %vm358_vm14, %v369_v24, %v156_v14  ;;  %vm568_vm14 = vcmp.eq.s32.totalorder %v994_v2, 27 }
 0x97e   :  { %v385_v26 = vmul.f32 %v373_v18, %v370_v25 }
 0x980   :  { %386 = vadd.xlane.f32.xlu1 %v385_v26 }
 0x995   :  { %v383_v28 = vpop.xlane.xlu0 %382 }
 0x996   :  { %v384_v30 = vsel %vm376_vm15, %v383_v28, %v366_v19  ;;  %v463_v19 = vxor.u32 2147483648, %v462_v16 }
 0x997   :  { %v399_v31 = vmul.f32 %v391_v29, %v384_v30 }
 0x999   :  { %400 = vadd.xlane.f32.xlu1 %v399_v31 }
 0xa05   :  { %v379_v32 = vpop.xlane.xlu1 %378 }
 0xa06   :  { %v380_v33 = vsel %vm376_vm15, %v379_v32, %v362_v22  ;;  %v44_v22 = vld [vmem:[%s1242_s0 + $0x18] sm:$0xff] }
 0xa07   :  { %v395_v34 = vmul.f32 %v391_v29, %v380_v33  ;;  %v107_v23 = vsel %vm105_vm5, %v44_v22, 0.0 }
 0xa09   :  { %396 = vadd.xlane.f32.xlu0 %v395_v34  ;;  %v387_v35 = vpop.xlane.xlu1 %386 }
 0xa0a   :  { %v388_v36 = vsel %vm376_vm15, %v387_v35, %v370_v25  ;;  %vm590_vm15 = vcmp.eq.s32.totalorder %v994_v2, 28 }
 0xa0b   :  { %v403_v37 = vmul.f32 %v391_v29, %v388_v36 }
 0xa0d   :  { %404 = vadd.xlane.f32.xlu0 %v403_v37 }
 0xa22   :  { %v401_v39 = vpop.xlane.xlu1 %400 }
 0xa23   :  { %v402_v41 = vsel %vm394_vm0, %v401_v39, %v384_v30  ;;  %v480_v30 = vld [vmem:[#allocation2 + $0x17] ss:$0 sm:$0xff] }
 0xa24   :  { %v417_v42 = vmul.f32 %v409_v40, %v402_v41  ;;  %v481_v32 = vxor.u32 2147483648, %v480_v30 }
 0xa26   :  { %418 = vadd.xlane.f32.xlu0 %v417_v42 }
 0xa92   :  { %v397_v44 = vpop.xlane.xlu0 %396 }
 0xa93   :  { %v398_v46 = vsel %vm394_vm0, %v397_v44, %v380_v33 }
 0xa94   :  { %v413_v47 = vmul.f32 %v409_v40, %v398_v46 }
 0xa96   :  { %414 = vadd.xlane.f32.xlu1 %v413_v47  ;;  %v405_v48 = vpop.xlane.xlu0 %404 }
 0xa97   :  { %v406_v49 = vsel %vm394_vm0, %v405_v48, %v388_v36  ;;  %v112_v36 = vsel %vm111_vm8, %v44_v22, 0.0  ;;  %vm612_vm0 = vcmp.eq.s32.totalorder %v994_v2, 29  ;;  %vm704_vm8 = vcmp.eq.s32.totalorder %v994_v2, 33 }
 0xa98   :  { %v421_v50 = vmul.f32 %v409_v40, %v406_v49 }
 0xa9a   :  { %422 = vadd.xlane.f32.xlu1 %v421_v50 }
 0xaaf   :  { %v419_v52 = vpop.xlane.xlu0 %418 }
 0xab0   :  { %v420_v55 = vsel %vm412_vm2, %v419_v52, %v402_v41 }
 0xab1   :  { %v435_v56 = vmul.f32 %v427_v54, %v420_v55 }
 0xab3   :  { %436 = vadd.xlane.f32.xlu1 %v435_v56 }
 0xb1f   :  { %v415_v57 = vpop.xlane.xlu1 %414 }
 0xb20   :  { %v416_v58 = vsel %vm412_vm2, %v415_v57, %v398_v46 }
 0xb21   :  { %v431_v59 = vmul.f32 %v427_v54, %v416_v58 }
 0xb23   :  { %432 = vadd.xlane.f32.xlu0 %v431_v59  ;;  %v423_v60 = vpop.xlane.xlu1 %422 }
 0xb24   :  { %v424_v61 = vsel %vm412_vm2, %v423_v60, %v406_v49 }
 0xb25   :  { %v439_v63 = vmul.f32 %v427_v54, %v424_v61 }
 0xb27   :  { %440 = vadd.xlane.f32.xlu0 %v439_v63 }
 0xb3c   :  { %v437_v4 = vpop.xlane.xlu1 %436 }
 0xb3d   :  { %v438_v8 = vsel %vm430_vm3, %v437_v4, %v420_v55 }
 0xb3e   :  { %v453_v9 = vmul.f32 %v445_v6, %v438_v8 }
 0xb40   :  { %454 = vadd.xlane.f32.xlu0 %v453_v9 }
 0xbac   :  { %v433_v10 = vpop.xlane.xlu0 %432 }
 0xbad   :  { %v434_v11 = vsel %vm430_vm3, %v433_v10, %v416_v58 }
 0xbae   :  { %v449_v12 = vmul.f32 %v445_v6, %v434_v11 }
 0xbb0   :  { %450 = vadd.xlane.f32.xlu1 %v449_v12  ;;  %v441_v13 = vpop.xlane.xlu0 %440 }
 0xbb1   :  { %v442_v14 = vsel %vm430_vm3, %v441_v13, %v424_v61  ;;  %vm634_vm3 = vcmp.eq.s32.totalorder %v994_v2, 30 }
 0xbb2   :  { %v457_v15 = vmul.f32 %v445_v6, %v442_v14 }
 0xbb4   :  { %458 = vadd.xlane.f32.xlu1 %v457_v15 }
 0xbc9   :  { %v455_v18 = vpop.xlane.xlu0 %454 }
 0xbca   :  { %v456_v20 = vsel %vm448_vm4, %v455_v18, %v438_v8 }
 0xbcb   :  { %v471_v21 = vmul.f32 %v463_v19, %v456_v20 }
 0xbcd   :  { %472 = vadd.xlane.f32.xlu1 %v471_v21 }
 0xbd1   :  { %108 = vadd.xlane.f32.xlu1 %v107_v23 }
 0xc39   :  { %v451_v24 = vpop.xlane.xlu1 %450 }
 0xc3a   :  { %v452_v25 = vsel %vm448_vm4, %v451_v24, %v434_v11 }
 0xc3b   :  { %v467_v26 = vmul.f32 %v463_v19, %v452_v25 }
 0xc3d   :  { %468 = vadd.xlane.f32.xlu0 %v467_v26  ;;  %v459_v27 = vpop.xlane.xlu1 %458 }
 0xc3e   :  { %v460_v28 = vsel %vm448_vm4, %v459_v27, %v442_v14 }
 0xc3f   :  { %v475_v29 = vmul.f32 %v463_v19, %v460_v28 }
 0xc41   :  { %476 = vadd.xlane.f32.xlu0 %v475_v29 }
 0xc56   :  { %v473_v31 = vpop.xlane.xlu1 %472 }
 0xc57   :  { %v474_v33 = vsel %vm466_vm6, %v473_v31, %v456_v20 }
 0xc58   :  { %v489_v34 = vmul.f32 %v481_v32, %v474_v33 }
 0xc5a   :  { %490 = vadd.xlane.f32.xlu1 %v489_v34  ;;  %v1081_v35 = vpop.xlane.xlu1 %108 }
 0xc5b   :  { %975 = vrcp.f32 %v1081_v35 }
 0xc68   :  { %v1087_v37 = vpop.eup %975 }
 0xc69   :  { %v114_v38 = vmul.f32 %v1087_v37, %v112_v36 }
 0xc6b   :  { %115 = vst [vmem:[#allocation2 + $0x18] sm:$0xff] %v114_v38 }
 0xc72   :  { %v498_v47 = vld [vmem:[#allocation2 + $0x18] ss:$0 sm:$0xff]  ;;  %v520_v61 = vld [vmem:[#allocation2 + $0x19] ss:$0 sm:$0xff]  ;;  %v542_v17 = vld [vmem:[#allocation2 + $0x1a] ss:$0 sm:$0xff] }
 0xc73   :  { %v499_v48 = vxor.u32 2147483648, %v498_v47  ;;  %v521_v1 = vxor.u32 2147483648, %v520_v61  ;;  %v543_v19 = vxor.u32 2147483648, %v542_v17  ;;  %v564_v31 = vld [vmem:[#allocation2 + $0x1b] ss:$0 sm:$0xff] }
 0xc75   :  { %v515_v54 = vmul.f32 %v499_v48, %v163_v51 }
 0xcc6   :  { %v469_v39 = vpop.xlane.xlu0 %468 }
 0xcc7   :  { %v470_v40 = vsel %vm466_vm6, %v469_v39, %v452_v25 }
 0xcc8   :  { %v485_v41 = vmul.f32 %v481_v32, %v470_v40 }
 0xcca   :  { %486 = vadd.xlane.f32.xlu0 %v485_v41  ;;  %v477_v42 = vpop.xlane.xlu0 %476 }
 0xccb   :  { %v478_v44 = vsel %vm466_vm6, %v477_v42, %v460_v28  ;;  %vm656_vm6 = vcmp.eq.s32.totalorder %v994_v2, 31 }
 0xccc   :  { %v493_v46 = vmul.f32 %v481_v32, %v478_v44 }
 0xcce   :  { %494 = vadd.xlane.f32.xlu0 %v493_v46 }
 0xce3   :  { %v491_v49 = vpop.xlane.xlu1 %490 }
 0xce4   :  { %v492_v50 = vsel %vm484_vm9, %v491_v49, %v474_v33  ;;  %v565_v33 = vxor.u32 2147483648, %v564_v31  ;;  %v586_v49 = vld [vmem:[#allocation2 + $0x1c] ss:$0 sm:$0xff]  ;;  %v120_v31 = vadd.s32 32, %v996_v3 }
 0xce5   :  { %v507_v52 = vmul.f32 %v499_v48, %v492_v50 }
 0xce6   :  { %vm121_vm2 = vcmp.eq.s32.totalorder %v120_v31, %v994_v2  ;;  %vm126_vm4 = vcmp.ge.s32.totalorder %v120_v31, %v994_v2 }
 0xce7   :  { %508 = vadd.xlane.f32.xlu0 %v507_v52  ;;  %vm127_vm5 = vmand %vm126_vm4, %vm53_vm1  ;;  %vm169_vm1 = vcmp.eq.s32.totalorder %v994_v2, %v120_v31 }
 0xceb   :  { %516 = vadd.xlane.f32.xlu0 %v515_v54 }
 0xd53   :  { %v487_v55 = vpop.xlane.xlu0 %486 }
 0xd54   :  { %v488_v56 = vsel %vm484_vm9, %v487_v55, %v470_v40 }
 0xd55   :  { %v503_v57 = vmul.f32 %v499_v48, %v488_v56 }
 0xd57   :  { %v495_v58 = vpop.xlane.xlu0 %494  ;;  %504 = vadd.xlane.f32.xlu1 %v503_v57 }
 0xd58   :  { %v496_v59 = vsel %vm484_vm9, %v495_v58, %v478_v44  ;;  %vm730_vm9 = vcmp.eq.s32.totalorder %v994_v2, 34 }
 0xd59   :  { %v511_v60 = vmul.f32 %v499_v48, %v496_v59 }
 0xd5b   :  { %512 = vadd.xlane.f32.xlu1 %v511_v60 }
 0xd70   :  { %v509_v63 = vpop.xlane.xlu0 %508 }
 0xd71   :  { %v510_v4 = vsel %vm502_vm11, %v509_v63, %v492_v50 }
 0xd72   :  { %v529_v6 = vmul.f32 %v521_v1, %v510_v4 }
 0xd74   :  { %530 = vadd.xlane.f32.xlu0 %v529_v6  ;;  %v517_v8 = vpop.xlane.xlu0 %516 }
 0xd75   :  { %v518_v9 = vsel %vm502_vm11, %v517_v8, %v163_v51  ;;  %v587_v51 = vxor.u32 2147483648, %v586_v49 }
 0xd76   :  { %v537_v10 = vmul.f32 %v521_v1, %v518_v9 }
 0xd78   :  { %538 = vadd.xlane.f32.xlu0 %v537_v10 }
 0xde0   :  { %v505_v11 = vpop.xlane.xlu1 %504 }
 0xde1   :  { %v506_v12 = vsel %vm502_vm11, %v505_v11, %v488_v56 }
 0xde2   :  { %v525_v13 = vmul.f32 %v521_v1, %v506_v12 }
 0xde4   :  { %526 = vadd.xlane.f32.xlu1 %v525_v13  ;;  %v513_v14 = vpop.xlane.xlu1 %512 }
 0xde5   :  { %v514_v15 = vsel %vm502_vm11, %v513_v14, %v496_v59  ;;  %vm782_vm11 = vcmp.eq.s32.totalorder %v994_v2, 36 }
 0xde6   :  { %v533_v16 = vmul.f32 %v521_v1, %v514_v15 }
 0xde8   :  { %534 = vadd.xlane.f32.xlu1 %v533_v16 }
 0xdfd   :  { %v531_v18 = vpop.xlane.xlu0 %530 }
 0xdfe   :  { %v532_v20 = vsel %vm524_vm12, %v531_v18, %v510_v4  ;;  %v608_v4 = vld [vmem:[#allocation2 + $0x1d] ss:$0 sm:$0xff] }
 0xdff   :  { %v551_v21 = vmul.f32 %v543_v19, %v532_v20  ;;  %v609_v8 = vxor.u32 2147483648, %v608_v4 }
 0xe01   :  { %552 = vadd.xlane.f32.xlu0 %v551_v21  ;;  %v539_v22 = vpop.xlane.xlu0 %538 }
 0xe02   :  { %v540_v23 = vsel %vm524_vm12, %v539_v22, %v518_v9 }
 0xe03   :  { %v559_v24 = vmul.f32 %v543_v19, %v540_v23 }
 0xe05   :  { %560 = vadd.xlane.f32.xlu0 %v559_v24 }
 0xe6d   :  { %v527_v25 = vpop.xlane.xlu1 %526 }
 0xe6e   :  { %v528_v26 = vsel %vm524_vm12, %v527_v25, %v506_v12 }
 0xe6f   :  { %v547_v27 = vmul.f32 %v543_v19, %v528_v26 }
 0xe71   :  { %548 = vadd.xlane.f32.xlu1 %v547_v27  ;;  %v535_v28 = vpop.xlane.xlu1 %534 }
 0xe72   :  { %v536_v29 = vsel %vm524_vm12, %v535_v28, %v514_v15  ;;  %vm808_vm12 = vcmp.eq.s32.totalorder %v994_v2, 37 }
 0xe73   :  { %v555_v30 = vmul.f32 %v543_v19, %v536_v29 }
 0xe75   :  { %556 = vadd.xlane.f32.xlu1 %v555_v30 }
 0xe8a   :  { %v553_v32 = vpop.xlane.xlu0 %552 }
 0xe8b   :  { %v554_v34 = vsel %vm546_vm13, %v553_v32, %v532_v20  ;;  %v630_v20 = vld [vmem:[#allocation2 + $0x1e] ss:$0 sm:$0xff] }
 0xe8c   :  { %v573_v36 = vmul.f32 %v565_v33, %v554_v34  ;;  %v631_v22 = vxor.u32 2147483648, %v630_v20 }
 0xe8e   :  { %574 = vadd.xlane.f32.xlu0 %v573_v36  ;;  %v561_v38 = vpop.xlane.xlu0 %560  ;;  %v46_v36 = vld [vmem:[%s1242_s0 + $0x20] sm:$0xff] }
 0xe8f   :  { %v562_v39 = vsel %vm546_vm13, %v561_v38, %v540_v23  ;;  %v123_v38 = vsel %vm121_vm2, %v46_v36, 0.0  ;;  %vm894_vm2 = vweird.f32 %v1049_v62 }
 0xe90   :  { %v581_v40 = vmul.f32 %v565_v33, %v562_v39 }
 0xe92   :  { %582 = vadd.xlane.f32.xlu0 %v581_v40 }
 0xefa   :  { %v549_v41 = vpop.xlane.xlu1 %548 }
 0xefb   :  { %v550_v42 = vsel %vm546_vm13, %v549_v41, %v528_v26 }
 0xefc   :  { %v569_v44 = vmul.f32 %v565_v33, %v550_v42 }
 0xefe   :  { %570 = vadd.xlane.f32.xlu1 %v569_v44  ;;  %v557_v46 = vpop.xlane.xlu1 %556 }
 0xeff   :  { %v558_v47 = vsel %vm546_vm13, %v557_v46, %v536_v29  ;;  %vm834_vm13 = vcmp.eq.s32.totalorder %v994_v2, 38 }
 0xf00   :  { %v577_v48 = vmul.f32 %v565_v33, %v558_v47 }
 0xf02   :  { %578 = vadd.xlane.f32.xlu1 %v577_v48 }
 0xf17   :  { %v575_v50 = vpop.xlane.xlu0 %574 }
 0xf18   :  { %v576_v52 = vsel %vm568_vm14, %v575_v50, %v554_v34 }
 0xf19   :  { %v595_v54 = vmul.f32 %v587_v51, %v576_v52 }
 0xf1b   :  { %596 = vadd.xlane.f32.xlu0 %v595_v54  ;;  %v583_v55 = vpop.xlane.xlu0 %582 }
 0xf1c   :  { %v584_v56 = vsel %vm568_vm14, %v583_v55, %v562_v39  ;;  %v652_v39 = vld [vmem:[#allocation2 + $0x1f] ss:$0 sm:$0xff] }
 0xf1d   :  { %v603_v57 = vmul.f32 %v587_v51, %v584_v56  ;;  %v653_v3 = vxor.u32 2147483648, %v652_v39 }
 0xf1f   :  { %604 = vadd.xlane.f32.xlu0 %v603_v57 }
 0xf87   :  { %v571_v58 = vpop.xlane.xlu1 %570 }
 0xf88   :  { %v572_v59 = vsel %vm568_vm14, %v571_v58, %v550_v42 }
 0xf89   :  { %v591_v60 = vmul.f32 %v587_v51, %v572_v59 }
 0xf8b   :  { %592 = vadd.xlane.f32.xlu1 %v591_v60  ;;  %v579_v61 = vpop.xlane.xlu1 %578 }
 0xf8c   :  { %v580_v63 = vsel %vm568_vm14, %v579_v61, %v558_v47  ;;  %vm860_vm14 = vcmp.eq.s32.totalorder %v994_v2, 39 }
 0xf8d   :  { %v599_v1 = vmul.f32 %v587_v51, %v580_v63 }
 0xf8f   :  { %600 = vadd.xlane.f32.xlu1 %v599_v1 }
 0xfa4   :  { %v597_v6 = vpop.xlane.xlu0 %596 }
 0xfa5   :  { %v598_v9 = vsel %vm590_vm15, %v597_v6, %v576_v52 }
 0xfa6   :  { %v617_v10 = vmul.f32 %v609_v8, %v598_v9 }
 0xfa8   :  { %618 = vadd.xlane.f32.xlu0 %v617_v10  ;;  %v605_v11 = vpop.xlane.xlu0 %604 }
 0xfa9   :  { %v606_v12 = vsel %vm590_vm15, %v605_v11, %v584_v56  ;;  %v128_v56 = vsel %vm127_vm5, %v46_v36, 0.0 }
 0xfaa   :  { %v625_v13 = vmul.f32 %v609_v8, %v606_v12 }
 0xfac   :  { %626 = vadd.xlane.f32.xlu0 %v625_v13 }
0x1014   :  { %v593_v14 = vpop.xlane.xlu1 %592 }
0x1015   :  { %v594_v15 = vsel %vm590_vm15, %v593_v14, %v572_v59 }
0x1016   :  { %v613_v16 = vmul.f32 %v609_v8, %v594_v15 }
0x1018   :  { %614 = vadd.xlane.f32.xlu1 %v613_v16  ;;  %v601_v17 = vpop.xlane.xlu1 %600 }
0x1019   :  { %v602_v18 = vsel %vm590_vm15, %v601_v17, %v580_v63  ;;  %vm888_vm15 = vweird.f32 %v1024_v43 }
0x101a   :  { %v621_v19 = vmul.f32 %v609_v8, %v602_v18 }
0x101c   :  { %622 = vadd.xlane.f32.xlu1 %v621_v19 }
0x1031   :  { %v619_v21 = vpop.xlane.xlu0 %618 }
0x1032   :  { %v620_v23 = vsel %vm612_vm0, %v619_v21, %v598_v9 }
0x1033   :  { %v639_v24 = vmul.f32 %v631_v22, %v620_v23 }
0x1035   :  { %640 = vadd.xlane.f32.xlu0 %v639_v24  ;;  %v627_v25 = vpop.xlane.xlu0 %626 }
0x1036   :  { %v628_v26 = vsel %vm612_vm0, %v627_v25, %v606_v12 }
0x1037   :  { %v647_v27 = vmul.f32 %v631_v22, %v628_v26 }
0x1039   :  { %648 = vadd.xlane.f32.xlu0 %v647_v27 }
0x10a1   :  { %v615_v28 = vpop.xlane.xlu1 %614 }
0x10a2   :  { %v616_v29 = vsel %vm612_vm0, %v615_v28, %v594_v15  ;;  %v170_v15 = vsel %vm169_vm1, -1.0, %v980_v53 }
0x10a3   :  { %v635_v30 = vmul.f32 %v631_v22, %v616_v29 }
0x10a5   :  { %636 = vadd.xlane.f32.xlu1 %v635_v30  ;;  %v623_v32 = vpop.xlane.xlu1 %622 }
0x10a6   :  { %v624_v33 = vsel %vm612_vm0, %v623_v32, %v602_v18  ;;  %vm900_vm0 = vweird.f32 %v1081_v35 }
0x10a7   :  { %v643_v34 = vmul.f32 %v631_v22, %v624_v33 }
0x10a9   :  { %644 = vadd.xlane.f32.xlu1 %v643_v34 }
0x10ad   :  { %124 = vadd.xlane.f32.xlu1 %v123_v38 }
0x10be   :  { %v641_v40 = vpop.xlane.xlu0 %640 }
0x10bf   :  { %v642_v41 = vsel %vm634_vm3, %v641_v40, %v620_v23 }
0x10c0   :  { %v661_v42 = vmul.f32 %v653_v3, %v642_v41 }
0x10c2   :  { %v649_v44 = vpop.xlane.xlu0 %648  ;;  %662 = vadd.xlane.f32.xlu1 %v661_v42 }
0x10c3   :  { %v650_v46 = vsel %vm634_vm3, %v649_v44, %v628_v26 }
0x10c4   :  { %v669_v47 = vmul.f32 %v653_v3, %v650_v46 }
0x10c6   :  { %670 = vadd.xlane.f32.xlu1 %v669_v47 }
0x112e   :  { %v637_v48 = vpop.xlane.xlu1 %636 }
0x112f   :  { %v638_v49 = vsel %vm634_vm3, %v637_v48, %v616_v29 }
0x1130   :  { %v657_v50 = vmul.f32 %v653_v3, %v638_v49 }
0x1132   :  { %658 = vadd.xlane.f32.xlu0 %v657_v50  ;;  %v645_v51 = vpop.xlane.xlu1 %644 }
0x1133   :  { %v646_v52 = vsel %vm634_vm3, %v645_v51, %v624_v33  ;;  %vm883_vm3 = vweird.f32 %v1000_v5 }
0x1134   :  { %v665_v54 = vmul.f32 %v653_v3, %v646_v52 }
0x1136   :  { %666 = vadd.xlane.f32.xlu0 %v665_v54  ;;  %v1117_v55 = vpop.xlane.xlu1 %124 }
0x1137   :  { %977 = vrcp.f32 %v1117_v55  ;;  %vm906_vm4 = vweird.f32 %v1117_v55 }
0x1144   :  { %v1123_v57 = vpop.eup %977 }
0x1145   :  { %v130_v58 = vmul.f32 %v1123_v57, %v128_v56 }
0x1147   :  { %131 = vst [vmem:[#allocation2 + $0x20] sm:$0xff] %v130_v58 }
0x114b   :  { %v663_v59 = vpop.xlane.xlu1 %662 }
0x114c   :  { %v664_v1 = vsel %vm656_vm6, %v663_v59, %v642_v41 }
0x114e   :  { %v674_v60 = vld [vmem:[#allocation2 + $0x20] ss:$0 sm:$0xff]  ;;  %v700_v17 = vld [vmem:[#allocation2 + $0x21] ss:$0 sm:$0xff]  ;;  %v726_v33 = vld [vmem:[#allocation2 + $0x22] ss:$0 sm:$0xff] }
0x114f   :  { %v671_v61 = vpop.xlane.xlu1 %670  ;;  %v675_v63 = vxor.u32 2147483648, %v674_v60  ;;  %v701_v19 = vxor.u32 2147483648, %v700_v17  ;;  %v727_v36 = vxor.u32 2147483648, %v726_v33  ;;  %v752_v54 = vld [vmem:[#allocation2 + $0x23] ss:$0 sm:$0xff] }
0x1150   :  { %v672_v6 = vsel %vm656_vm6, %v671_v61, %v650_v46  ;;  %v753_v56 = vxor.u32 2147483648, %v752_v54 }
0x1151   :  { %v683_v4 = vmul.f32 %v675_v63, %v664_v1  ;;  %v691_v8 = vmul.f32 %v675_v63, %v672_v6  ;;  %v695_v16 = vmul.f32 %v675_v63, %v170_v15 }
0x1153   :  { %684 = vadd.xlane.f32.xlu1 %v683_v4 }
0x1157   :  { %692 = vadd.xlane.f32.xlu1 %v691_v8 }
0x11bb   :  { %v659_v9 = vpop.xlane.xlu0 %658 }
0x11bc   :  { %v660_v13 = vsel %vm656_vm6, %v659_v9, %v638_v49 }
0x11bd   :  { %v679_v14 = vmul.f32 %v675_v63, %v660_v13 }
0x11bf   :  { %v667_v10 = vpop.xlane.xlu0 %666 }
0x11c0   :  { %v668_v11 = vsel %vm656_vm6, %v667_v10, %v646_v52 }
0x11c1   :  { %v687_v12 = vmul.f32 %v675_v63, %v668_v11 }
0x11c3   :  { %688 = vadd.xlane.f32.xlu0 %v687_v12 }
0x11c7   :  { %680 = vadd.xlane.f32.xlu0 %v679_v14 }
0x11cb   :  { %696 = vadd.xlane.f32.xlu0 %v695_v16 }
0x11dc   :  { %v685_v18 = vpop.xlane.xlu1 %684 }
0x11dd   :  { %v686_v20 = vsel %vm678_vm7, %v685_v18, %v664_v1 }
0x11de   :  { %v709_v21 = vmul.f32 %v701_v19, %v686_v20 }
0x11e0   :  { %710 = vadd.xlane.f32.xlu0 %v709_v21  ;;  %v693_v22 = vpop.xlane.xlu1 %692 }
0x11e1   :  { %v694_v23 = vsel %vm678_vm7, %v693_v22, %v672_v6 }
0x11e2   :  { %v717_v24 = vmul.f32 %v701_v19, %v694_v23 }
0x11e4   :  { %718 = vadd.xlane.f32.xlu0 %v717_v24 }
0x124c   :  { %v689_v53 = vpop.xlane.xlu0 %688 }
0x124d   :  { %v690_v25 = vsel %vm678_vm7, %v689_v53, %v668_v11 }
0x124e   :  { %v713_v26 = vmul.f32 %v701_v19, %v690_v25 }
0x1250   :  { %v681_v27 = vpop.xlane.xlu0 %680  ;;  %714 = vadd.xlane.f32.xlu1 %v713_v26 }
0x1251   :  { %v682_v28 = vsel %vm678_vm7, %v681_v27, %v660_v13 }
0x1252   :  { %v705_v29 = vmul.f32 %v701_v19, %v682_v28 }
0x1254   :  { %v697_v30 = vpop.xlane.xlu0 %696  ;;  %706 = vadd.xlane.f32.xlu1 %v705_v29 }
0x1255   :  { %v698_v31 = vsel %vm678_vm7, %v697_v30, %v170_v15  ;;  %v778_v15 = vld [vmem:[#allocation2 + $0x24] ss:$0 sm:$0xff] }
0x1256   :  { %v721_v32 = vmul.f32 %v701_v19, %v698_v31  ;;  %v779_v16 = vxor.u32 2147483648, %v778_v15 }
0x1258   :  { %722 = vadd.xlane.f32.xlu1 %v721_v32 }
0x1269   :  { %v711_v34 = vpop.xlane.xlu0 %710 }
0x126a   :  { %v712_v38 = vsel %vm704_vm8, %v711_v34, %v686_v20 }
0x126b   :  { %v735_v39 = vmul.f32 %v727_v36, %v712_v38 }
0x126d   :  { %736 = vadd.xlane.f32.xlu1 %v735_v39  ;;  %v719_v40 = vpop.xlane.xlu0 %718 }
0x126e   :  { %v720_v3 = vsel %vm704_vm8, %v719_v40, %v694_v23 }
0x126f   :  { %v743_v41 = vmul.f32 %v727_v36, %v720_v3 }
0x1271   :  { %744 = vadd.xlane.f32.xlu1 %v743_v41 }
0x12d9   :  { %v715_v42 = vpop.xlane.xlu1 %714 }
0x12da   :  { %v716_v44 = vsel %vm704_vm8, %v715_v42, %v690_v25 }
0x12db   :  { %v739_v46 = vmul.f32 %v727_v36, %v716_v44 }
0x12dd   :  { %740 = vadd.xlane.f32.xlu0 %v739_v46  ;;  %v707_v47 = vpop.xlane.xlu1 %706 }
0x12de   :  { %v708_v48 = vsel %vm704_vm8, %v707_v47, %v682_v28 }
0x12df   :  { %v731_v49 = vmul.f32 %v727_v36, %v708_v48 }
0x12e1   :  { %732 = vadd.xlane.f32.xlu0 %v731_v49  ;;  %v723_v50 = vpop.xlane.xlu1 %722 }
0x12e2   :  { %v724_v51 = vsel %vm704_vm8, %v723_v50, %v698_v31  ;;  %v804_v31 = vld [vmem:[#allocation2 + $0x25] ss:$0 sm:$0xff] }
0x12e3   :  { %v747_v52 = vmul.f32 %v727_v36, %v724_v51  ;;  %v805_v32 = vxor.u32 2147483648, %v804_v31 }
0x12e5   :  { %748 = vadd.xlane.f32.xlu0 %v747_v52 }
0x12f6   :  { %v737_v58 = vpop.xlane.xlu1 %736 }
0x12f7   :  { %v738_v59 = vsel %vm730_vm9, %v737_v58, %v712_v38 }
0x12f8   :  { %v761_v60 = vmul.f32 %v753_v56, %v738_v59 }
0x12fa   :  { %762 = vadd.xlane.f32.xlu0 %v761_v60  ;;  %v745_v61 = vpop.xlane.xlu1 %744 }
0x12fb   :  { %v746_v63 = vsel %vm730_vm9, %v745_v61, %v720_v3 }
0x12fc   :  { %v769_v1 = vmul.f32 %v753_v56, %v746_v63 }
0x12fe   :  { %770 = vadd.xlane.f32.xlu0 %v769_v1 }
0x1366   :  { %v741_v4 = vpop.xlane.xlu0 %740 }
0x1367   :  { %v742_v6 = vsel %vm730_vm9, %v741_v4, %v716_v44 }
0x1368   :  { %v765_v8 = vmul.f32 %v753_v56, %v742_v6 }
0x136a   :  { %766 = vadd.xlane.f32.xlu1 %v765_v8  ;;  %v733_v9 = vpop.xlane.xlu0 %732 }
0x136b   :  { %v734_v10 = vsel %vm730_vm9, %v733_v9, %v708_v48 }
0x136c   :  { %v757_v11 = vmul.f32 %v753_v56, %v734_v10 }
0x136e   :  { %758 = vadd.xlane.f32.xlu1 %v757_v11  ;;  %v749_v12 = vpop.xlane.xlu0 %748 }
0x136f   :  { %v750_v13 = vsel %vm730_vm9, %v749_v12, %v724_v51  ;;  %v830_v51 = vld [vmem:[#allocation2 + $0x26] ss:$0 sm:$0xff] }
0x1370   :  { %v773_v14 = vmul.f32 %v753_v56, %v750_v13  ;;  %v831_v52 = vxor.u32 2147483648, %v830_v51 }
0x1372   :  { %774 = vadd.xlane.f32.xlu1 %v773_v14 }
0x1383   :  { %v763_v17 = vpop.xlane.xlu0 %762 }
0x1384   :  { %v764_v18 = vsel %vm756_vm10, %v763_v17, %v738_v59 }
0x1385   :  { %v787_v19 = vmul.f32 %v779_v16, %v764_v18 }
0x1387   :  { %788 = vadd.xlane.f32.xlu1 %v787_v19  ;;  %v771_v20 = vpop.xlane.xlu0 %770 }
0x1388   :  { %v772_v21 = vsel %vm756_vm10, %v771_v20, %v746_v63 }
0x1389   :  { %v795_v22 = vmul.f32 %v779_v16, %v772_v21 }
0x138b   :  { %796 = vadd.xlane.f32.xlu1 %v795_v22 }
0x13f3   :  { %v767_v23 = vpop.xlane.xlu1 %766 }
0x13f4   :  { %v768_v24 = vsel %vm756_vm10, %v767_v23, %v742_v6 }
0x13f5   :  { %v791_v53 = vmul.f32 %v779_v16, %v768_v24 }
0x13f7   :  { %792 = vadd.xlane.f32.xlu0 %v791_v53  ;;  %v759_v25 = vpop.xlane.xlu1 %758 }
0x13f8   :  { %v760_v26 = vsel %vm756_vm10, %v759_v25, %v734_v10 }
0x13f9   :  { %v783_v27 = vmul.f32 %v779_v16, %v760_v26 }
0x13fb   :  { %784 = vadd.xlane.f32.xlu0 %v783_v27  ;;  %v775_v28 = vpop.xlane.xlu1 %774 }
0x13fc   :  { %v776_v29 = vsel %vm756_vm10, %v775_v28, %v750_v13  ;;  %v856_v13 = vld [vmem:[#allocation2 + $0x27] ss:$0 sm:$0xff] }
0x13fd   :  { %v799_v30 = vmul.f32 %v779_v16, %v776_v29  ;;  %v857_v14 = vxor.u32 2147483648, %v856_v13 }
0x13ff   :  { %800 = vadd.xlane.f32.xlu0 %v799_v30 }
0x1410   :  { %v789_v33 = vpop.xlane.xlu1 %788 }
0x1411   :  { %v790_v34 = vsel %vm782_vm11, %v789_v33, %v764_v18 }
0x1412   :  { %v813_v36 = vmul.f32 %v805_v32, %v790_v34 }
0x1414   :  { %814 = vadd.xlane.f32.xlu0 %v813_v36  ;;  %v797_v38 = vpop.xlane.xlu1 %796 }
0x1415   :  { %v798_v39 = vsel %vm782_vm11, %v797_v38, %v772_v21 }
0x1416   :  { %v821_v40 = vmul.f32 %v805_v32, %v798_v39 }
0x1418   :  { %822 = vadd.xlane.f32.xlu0 %v821_v40 }
0x1480   :  { %v793_v3 = vpop.xlane.xlu0 %792 }
0x1481   :  { %v794_v41 = vsel %vm782_vm11, %v793_v3, %v768_v24 }
0x1482   :  { %v817_v42 = vmul.f32 %v805_v32, %v794_v41 }
0x1484   :  { %818 = vadd.xlane.f32.xlu1 %v817_v42  ;;  %v785_v44 = vpop.xlane.xlu0 %784 }
0x1485   :  { %v786_v46 = vsel %vm782_vm11, %v785_v44, %v760_v26 }
0x1486   :  { %v809_v47 = vmul.f32 %v805_v32, %v786_v46 }
0x1488   :  { %810 = vadd.xlane.f32.xlu1 %v809_v47  ;;  %v801_v48 = vpop.xlane.xlu0 %800 }
0x1489   :  { %v802_v49 = vsel %vm782_vm11, %v801_v48, %v776_v29 }
0x148a   :  { %v825_v50 = vmul.f32 %v805_v32, %v802_v49 }
0x148c   :  { %826 = vadd.xlane.f32.xlu1 %v825_v50 }
0x149d   :  { %v815_v54 = vpop.xlane.xlu0 %814 }
0x149e   :  { %v816_v56 = vsel %vm808_vm12, %v815_v54, %v790_v34 }
0x149f   :  { %v839_v58 = vmul.f32 %v831_v52, %v816_v56 }
0x14a1   :  { %840 = vadd.xlane.f32.xlu1 %v839_v58  ;;  %v823_v59 = vpop.xlane.xlu0 %822 }
0x14a2   :  { %v824_v60 = vsel %vm808_vm12, %v823_v59, %v798_v39 }
0x14a3   :  { %v847_v61 = vmul.f32 %v831_v52, %v824_v60 }
0x14a5   :  { %848 = vadd.xlane.f32.xlu1 %v847_v61 }
0x150d   :  { %v819_v63 = vpop.xlane.xlu1 %818 }
0x150e   :  { %v820_v1 = vsel %vm808_vm12, %v819_v63, %v794_v41 }
0x150f   :  { %v843_v4 = vmul.f32 %v831_v52, %v820_v1 }
0x1511   :  { %844 = vadd.xlane.f32.xlu0 %v843_v4  ;;  %v811_v6 = vpop.xlane.xlu1 %810 }
0x1512   :  { %v812_v8 = vsel %vm808_vm12, %v811_v6, %v786_v46 }
0x1513   :  { %v835_v9 = vmul.f32 %v831_v52, %v812_v8 }
0x1515   :  { %836 = vadd.xlane.f32.xlu0 %v835_v9  ;;  %v827_v10 = vpop.xlane.xlu1 %826 }
0x1516   :  { %v828_v11 = vsel %vm808_vm12, %v827_v10, %v802_v49 }
0x1517   :  { %v851_v12 = vmul.f32 %v831_v52, %v828_v11 }
0x1519   :  { %852 = vadd.xlane.f32.xlu0 %v851_v12 }
0x152a   :  { %v841_v15 = vpop.xlane.xlu1 %840 }
0x152b   :  { %v842_v16 = vsel %vm834_vm13, %v841_v15, %v816_v56 }
0x152c   :  { %v865_v17 = vmul.f32 %v857_v14, %v842_v16 }
0x152e   :  { %866 = vadd.xlane.f32.xlu0 %v865_v17  ;;  %v849_v18 = vpop.xlane.xlu1 %848 }
0x152f   :  { %v850_v19 = vsel %vm834_vm13, %v849_v18, %v824_v60 }
0x1530   :  { %v873_v20 = vmul.f32 %v857_v14, %v850_v19 }
0x1532   :  { %874 = vadd.xlane.f32.xlu0 %v873_v20 }
0x159a   :  { %v845_v21 = vpop.xlane.xlu0 %844 }
0x159b   :  { %v846_v22 = vsel %vm834_vm13, %v845_v21, %v820_v1 }
0x159c   :  { %v869_v23 = vmul.f32 %v857_v14, %v846_v22 }
0x159e   :  { %870 = vadd.xlane.f32.xlu1 %v869_v23  ;;  %v837_v24 = vpop.xlane.xlu0 %836 }
0x159f   :  { %v838_v53 = vsel %vm834_vm13, %v837_v24, %v812_v8 }
0x15a0   :  { %v861_v25 = vmul.f32 %v857_v14, %v838_v53 }
0x15a2   :  { %862 = vadd.xlane.f32.xlu1 %v861_v25  ;;  %v853_v26 = vpop.xlane.xlu0 %852 }
0x15a3   :  { %v854_v27 = vsel %vm834_vm13, %v853_v26, %v828_v11 }
0x15a4   :  { %v877_v28 = vmul.f32 %v857_v14, %v854_v27 }
0x15a6   :  { %878 = vadd.xlane.f32.xlu1 %v877_v28 }
0x15b7   :  { %v867_v29 = vpop.xlane.xlu0 %866 }
0x15b8   :  { %v868_v30 = vsel %vm860_vm14, %v867_v29, %v842_v16 }
0x15b9   :  { %v887_v31 = vmul.f32 %v1030_v45, %v868_v30 }
0x15bb   :  { %v889_v32 = vsel %vm888_vm15, %v868_v30, %v887_v31  ;;  %v875_v33 = vpop.xlane.xlu0 %874 }
0x15bc   :  { %949 = vst [vmem:[%s1243_s1 + $0x8] sm:$0xff] %v889_v32  ;;  %v876_v34 = vsel %vm860_vm14, %v875_v33, %v850_v19 }
0x15bd   :  { %v899_v36 = vmul.f32 %v1087_v37, %v876_v34 }
0x15bf   :  { %v901_v38 = vsel %vm900_vm0, %v876_v34, %v899_v36 }
0x15c0   :  { %953 = vst [vmem:[%s1243_s1 + $0x18] sm:$0xff] %v901_v38 }
0x1627   :  { %v871_v45 = vpop.xlane.xlu1 %870 }
0x1628   :  { %v872_v43 = vsel %vm860_vm14, %v871_v45, %v846_v22 }
0x1629   :  { %v893_v39 = vmul.f32 %v1055_v0, %v872_v43 }
0x162b   :  { %v895_v40 = vsel %vm894_vm2, %v872_v43, %v893_v39  ;;  %v863_v3 = vpop.xlane.xlu1 %862 }
0x162c   :  { %951 = vst [vmem:[%s1243_s1 + $0x10] sm:$0xff] %v895_v40  ;;  %v864_v35 = vsel %vm860_vm14, %v863_v3, %v838_v53 }
0x162d   :  { %v882_v37 = vmul.f32 %v1008_v7, %v864_v35 }
0x162f   :  { %v884_v41 = vsel %vm883_vm3, %v864_v35, %v882_v37  ;;  %v879_v42 = vpop.xlane.xlu1 %878 }
0x1630   :  { %947 = vst [vmem:[%s1243_s1] sm:$0xff] %v884_v41  ;;  %v880_v62 = vsel %vm860_vm14, %v879_v42, %v854_v27 }
0x1631   :  { %v905_v0 = vmul.f32 %v1123_v57, %v880_v62 }
0x1633   :  { %v907_v44 = vsel %vm906_vm4, %v880_v62, %v905_v0 }
0x1634   :  { %955 = vst [vmem:[%s1243_s1 + $0x20] sm:$0xff] %v907_v44 }

// kernel: _lambda_.1
= control target key start
LH: loop header
LB: loop body
LE: loop exit
PB: predicated region body
PF: predicated region fallthrough
CT: control target
= control target key end

     0   :  { %11 = vsyncpa [#allocation3], 0  ;;  %s603_s0 = inlined_call_operand.vmem [shape: f32[32], index: 0, kind: input, shape index: {}]   ;;  %s604_s1 = inlined_call_operand.vmem [shape: f32[48,1], index: 1, kind: input, shape index: {}]   ;;  %s605_s2 = inlined_call_operand.vmem [shape: f32[1,128], index: 2, kind: input, shape index: {}]   ;;  %s606_s3 = inlined_call_operand.vmem [shape: f32[40,40], index: 3, kind: output, shape index: {0}]   ;;  %s607_s4 = inlined_call_operand.vmem [shape: f32[8,40], index: 4, kind: output, shape index: {1}]   ;;  %s608_s5 = inlined_call_operand.vmem [shape: f32[8,1], index: 5, kind: output, shape index: {2}]  }
   0x1   :  { %s18_s20 = sshll.u32 %s603_s0, 4  ;;  %s19_s20 = int_to_ptr.vmem [resolvable:$true] %s18_s20 }
   0x2   :  { %s385_s21 = scalar_lea.vmem %s19_s20, 16  ;;  %p390_p1 = scmp.lt.s32.totalorder %s19_s20, %s19_s20 }
   0x3   :  { %p386_p0 = scmp.ne.s32.totalorder %s19_s20, %s385_s21  ;;  %p391_p2 = scmp.lt.s32.totalorder %s385_s21, %s385_s21 }
   0x5   :  { %p392_p3 = por %p391_p2, %p390_p1 }
   0x7   :  { %p393_p4 = pnand %p392_p3, %p386_p0 }
   0x9   :  { %396 = shalt.err (!%p393_p4)
}
   0xa   :  { %s399_s22 = smov [#allocation2]  }
   0xb   :  { %21 = dma.vmem_to_smem %s19_s20, 16, %s399_s22, [#allocation3]  }
   0xc   :  { %397 = dma.done.wait [#allocation3], 16  }
   0xd   :  { %398 = vsyncadd [#allocation3], 4294967280 }
   0xe   :  { %29 = sfence }
   0xf   :  { %v185_v0 = vld [vmem:[%s604_s1] sm:$0xff]  ;;  %v187_v1 = vld [vmem:[%s604_s1 + $0x10] sm:$0xff]  ;;  %s34_s0 = sld [smem:[#allocation2]]  ;;  %v400_v2 = vmov 0   ;;  %v186_v3 = vld [vmem:[%s604_s1 + $0x8] sm:$0xff]  ;;  %vm280_vm6 = vcmask 326656  }
  0x10   :  { %351 = vset.pattern.permute.xlu0 %v400_v2  ;;  %352 = vset.pattern.permute.xlu1 %v400_v2  ;;  %s321_s27 = sld [smem:[#allocation2 + $0x1]]  ;;  %v188_v4 = vld [vmem:[%s604_s1 + $0x18] sm:$0xff]  ;;  %v451_v5 = vld [vmem:[%s605_s2] sm:$0x1]  ;;  %v190_v8 = vld [vmem:[%s604_s1 + $0x28] sm:$0xff]  ;;  %vm303_vm7 = vcmask 7168  }
  0x11   :  { %193 = vperm.xlu0 %351, %v185_v0   ;;  %203 = vperm.xlu1 %352, %v187_v1   ;;  %s322_s28 = sld [smem:[#allocation2 + $0x2]]  ;;  %v189_v7 = vld [vmem:[%s604_s1 + $0x20] sm:$0xff] }
  0x12   :  { %s323_s8 = sld [smem:[#allocation2 + $0x3]] }
  0x13   :  { %s324_s9 = sld [smem:[#allocation2 + $0x4]] }
  0x14   :  { %s446_s10 = sld [smem:[#allocation2 + $0x5]] }
  0x15   :  { %198 = vperm.xlu0 %351, %v186_v3   ;;  %208 = vperm.xlu1 %352, %v188_v4   ;;  %s326_s13 = sld [smem:[#allocation2 + $0x6]]  ;;  %v63_v6 = vstv %s34_s0 }
  0x16   :  { %s327_s18 = sld [smem:[#allocation2 + $0x7]]  ;;  %v68_v9 = vstv %s321_s27  ;;  %v64_v11 = vmul.f32 %v63_v6, %v451_v5 }
  0x17   :  { %s328_s19 = sld [smem:[#allocation2 + $0x8]]  ;;  %v73_v10 = vstv %s322_s28  ;;  %v69_v13 = vmul.f32 %v68_v9, %v451_v5 }
  0x18   :  { %s329_s20 = sld [smem:[#allocation2 + $0x9]]  ;;  %v78_v12 = vstv %s323_s8  ;;  %v74_v15 = vmul.f32 %v73_v10, %v451_v5 }
  0x19   :  { %213 = vperm.xlu0 %351, %v189_v7   ;;  %288 = vperm.xlu1 %352, %v190_v8   ;;  %s330_s2 = sld [smem:[#allocation2 + $0xa]]  ;;  %v83_v14 = vstv %s324_s9  ;;  %v79_v18 = vmul.f32 %v78_v12, %v451_v5 }
  0x1a   :  { %s331_s21 = sld [smem:[#allocation2 + $0xb]]  ;;  %v88_v16 = vstv %s446_s10  ;;  %v84_v21 = vmul.f32 %v83_v14, %v451_v5 }
  0x1b   :  { %v65_v17 = vstv %s326_s13  ;;  %s465_s1 = sld [smem:[#allocation2 + $0xc]]  ;;  %v89_v24 = vmul.f32 %v88_v16, %v451_v5 }
  0x1c   :  { %v66_v19 = vadd.f32 %v65_v17, %v64_v11  ;;  %v70_v20 = vstv %s327_s18  ;;  %s468_s22 = sld [smem:[#allocation2 + $0xd]] }
  0x1d   :  { %v71_v22 = vadd.f32 %v70_v20, %v69_v13  ;;  %v75_v23 = vstv %s328_s19  ;;  %s470_s23 = sld [smem:[#allocation2 + $0xe]] }
  0x1e   :  { %353 = vtanh.f32 %v66_v19  ;;  %v76_v25 = vadd.f32 %v75_v23, %v74_v15  ;;  %v80_v26 = vstv %s329_s20  ;;  %s472_s24 = sld [smem:[#allocation2 + $0xf]] }
  0x1f   :  { %355 = vtanh.f32 %v71_v22  ;;  %v81_v27 = vadd.f32 %v80_v26, %v79_v18  ;;  %v85_v28 = vstv %s330_s2  ;;  %s474_s25 = sld [smem:[#allocation2 + $0x10]]  ;;  %v146_v26 = vlaneseq }
  0x20   :  { %357 = vtanh.f32 %v76_v25  ;;  %v86_v29 = vadd.f32 %v85_v28, %v84_v21  ;;  %v90_v30 = vstv %s331_s21  ;;  %s476_s26 = sld [smem:[#allocation2 + $0x11]] }
  0x21   :  { %359 = vtanh.f32 %v81_v27  ;;  %v91_v31 = vadd.f32 %v90_v30, %v89_v24  ;;  %s478_s0 = sld [smem:[#allocation2 + $0x12]]  ;;  %v93_v32 = vstv %s465_s1  ;;  %v502_v27 = vshrl.u32 %v146_v26, 7 }
  0x22   :  { %361 = vtanh.f32 %v86_v29  ;;  %s480_s27 = sld [smem:[#allocation2 + $0x13]]  ;;  %v113_v33 = vstv %s468_s22  ;;  %v507_v29 = vand.u32 127, %v146_v26 }
  0x23   :  { %363 = vtanh.f32 %v91_v31  ;;  %s482_s28 = sld [smem:[#allocation2 + $0x14]]  ;;  %v97_v34 = vstv %s470_s23  ;;  %v505_v28 = vadd.s32 8, %v502_v27  ;;  %v164_v30 = vsub.s32 0, %v502_v27 }
  0x24   :  { %s484_s29 = sld [smem:[#allocation2 + $0x15]]  ;;  %v117_v35 = vstv %s472_s24  ;;  %v511_v31 = vadd.s32 32, %v502_v27  ;;  %vm155_vm1 = vcmp.eq.s32.totalorder %v502_v27, %v507_v29 }
  0x25   :  { %s344_s30 = sld [smem:[#allocation2 + $0x18]]  ;;  %v100_v37 = vstv %s474_s25  ;;  %vm156_vm0 = vcmp.eq.s32.totalorder %v505_v28, %v507_v29 }
  0x26   :  { %s345_s6 = sld [smem:[#allocation2 + $0x19]]  ;;  %v120_v41 = vstv %s476_s26  ;;  %vm159_vm2 = vcmp.eq.s32.totalorder %v511_v31, %v507_v29 }
  0x27   :  { %s486_s7 = sld [smem:[#allocation2 + $0x16]]  ;;  %v103_v45 = vstv %s478_s0 }
  0x28   :  { %s490_s8 = sld [smem:[#allocation2 + $0x17]]  ;;  %v123_v51 = vstv %s480_s27 }
  0x29   :  { %v106_v53 = vstv %s482_s28  ;;  %s346_s9 = sld [smem:[#allocation2 + $0x1a]] }
  0x2a   :  { %v126_v58 = vstv %s484_s29  ;;  %s347_s10 = sld [smem:[#allocation2 + $0x1b]] }
  0x2b   :  { %v354_v36 = vpop.eup %353  ;;  %v95_v43 = vstv %s344_s30  ;;  %s348_s11 = sld [smem:[#allocation2 + $0x1c]] }
  0x2c   :  { %v356_v38 = vpop.eup %355  ;;  %v94_v39 = vmul.f32 %v354_v36, %v93_v32  ;;  %v114_v40 = vmul.f32 %v354_v36, %v113_v33  ;;  %v115_v50 = vstv %s345_s6  ;;  %v514_v32 = vadd.s32 16, %v502_v27  ;;  %s318_s12 = sld [smem:[#allocation2 + $0x1d]] }
  0x2d   :  { %v358_v42 = vpop.eup %357  ;;  %v98_v44 = vmul.f32 %v356_v38, %v97_v34  ;;  %v118_v46 = vmul.f32 %v356_v38, %v117_v35  ;;  %v109_v60 = vstv %s486_s7  ;;  %v527_v35 = vadd.s32 24, %v502_v27  ;;  %s319_s13 = sld [smem:[#allocation2 + $0x1e]] }
  0x2e   :  { %v360_v47 = vpop.eup %359  ;;  %v96_v48 = vadd.f32 %v95_v43, %v94_v39  ;;  %v101_v49 = vmul.f32 %v358_v42, %v100_v37  ;;  %v116_v54 = vadd.f32 %v115_v50, %v114_v40  ;;  %v121_v55 = vmul.f32 %v358_v42, %v120_v41  ;;  %s320_s14 = sld [smem:[#allocation2 + $0x1f]] }
  0x2f   :  { %v362_v52 = vpop.eup %361  ;;  %v104_v57 = vmul.f32 %v360_v47, %v103_v45  ;;  %v124_v62 = vmul.f32 %v360_v47, %v123_v51  ;;  %v129_v1 = vstv %s490_s8  ;;  %v133_v13 = vstv %s346_s9 }
  0x30   :  { %v99_v56 = vadd.f32 %v98_v44, %v96_v48  ;;  %v364_v59 = vpop.eup %363  ;;  %v119_v61 = vadd.f32 %v118_v46, %v116_v54  ;;  %v107_v0 = vmul.f32 %v362_v52, %v106_v53  ;;  %v127_v3 = vmul.f32 %v362_v52, %v126_v58 }
  0x31   :  { %v110_v6 = vmul.f32 %v364_v59, %v109_v60  ;;  %v130_v8 = vmul.f32 %v364_v59, %v129_v1  ;;  %v137_v14 = vstv %s347_s10  ;;  %v135_v16 = vstv %s348_s11 }
  0x32   :  { %v102_v63 = vadd.f32 %v101_v49, %v99_v56  ;;  %v122_v2 = vadd.f32 %v121_v55, %v119_v61  ;;  %vm157_vm3 = vcmp.eq.s32.totalorder %v514_v32, %v507_v29  ;;  %vm158_vm4 = vcmp.eq.s32.totalorder %v527_v35, %v507_v29 }
  0x33   :  { %v152_v40 = vadd.s32 40, %v502_v27  ;;  %v220_v45 = vrot.slane %v451_v5, %v164_v30  ;;  %v232_v54 = vstv %s318_s12 }
  0x34   :  { %v105_v4 = vadd.f32 %v104_v57, %v102_v63  ;;  %v125_v7 = vadd.f32 %v124_v62, %v122_v2 }
  0x35   :  { %vm160_vm5 = vcmp.eq.s32.totalorder %v152_v40, %v507_v29 }
  0x36   :  { %v108_v9 = vadd.f32 %v107_v0, %v105_v4  ;;  %v128_v10 = vadd.f32 %v127_v3, %v125_v7 }
  0x38   :  { %v111_v11 = vadd.f32 %v110_v6, %v108_v9  ;;  %v131_v12 = vadd.f32 %v130_v8, %v128_v10 }
  0x3a   :  { %365 = vtanh.f32 %v111_v11 }
  0x3b   :  { %367 = vtanh.f32 %v131_v12 }
  0x47   :  { %v366_v15 = vpop.eup %365 }
  0x48   :  { %v368_v17 = vpop.eup %367  ;;  %v134_v18 = vmul.f32 %v366_v15, %v133_v13 }
  0x49   :  { %v138_v19 = vmul.f32 %v368_v17, %v137_v14 }
  0x4a   :  { %v136_v20 = vadd.f32 %v135_v16, %v134_v18 }
  0x4c   :  { %v139_v21 = vadd.f32 %v138_v19, %v136_v20  ;;  %v258_v19 = vstv %s319_s13  ;;  %v269_v20 = vstv %s320_s14 }
  0x4d   :  { %v274_v28 = vsel %vm159_vm2, %v269_v20, 0.0  ;;  %v272_v27 = vsel %vm157_vm3, %v269_v20, 0.0 }
  0x4e   :  { %v140_v22 = vsub.f32 0.0, %v139_v21 }
  0x50   :  { %v141_v23 = vmul.f32 1.442695, %v140_v22 }
  0x52   :  { %369 = vpow2.f32 %v141_v23 }
  0x5f   :  { %v370_v24 = vpop.eup %369 }
  0x60   :  { %v143_v25 = vadd.f32 1.0, %v370_v24 }
  0x62   :  { %371 = vrcp.f32 %v143_v25 }
  0x6f   :  { %v372_v33 = vpop.eup %371 }
  0x70   :  { %v520_v34 = vrot.slane %v372_v33, %v164_v30 }
  0x72   :  { %v168_v36 = vsel %vm156_vm0, %v520_v34, 0.0  ;;  %v167_v37 = vsel %vm155_vm1, %v520_v34, 0.0  ;;  %v171_v38 = vsel %vm159_vm2, %v520_v34, 0.0  ;;  %v169_v39 = vsel %vm157_vm3, %v520_v34, 0.0 }
  0x73   :  { %175 = vadd.xlane.f32.xlu1 %v168_v36  ;;  %173 = vadd.xlane.f32.xlu0 %v167_v37  ;;  %v170_v41 = vsel %vm158_vm4, %v520_v34, 0.0  ;;  %v172_v42 = vsel %vm160_vm5, %v520_v34, 0.0  ;;  %v271_v36 = vsel %vm156_vm0, %v269_v20, 0.0  ;;  %v270_v37 = vsel %vm155_vm1, %v269_v20, 0.0 }
  0x77   :  { %181 = vadd.xlane.f32.xlu1 %v171_v38  ;;  %177 = vadd.xlane.f32.xlu0 %v169_v39 }
  0x7b   :  { %179 = vadd.xlane.f32.xlu0 %v170_v41 }
  0x7f   :  { %183 = vadd.xlane.f32.xlu0 %v172_v42 }
  0x8c   :  { %v194_v43 = vpop.permute.xlu0 %193  ;;  %v204_v46 = vpop.permute.xlu1 %203 }
  0x8d   :  { %v222_v47 = vsub.f32 %v194_v43, %v220_v45  ;;  %v224_v50 = vsub.f32 %v204_v46, %v220_v45 }
  0x8f   :  { %v227_v51 = vmul.f32 %v222_v47, %v222_v47  ;;  %v229_v56 = vmul.f32 %v224_v50, %v224_v50 }
  0x90   :  { %v199_v44 = vpop.permute.xlu0 %198  ;;  %v209_v52 = vpop.permute.xlu1 %208 }
  0x91   :  { %v223_v48 = vsub.f32 %v199_v44, %v220_v45  ;;  %v233_v57 = vmul.f32 %v232_v54, %v227_v51  ;;  %v225_v60 = vsub.f32 %v209_v52, %v220_v45  ;;  %v235_v62 = vmul.f32 %v232_v54, %v229_v56 }
  0x93   :  { %v228_v55 = vmul.f32 %v223_v48, %v223_v48  ;;  %v243_v63 = vmul.f32 -0.5, %v233_v57  ;;  %v230_v1 = vmul.f32 %v225_v60, %v225_v60  ;;  %v245_v3 = vmul.f32 -0.5, %v235_v62 }
  0x94   :  { %v214_v49 = vpop.permute.xlu0 %213  ;;  %v289_v61 = vpop.permute.xlu1 %288 }
  0x95   :  { %v226_v53 = vsub.f32 %v214_v49, %v220_v45  ;;  %v234_v59 = vmul.f32 %v232_v54, %v228_v55  ;;  %v291_v2 = vsub.f32 %v289_v61, %v220_v45  ;;  %v248_v4 = vmul.f32 1.442695, %v243_v63 }
  0x96   :  { %v236_v8 = vmul.f32 %v232_v54, %v230_v1  ;;  %v252_v10 = vmul.f32 1.442695, %v245_v3  ;;  %v273_v55 = vsel %vm158_vm4, %v269_v20, 0.0 }
  0x97   :  { %v231_v58 = vmul.f32 %v226_v53, %v226_v53  ;;  %v244_v0 = vmul.f32 -0.5, %v234_v59  ;;  %v292_v9 = vmul.f32 %v291_v2, %v291_v2  ;;  %373 = vpow2.f32 %v248_v4 }
  0x98   :  { %v246_v12 = vmul.f32 -0.5, %v236_v8 }
  0x99   :  { %v237_v5 = vmul.f32 %v232_v54, %v231_v58  ;;  %v250_v7 = vmul.f32 1.442695, %v244_v0  ;;  %v293_v13 = vmul.f32 %v292_v9, %v232_v54 }
  0x9a   :  { %v254_v14 = vmul.f32 1.442695, %v246_v12 }
  0x9b   :  { %v247_v6 = vmul.f32 -0.5, %v237_v5  ;;  %375 = vpow2.f32 %v250_v7  ;;  %v295_v15 = vmul.f32 -0.5, %v293_v13 }
  0x9c   :  { %377 = vpow2.f32 %v252_v10 }
  0x9d   :  { %v256_v11 = vmul.f32 1.442695, %v247_v6  ;;  %v296_v16 = vmul.f32 1.442695, %v295_v15 }
  0x9f   :  { %379 = vpow2.f32 %v256_v11 }
  0xa0   :  { %381 = vpow2.f32 %v254_v14 }
  0xa1   :  { %383 = vpow2.f32 %v296_v16 }
  0xa4   :  { %v374_v17 = vpop.eup %373 }
  0xa5   :  { %v259_v33 = vmul.f32 %v374_v17, %v258_v19 }
  0xa8   :  { %v376_v18 = vpop.eup %375 }
  0xa9   :  { %v378_v21 = vpop.eup %377  ;;  %v260_v26 = vmul.f32 %v376_v18, %v258_v19 }
  0xaa   :  { %v261_v43 = vmul.f32 %v378_v21, %v258_v19 }
  0xac   :  { %v380_v24 = vpop.eup %379 }
  0xad   :  { %v263_v41 = vmul.f32 %v380_v24, %v258_v19  ;;  %v382_v48 = vpop.eup %381 }
  0xae   :  { %v262_v54 = vmul.f32 %v382_v48, %v258_v19  ;;  %v384_v32 = vpop.eup %383 }
  0xaf   :  { %v298_v60 = vmul.f32 %v384_v32, %v258_v19 }
  0xfc   :  { %v176_v22 = vpop.xlane.xlu1 %175  ;;  %v174_v23 = vpop.xlane.xlu0 %173 }
  0xfd   :  { %v239_v25 = vmul.f32 %v176_v22, %v520_v34  ;;  %v238_v30 = vmul.f32 %v174_v23, %v520_v34 }
  0xff   :  { %v265_v38 = vmul.f32 %v260_v26, %v239_v25  ;;  %v264_v39 = vmul.f32 %v259_v33, %v238_v30 }
 0x100   :  { %v182_v40 = vpop.xlane.xlu1 %181  ;;  %v178_v42 = vpop.xlane.xlu0 %177 }
 0x101   :  { %v276_v44 = vadd.f32 %v271_v36, %v265_v38  ;;  %v275_v45 = vadd.f32 %v270_v37, %v264_v39  ;;  %v242_v46 = vmul.f32 %v182_v40, %v520_v34  ;;  %v240_v47 = vmul.f32 %v178_v42, %v520_v34 }
 0x103   :  { %282 = vst.msk [vmem:[%s606_s3 + $0x8] sm:$0xff] %vm280_vm6, %v276_v44  ;;  %281 = vst.msk [vmem:[%s606_s3] sm:$0xff] %vm280_vm6, %v275_v45  ;;  %v268_v49 = vmul.f32 %v263_v41, %v242_v46  ;;  %v266_v50 = vmul.f32 %v261_v43, %v240_v47 }
 0x104   :  { %v180_v51 = vpop.xlane.xlu0 %179 }
 0x105   :  { %v279_v52 = vadd.f32 %v274_v28, %v268_v49  ;;  %v277_v31 = vadd.f32 %v272_v27, %v266_v50  ;;  %v241_v53 = vmul.f32 %v180_v51, %v520_v34 }
 0x107   :  { %285 = vst.msk [vmem:[%s606_s3 + $0x20] sm:$0xff] %vm280_vm6, %v279_v52  ;;  %283 = vst.msk [vmem:[%s606_s3 + $0x10] sm:$0xff] %vm280_vm6, %v277_v31  ;;  %v267_v56 = vmul.f32 %v262_v54, %v241_v53 }
 0x108   :  { %v184_v57 = vpop.xlane.xlu0 %183 }
 0x109   :  { %v278_v58 = vadd.f32 %v273_v55, %v267_v56  ;;  %v294_v59 = vmul.f32 %v184_v57, %v520_v34  ;;  %v301_v61 = vmul.f32 %v184_v57, %v184_v57 }
 0x10b   :  { %284 = vst.msk [vmem:[%s606_s3 + $0x18] sm:$0xff] %vm280_vm6, %v278_v58  ;;  %v299_v29 = vmul.f32 %v298_v60, %v294_v59  ;;  %v302_v35 = vmul.f32 %v301_v61, %v258_v19 }
 0x10d   :  { %300 = vst.msk [vmem:[%s607_s4] sm:$0xff] %vm280_vm6, %v299_v29 }
 0x10e   :  { %304 = vst.msk [vmem:[%s608_s5] sm:$0xff] %vm303_vm7, %v302_v35 }
 0x10f   :  { %317 = vsyncpa [#allocation3], 1 }

</bundles_post_ra>
